<compile_context>
chip_gen: v7x
topology: tpu7x:2x2x1
jax: 0.10.0
libtpu: 0.0.40
codegen_flags: <defaults>
</compile_context>

<pallas_src>
import functools

import jax
import jax.numpy as jnp
from jax import lax
from jax.experimental import pallas as pl
from jax.experimental.pallas import tpu as pltpu
import numpy as np


def _round_up(x, m):
    return (x + m - 1) // m * m


def _lane_pad(c):
    # Pad a channel (lane) dim to a multiple of 128 only when the overhead is
    # modest (<= 2x); tiny channel counts fall back to masked stores instead of
    # paying 8-32x extra MXU work / HBM writes.
    cp = _round_up(c, 128)
    return cp if cp <= 2 * c else c


def _vmem_limit_bytes():
    # Generation-aware VMEM limit: ~48 MiB on v7x (64 MiB physical),
    # ~96 MiB on v5e / v6e (128 MiB physical).
    cap = 128 * 1024 * 1024
    try:
        cap = int(pltpu.get_tpu_info().vmem_capacity_bytes)
    except Exception:
        pass
    return max(32 * 1024 * 1024, min(3 * cap // 4, 96 * 1024 * 1024))


# ------------------------- fused down+ReLU+up kernel --------------------------
# grid = (N,): one image per step ("parallel" for megacore). Both convs run in
# the same step; x1 (ReLU'd down activation) stays in a VMEM scratch, with a
# zeroed 1-pixel border ring used by the transpose-conv taps.
def _unet_inner_kernel(s2d_ref, wd_ref, bd_ref, wu_ref, bu_ref, o_ref, x1_ref,
                       *, oh, ow):
    cin4 = s2d_ref.shape[-1]
    cp_in = x1_ref.shape[-1]

    # ---- down: Conv2d(cin, inner, 4, 2, 1) == 2x2 stride-1 conv on s2d view.
    # All 4 taps summed in registers (single grid step, no VMEM accumulator).
    acc = None
    for a in range(2):                       # row tap (static)
        for b in range(2):                   # column tap (static)
            xs = s2d_ref[0, pl.ds(a, oh), pl.ds(b, ow), :]     # (oh, ow, 4cin) bf16
            xs = xs.reshape(oh * ow, cin4)                     # free when ow % 8 == 0
            d = jnp.dot(xs, wd_ref[a, b], preferred_element_type=jnp.float32)
            acc = d if acc is None else acc + d
    x1 = jnp.maximum(acc + bd_ref[...], 0.0)                   # bias + fused ReLU (f32)

    # Keep the down activation resident in VMEM (never touches HBM).
    # Zero the border ring (re-done per step so megacore cores stay correct).
    zr = jnp.zeros((1, ow + 2, cp_in), jnp.bfloat16)
    zc = jnp.zeros((oh + 2, 1, cp_in), jnp.bfloat16)
    x1_ref[pl.ds(0, 1), :, :] = zr
    x1_ref[pl.ds(oh + 1, 1), :, :] = zr
    x1_ref[:, pl.ds(0, 1), :] = zc
    x1_ref[:, pl.ds(ow + 1, 1), :] = zc
    x1_ref[pl.ds(1, oh), pl.ds(1, ow), :] = (
        x1.reshape(oh, ow, cp_in).astype(jnp.bfloat16))        # bf16 MXU operand

    # ---- up: ConvTranspose2d(inner, outer, 4, 2, 1) via sub-pixel
    # decomposition: each output parity (ry, rx) is a 2x2 stride-1 conv over
    # the padded down activation.  Taps summed locally; one store per parity.
    for p in range(4):                       # output parity ry*2+rx (static)
        ry, rx = p // 2, p % 2
        accu = None
        for a in range(2):
            for b in range(2):
                xs = x1_ref[pl.ds(ry + a, oh), pl.ds(rx + b, ow), :]
                xs = xs.reshape(oh * ow, cp_in)
                d = jnp.dot(xs, wu_ref[a, b, p], preferred_element_type=jnp.float32)
                accu = d if accu is None else accu + d
        o_ref[0, p] = accu + bu_ref[...]


def _fused_block(s2d, wd, bd, wu, bu, *, oh, ow, cp_in, cp_out):
    n = s2d.shape[0]
    cin4 = s2d.shape[-1]
    kern = functools.partial(_unet_inner_kernel, oh=oh, ow=ow)
    return pl.pallas_call(
        kern,
        out_shape=jax.ShapeDtypeStruct((n, 4, oh * ow, cp_out), jnp.float32),
        grid_spec=pltpu.PrefetchScalarGridSpec(
            num_scalar_prefetch=0,
            grid=(n,),
            in_specs=[
                pl.BlockSpec((1, oh + 1, ow + 1, cin4), lambda i: (i, 0, 0, 0)),
                # constant index maps -> weights/biases DMA'd once, stay resident
                pl.BlockSpec((2, 2, cin4, cp_in), lambda i: (0, 0, 0, 0)),
                pl.BlockSpec((1, cp_in), lambda i: (0, 0)),
                pl.BlockSpec((2, 2, 4, cp_in, cp_out), lambda i: (0, 0, 0, 0, 0)),
                pl.BlockSpec((1, cp_out), lambda i: (0, 0)),
            ],
            out_specs=pl.BlockSpec((1, 4, oh * ow, cp_out), lambda i: (i, 0, 0, 0)),
            scratch_shapes=[pltpu.VMEM((oh + 2, ow + 2, cp_in), jnp.bfloat16)],
        ),
        compiler_params=pltpu.CompilerParams(
            dimension_semantics=("parallel",),
            vmem_limit_bytes=_vmem_limit_bytes()),
    )(s2d, wd, bd, wu, bu)


# -------------------------- UnetBlock_with_z (innermost) ----------------------
def unet_block_with_z_forward(x, z, params):
    n, in_c, h, w = x.shape
    nz = z.shape[1]
    inner_nc = params["down_w"].shape[0]
    outer_nc = params["up_w"].shape[1]
    oh, ow = h // 2, w // 2
    cin = in_c + nz
    cin_p = _round_up(cin, 32)               # K lane-dense: 4*cin_p % 128 == 0
    cp_in = _lane_pad(inner_nc)
    cp_out = _lane_pad(outer_nc)

    # ---- producer (one XLA copy fusion): NCHW->NHWC, z broadcast/concat,
    #      LeakyReLU(0.2), bf16 cast, zero pad (spatial + K), space-to-depth.
    x_nhwc = jnp.transpose(x, (0, 2, 3, 1))
    z_img = jnp.broadcast_to(z[:, None, None, :], (n, h, w, nz))
    xz = jnp.concatenate([x_nhwc, z_img], axis=-1)
    act = jnp.where(xz >= 0, xz, 0.2 * xz).astype(jnp.bfloat16)   # bf16 before relayout
    hp = jnp.pad(act, ((0, 0), (1, 1), (1, 1), (0, cin_p - cin)))
    s2d = hp.reshape(n, oh + 1, 2, ow + 1, 2, cin_p)
    s2d = s2d.transpose(0, 1, 3, 2, 4, 5).reshape(n, oh + 1, ow + 1, 4 * cin_p)
    # TODO(synk): for very large H*W (or batch<2 on v7x) add a halo'd oh-row
    # tile axis and fold the space-to-depth producer into the kernel; not
    # needed at these sizes and it keeps the down+up fusion simple.

    # down weights (inner, cin, 4, 4) -> (a, b, (py,px,ci), co), bf16
    wd = jnp.pad(params["down_w"], ((0, 0), (0, cin_p - cin), (0, 0), (0, 0)))
    wd = wd.reshape(inner_nc, cin_p, 2, 2, 2, 2)
    wd = wd.transpose(2, 4, 3, 5, 1, 0).reshape(2, 2, 4 * cin_p, inner_nc)
    wd = jnp.pad(wd, ((0, 0), (0, 0), (0, 0), (0, cp_in - inner_nc))).astype(jnp.bfloat16)
    bd = jnp.pad(params["down_b"], (0, cp_in - inner_nc)).astype(jnp.float32)[None, :]

    # up weights (inner, outer, 4, 4) -> (a, b, parity, ci, co), bf16
    wu = params["up_w"]
    rows = []
    for a in range(2):
        cols = []
        for b in range(2):
            pars = []
            for ry in range(2):
                for rx in range(2):
                    pars.append(wu[:, :, 3 - 2 * a - ry, 3 - 2 * b - rx])
            cols.append(jnp.stack(pars, axis=0))          # (4, inner, outer)
        rows.append(jnp.stack(cols, axis=0))              # (2, 4, inner, outer)
    wu_g = jnp.stack(rows, axis=0)                        # (2, 2, 4, inner, outer)
    wu_g = jnp.pad(wu_g, ((0, 0), (0, 0), (0, 0),
                          (0, cp_in - inner_nc), (0, cp_out - outer_nc)))
    wu_g = wu_g.astype(jnp.bfloat16)
    bu = jnp.pad(params["up_b"], (0, cp_out - outer_nc)).astype(jnp.float32)[None, :]

    y = _fused_block(s2d, wd, bd, wu_g, bu,
                     oh=oh, ow=ow, cp_in=cp_in, cp_out=cp_out)   # (n,4,oh*ow,cp_out) f32

    # ---- epilogue (one XLA copy fusion): drop channel pad, parity->spatial,
    #      NHWC->NCHW, concat skip connection.
    y = y[..., :outer_nc].reshape(n, 2, 2, oh, ow, outer_nc)     # (n, ry, rx, i, j, c)
    y = y.transpose(0, 5, 3, 1, 4, 2).reshape(n, outer_nc, 2 * oh, 2 * ow)

    # innermost UnetBlock_with_z: cat([up(down(x_and_z)), x], dim=1)
    return jnp.concatenate([y, x], axis=1)

    # TODO(synk): outermost/middle variants need the recursive submodule plus
    # Tanh/InstanceNorm2d/Dropout; only the self-contained innermost block is here.
    # TODO(synk): x1 is kept in bf16 for the MXU (PyTorch keeps it f32); bias +
    # ReLU are done in f32, so only the A-operand quantization differs.


# ------------------------------ pure-JAX reference ----------------------------
def reference_forward(x, z, params, quantize=False):
    n, _, h, w = x.shape
    nz = z.shape[1]
    z_img = jnp.broadcast_to(z[:, :, None, None], (n, nz, h, w))
    xz = jnp.concatenate([x, z_img], axis=1)
    hh = jnp.where(xz >= 0, xz, 0.2 * xz)
    dw, db = params["down_w"], params["down_b"]
    uw, ub = params["up_w"], params["up_b"]
    if quantize:  # mirror the kernel's bf16 operands (f32 accumulation)
        hh = hh.astype(jnp.bfloat16).astype(jnp.float32)
        dw = dw.astype(jnp.bfloat16).astype(jnp.float32)
        uw = uw.astype(jnp.bfloat16).astype(jnp.float32)
    x1 = lax.conv_general_dilated(
        hh, dw, (2, 2), ((1, 1), (1, 1)),
        dimension_numbers=("NCHW", "OIHW", "NCHW")) + db[None, :, None, None]
    h2 = jnp.maximum(x1, 0.0)
    if quantize:
        h2 = h2.astype(jnp.bfloat16).astype(jnp.float32)
    wt = uw[:, :, ::-1, ::-1].transpose(1, 0, 2, 3)       # (outer, inner, 4, 4)
    x2 = lax.conv_general_dilated(
        h2, wt, (1, 1), ((2, 2), (2, 2)), lhs_dilation=(2, 2),
        dimension_numbers=("NCHW", "OIHW", "NCHW")) + ub[None, :, None, None]
    return jnp.concatenate([x2, x], axis=1)


# ------------------------------------ main -------------------------------------
if __name__ == "__main__":
    n, input_nc, h, w = 2, 4, 16, 16
    nz, inner_nc, outer_nc = 8, 16, 4

    key = jax.random.PRNGKey(0)
    k1, k2, k3, k4, k5, k6 = jax.random.split(key, 6)
    x = jax.random.normal(k1, (n, input_nc, h, w), jnp.float32)
    z = jax.random.normal(k2, (n, nz), jnp.float32)
    params = {
        # Conv2d(input_nc + nz, inner_nc, 4, 2, 1): weight (out, in, 4, 4)
        "down_w": 0.1 * jax.random.normal(k3, (inner_nc, input_nc + nz, 4, 4), jnp.float32),
        "down_b": 0.1 * jax.random.normal(k4, (inner_nc,), jnp.float32),
        # ConvTranspose2d(inner_nc, outer_nc, 4, 2, 1): weight (in, out, 4, 4)
        "up_w": 0.1 * jax.random.normal(k5, (inner_nc, outer_nc, 4, 4), jnp.float32),
        "up_b": 0.1 * jax.random.normal(k6, (outer_nc,), jnp.float32),
    }

    fwd = jax.jit(unet_block_with_z_forward)
    out = jax.block_until_ready(fwd(x, z, params))
    assert out.shape == (n, outer_nc + input_nc, h, w), out.shape

    ref_q = jax.block_until_ready(reference_forward(x, z, params, quantize=True))
    ref_f = jax.block_until_ready(reference_forward(x, z, params, quantize=False))
    # tight check vs a reference that uses the same bf16 operands (validates
    # indexing / structure), loose check vs the full-f32 module semantics.
    np.testing.assert_allclose(np.asarray(out), np.asarray(ref_q), rtol=5e-3, atol=5e-3)
    np.testing.assert_allclose(np.asarray(out), np.asarray(ref_f), rtol=5e-2, atol=5e-2)
    print("KERNEL_OK")
</pallas_src>

<mosaic_0001>
module attributes {stable_mosaic.version = 11 : i64} {
  func.func @_unet_inner_kernel(%arg0: i32, %arg1: memref<1x9x9x128xbf16, #tpu.memory_space<vmem>>, %arg2: memref<2x2x128x16xbf16, #tpu.memory_space<vmem>>, %arg3: memref<1x16xf32, #tpu.memory_space<vmem>>, %arg4: memref<2x2x4x16x4xbf16, #tpu.memory_space<vmem>>, %arg5: memref<1x4xf32, #tpu.memory_space<vmem>>, %arg6: memref<1x4x64x4xf32, #tpu.memory_space<vmem>>, %arg7: memref<10x10x16xbf16, #tpu.memory_space<vmem>>) attributes {dimension_semantics = [#tpu.dimension_semantics<parallel>], iteration_bounds = array<i64: 2>, scalar_prefetch = 0 : i64, scratch_operands = 1 : i64, tpu.core_type = #tpu.core_type<tc>, window_params = [{transform_indices = @transform_0, window_bounds = array<i64: 1, 9, 9, 128>}, {pipeline_mode = #tpu.pipeline_mode<synchronous>, transform_indices = @transform_1, window_bounds = array<i64: 2, 2, 128, 16>}, {pipeline_mode = #tpu.pipeline_mode<synchronous>, transform_indices = @transform_2, window_bounds = array<i64: 1, 16>}, {pipeline_mode = #tpu.pipeline_mode<synchronous>, transform_indices = @transform_3, window_bounds = array<i64: 2, 2, 4, 16, 4>}, {pipeline_mode = #tpu.pipeline_mode<synchronous>, transform_indices = @transform_4, window_bounds = array<i64: 1, 4>}, {transform_indices = @transform_5, window_bounds = array<i64: 1, 4, 64, 4>}]} {
    %c0 = arith.constant 0 : index
    %c0_0 = arith.constant 0 : index
    %c0_1 = arith.constant 0 : index
    %c0_2 = arith.constant 0 : index
    %0 = vector.load %arg1[%c0, %c0_0, %c0_1, %c0_2] : memref<1x9x9x128xbf16, #tpu.memory_space<vmem>>, vector<1x8x8x128xbf16>
    %1 = vector.shape_cast %0 : vector<1x8x8x128xbf16> to vector<8x8x128xbf16>
    %2 = vector.shape_cast %1 : vector<8x8x128xbf16> to vector<64x128xbf16>
    %c0_3 = arith.constant 0 : index
    %c0_4 = arith.constant 0 : index
    %c0_5 = arith.constant 0 : index
    %c0_6 = arith.constant 0 : index
    %3 = vector.load %arg2[%c0_3, %c0_4, %c0_5, %c0_6] : memref<2x2x128x16xbf16, #tpu.memory_space<vmem>>, vector<1x1x128x16xbf16>
    %4 = vector.shape_cast %3 : vector<1x1x128x16xbf16> to vector<128x16xbf16>
    %cst = arith.constant dense<0.000000e+00> : vector<64x16xf32>
    %5 = tpu.matmul %2, %4, %cst {dimension_numbers = #tpu.dot_dimension_numbers<[1], [0], [0], [1], [0, 0, 1, 1], [], []>} : vector<64x128xbf16>, vector<128x16xbf16>, vector<64x16xf32> -> vector<64x16xf32>
    %c0_7 = arith.constant 0 : index
    %c0_8 = arith.constant 0 : index
    %c1 = arith.constant 1 : index
    %c0_9 = arith.constant 0 : index
    %6 = vector.load %arg1[%c0_7, %c0_8, %c1, %c0_9] : memref<1x9x9x128xbf16, #tpu.memory_space<vmem>>, vector<1x8x8x128xbf16>
    %7 = vector.shape_cast %6 : vector<1x8x8x128xbf16> to vector<8x8x128xbf16>
    %8 = vector.shape_cast %7 : vector<8x8x128xbf16> to vector<64x128xbf16>
    %c0_10 = arith.constant 0 : index
    %c1_11 = arith.constant 1 : index
    %c0_12 = arith.constant 0 : index
    %c0_13 = arith.constant 0 : index
    %9 = vector.load %arg2[%c0_10, %c1_11, %c0_12, %c0_13] : memref<2x2x128x16xbf16, #tpu.memory_space<vmem>>, vector<1x1x128x16xbf16>
    %10 = vector.shape_cast %9 : vector<1x1x128x16xbf16> to vector<128x16xbf16>
    %cst_14 = arith.constant dense<0.000000e+00> : vector<64x16xf32>
    %11 = tpu.matmul %8, %10, %cst_14 {dimension_numbers = #tpu.dot_dimension_numbers<[1], [0], [0], [1], [0, 0, 1, 1], [], []>} : vector<64x128xbf16>, vector<128x16xbf16>, vector<64x16xf32> -> vector<64x16xf32>
    %12 = arith.addf %5, %11 : vector<64x16xf32>
    %c0_15 = arith.constant 0 : index
    %c1_16 = arith.constant 1 : index
    %c0_17 = arith.constant 0 : index
    %c0_18 = arith.constant 0 : index
    %13 = vector.load %arg1[%c0_15, %c1_16, %c0_17, %c0_18] : memref<1x9x9x128xbf16, #tpu.memory_space<vmem>>, vector<1x8x8x128xbf16>
    %14 = vector.shape_cast %13 : vector<1x8x8x128xbf16> to vector<8x8x128xbf16>
    %15 = vector.shape_cast %14 : vector<8x8x128xbf16> to vector<64x128xbf16>
    %c1_19 = arith.constant 1 : index
    %c0_20 = arith.constant 0 : index
    %c0_21 = arith.constant 0 : index
    %c0_22 = arith.constant 0 : index
    %16 = vector.load %arg2[%c1_19, %c0_20, %c0_21, %c0_22] : memref<2x2x128x16xbf16, #tpu.memory_space<vmem>>, vector<1x1x128x16xbf16>
    %17 = vector.shape_cast %16 : vector<1x1x128x16xbf16> to vector<128x16xbf16>
    %cst_23 = arith.constant dense<0.000000e+00> : vector<64x16xf32>
    %18 = tpu.matmul %15, %17, %cst_23 {dimension_numbers = #tpu.dot_dimension_numbers<[1], [0], [0], [1], [0, 0, 1, 1], [], []>} : vector<64x128xbf16>, vector<128x16xbf16>, vector<64x16xf32> -> vector<64x16xf32>
    %19 = arith.addf %12, %18 : vector<64x16xf32>
    %c0_24 = arith.constant 0 : index
    %c1_25 = arith.constant 1 : index
    %c1_26 = arith.constant 1 : index
    %c0_27 = arith.constant 0 : index
    %20 = vector.load %arg1[%c0_24, %c1_25, %c1_26, %c0_27] : memref<1x9x9x128xbf16, #tpu.memory_space<vmem>>, vector<1x8x8x128xbf16>
    %21 = vector.shape_cast %20 : vector<1x8x8x128xbf16> to vector<8x8x128xbf16>
    %22 = vector.shape_cast %21 : vector<8x8x128xbf16> to vector<64x128xbf16>
    %c1_28 = arith.constant 1 : index
    %c1_29 = arith.constant 1 : index
    %c0_30 = arith.constant 0 : index
    %c0_31 = arith.constant 0 : index
    %23 = vector.load %arg2[%c1_28, %c1_29, %c0_30, %c0_31] : memref<2x2x128x16xbf16, #tpu.memory_space<vmem>>, vector<1x1x128x16xbf16>
    %24 = vector.shape_cast %23 : vector<1x1x128x16xbf16> to vector<128x16xbf16>
    %cst_32 = arith.constant dense<0.000000e+00> : vector<64x16xf32>
    %25 = tpu.matmul %22, %24, %cst_32 {dimension_numbers = #tpu.dot_dimension_numbers<[1], [0], [0], [1], [0, 0, 1, 1], [], []>} : vector<64x128xbf16>, vector<128x16xbf16>, vector<64x16xf32> -> vector<64x16xf32>
    %26 = arith.addf %19, %25 : vector<64x16xf32>
    %c0_33 = arith.constant 0 : index
    %c0_34 = arith.constant 0 : index
    %27 = vector.load %arg3[%c0_33, %c0_34] : memref<1x16xf32, #tpu.memory_space<vmem>>, vector<1x16xf32>
    %28 = vector.broadcast %27 : vector<1x16xf32> to vector<64x16xf32>
    %29 = arith.addf %26, %28 : vector<64x16xf32>
    %cst_35 = arith.constant 0.000000e+00 : f32
    %30 = vector.broadcast %cst_35 : f32 to vector<64x16xf32>
    %31 = arith.maximumf %29, %30 : vector<64x16xf32>
    %cst_36 = arith.constant 0.000000e+00 : bf16
    %32 = vector.broadcast %cst_36 : bf16 to vector<1x10x16xbf16>
    %cst_37 = arith.constant 0.000000e+00 : bf16
    %33 = vector.broadcast %cst_37 : bf16 to vector<10x1x16xbf16>
    %c0_38 = arith.constant 0 : index
    %c0_39 = arith.constant 0 : index
    %c0_40 = arith.constant 0 : index
    %34 = vector.load %arg7[%c0_38, %c0_39, %c0_40] : memref<10x10x16xbf16, #tpu.memory_space<vmem>>, vector<1x10x16xbf16>
    tpu.vector_store %arg7[%c0_38, %c0_39, %c0_40], %32 {strides = array<i32>} : memref<10x10x16xbf16, #tpu.memory_space<vmem>>, vector<1x10x16xbf16>,
    %c9 = arith.constant 9 : index
    %c0_41 = arith.constant 0 : index
    %c0_42 = arith.constant 0 : index
    %35 = vector.load %arg7[%c9, %c0_41, %c0_42] : memref<10x10x16xbf16, #tpu.memory_space<vmem>>, vector<1x10x16xbf16>
    tpu.vector_store %arg7[%c9, %c0_41, %c0_42], %32 {strides = array<i32>} : memref<10x10x16xbf16, #tpu.memory_space<vmem>>, vector<1x10x16xbf16>,
    %c0_43 = arith.constant 0 : index
    %c0_44 = arith.constant 0 : index
    %c0_45 = arith.constant 0 : index
    %36 = vector.load %arg7[%c0_43, %c0_44, %c0_45] : memref<10x10x16xbf16, #tpu.memory_space<vmem>>, vector<10x1x16xbf16>
    tpu.vector_store %arg7[%c0_43, %c0_44, %c0_45], %33 {strides = array<i32>} : memref<10x10x16xbf16, #tpu.memory_space<vmem>>, vector<10x1x16xbf16>,
    %c0_46 = arith.constant 0 : index
    %c9_47 = arith.constant 9 : index
    %c0_48 = arith.constant 0 : index
    %37 = vector.load %arg7[%c0_46, %c9_47, %c0_48] : memref<10x10x16xbf16, #tpu.memory_space<vmem>>, vector<10x1x16xbf16>
    tpu.vector_store %arg7[%c0_46, %c9_47, %c0_48], %33 {strides = array<i32>} : memref<10x10x16xbf16, #tpu.memory_space<vmem>>, vector<10x1x16xbf16>,
    %38 = vector.shape_cast %31 : vector<64x16xf32> to vector<8x8x16xf32>
    %39 = arith.truncf %38 : vector<8x8x16xf32> to vector<8x8x16xbf16>
    %c1_49 = arith.constant 1 : index
    %c1_50 = arith.constant 1 : index
    %c0_51 = arith.constant 0 : index
    %40 = vector.load %arg7[%c1_49, %c1_50, %c0_51] : memref<10x10x16xbf16, #tpu.memory_space<vmem>>, vector<8x8x16xbf16>
    tpu.vector_store %arg7[%c1_49, %c1_50, %c0_51], %39 {strides = array<i32>} : memref<10x10x16xbf16, #tpu.memory_space<vmem>>, vector<8x8x16xbf16>,
    %c0_52 = arith.constant 0 : index
    %c0_53 = arith.constant 0 : index
    %c0_54 = arith.constant 0 : index
    %41 = vector.load %arg7[%c0_52, %c0_53, %c0_54] : memref<10x10x16xbf16, #tpu.memory_space<vmem>>, vector<8x8x16xbf16>
    %42 = vector.shape_cast %41 : vector<8x8x16xbf16> to vector<64x16xbf16>
    %c0_55 = arith.constant 0 : index
    %c0_56 = arith.constant 0 : index
    %c0_57 = arith.constant 0 : index
    %c0_58 = arith.constant 0 : index
    %c0_59 = arith.constant 0 : index
    %43 = vector.load %arg4[%c0_55, %c0_56, %c0_57, %c0_58, %c0_59] : memref<2x2x4x16x4xbf16, #tpu.memory_space<vmem>>, vector<1x1x1x16x4xbf16>
    %44 = vector.shape_cast %43 : vector<1x1x1x16x4xbf16> to vector<16x4xbf16>
    %cst_60 = arith.constant dense<0.000000e+00> : vector<64x4xf32>
    %45 = tpu.matmul %42, %44, %cst_60 {dimension_numbers = #tpu.dot_dimension_numbers<[1], [0], [0], [1], [0, 0, 1, 1], [], []>} : vector<64x16xbf16>, vector<16x4xbf16>, vector<64x4xf32> -> vector<64x4xf32>
    %c0_61 = arith.constant 0 : index
    %c1_62 = arith.constant 1 : index
    %c0_63 = arith.constant 0 : index
    %46 = vector.load %arg7[%c0_61, %c1_62, %c0_63] : memref<10x10x16xbf16, #tpu.memory_space<vmem>>, vector<8x8x16xbf16>
    %47 = vector.shape_cast %46 : vector<8x8x16xbf16> to vector<64x16xbf16>
    %c0_64 = arith.constant 0 : index
    %c1_65 = arith.constant 1 : index
    %c0_66 = arith.constant 0 : index
    %c0_67 = arith.constant 0 : index
    %c0_68 = arith.constant 0 : index
    %48 = vector.load %arg4[%c0_64, %c1_65, %c0_66, %c0_67, %c0_68] : memref<2x2x4x16x4xbf16, #tpu.memory_space<vmem>>, vector<1x1x1x16x4xbf16>
    %49 = vector.shape_cast %48 : vector<1x1x1x16x4xbf16> to vector<16x4xbf16>
    %cst_69 = arith.constant dense<0.000000e+00> : vector<64x4xf32>
    %50 = tpu.matmul %47, %49, %cst_69 {dimension_numbers = #tpu.dot_dimension_numbers<[1], [0], [0], [1], [0, 0, 1, 1], [], []>} : vector<64x16xbf16>, vector<16x4xbf16>, vector<64x4xf32> -> vector<64x4xf32>
    %51 = arith.addf %45, %50 : vector<64x4xf32>
    %c1_70 = arith.constant 1 : index
    %c0_71 = arith.constant 0 : index
    %c0_72 = arith.constant 0 : index
    %52 = vector.load %arg7[%c1_70, %c0_71, %c0_72] : memref<10x10x16xbf16, #tpu.memory_space<vmem>>, vector<8x8x16xbf16>
    %53 = vector.shape_cast %52 : vector<8x8x16xbf16> to vector<64x16xbf16>
    %c1_73 = arith.constant 1 : index
    %c0_74 = arith.constant 0 : index
    %c0_75 = arith.constant 0 : index
    %c0_76 = arith.constant 0 : index
    %c0_77 = arith.constant 0 : index
    %54 = vector.load %arg4[%c1_73, %c0_74, %c0_75, %c0_76, %c0_77] : memref<2x2x4x16x4xbf16, #tpu.memory_space<vmem>>, vector<1x1x1x16x4xbf16>
    %55 = vector.shape_cast %54 : vector<1x1x1x16x4xbf16> to vector<16x4xbf16>
    %cst_78 = arith.constant dense<0.000000e+00> : vector<64x4xf32>
    %56 = tpu.matmul %53, %55, %cst_78 {dimension_numbers = #tpu.dot_dimension_numbers<[1], [0], [0], [1], [0, 0, 1, 1], [], []>} : vector<64x16xbf16>, vector<16x4xbf16>, vector<64x4xf32> -> vector<64x4xf32>
    %57 = arith.addf %51, %56 : vector<64x4xf32>
    %c1_79 = arith.constant 1 : index
    %c1_80 = arith.constant 1 : index
    %c0_81 = arith.constant 0 : index
    %58 = vector.load %arg7[%c1_79, %c1_80, %c0_81] : memref<10x10x16xbf16, #tpu.memory_space<vmem>>, vector<8x8x16xbf16>
    %59 = vector.shape_cast %58 : vector<8x8x16xbf16> to vector<64x16xbf16>
    %c1_82 = arith.constant 1 : index
    %c1_83 = arith.constant 1 : index
    %c0_84 = arith.constant 0 : index
    %c0_85 = arith.constant 0 : index
    %c0_86 = arith.constant 0 : index
    %60 = vector.load %arg4[%c1_82, %c1_83, %c0_84, %c0_85, %c0_86] : memref<2x2x4x16x4xbf16, #tpu.memory_space<vmem>>, vector<1x1x1x16x4xbf16>
    %61 = vector.shape_cast %60 : vector<1x1x1x16x4xbf16> to vector<16x4xbf16>
    %cst_87 = arith.constant dense<0.000000e+00> : vector<64x4xf32>
    %62 = tpu.matmul %59, %61, %cst_87 {dimension_numbers = #tpu.dot_dimension_numbers<[1], [0], [0], [1], [0, 0, 1, 1], [], []>} : vector<64x16xbf16>, vector<16x4xbf16>, vector<64x4xf32> -> vector<64x4xf32>
    %63 = arith.addf %57, %62 : vector<64x4xf32>
    %c0_88 = arith.constant 0 : index
    %c0_89 = arith.constant 0 : index
    %64 = vector.load %arg5[%c0_88, %c0_89] : memref<1x4xf32, #tpu.memory_space<vmem>>, vector<1x4xf32>
    %65 = vector.broadcast %64 : vector<1x4xf32> to vector<64x4xf32>
    %66 = arith.addf %63, %65 : vector<64x4xf32>
    %c0_90 = arith.constant 0 : index
    %c0_91 = arith.constant 0 : index
    %c0_92 = arith.constant 0 : index
    %c0_93 = arith.constant 0 : index
    %67 = vector.load %arg6[%c0_90, %c0_91, %c0_92, %c0_93] : memref<1x4x64x4xf32, #tpu.memory_space<vmem>>, vector<1x1x64x4xf32>
    %68 = vector.shape_cast %67 : vector<1x1x64x4xf32> to vector<64x4xf32>
    %69 = vector.shape_cast %66 : vector<64x4xf32> to vector<1x1x64x4xf32>
    tpu.vector_store %arg6[%c0_90, %c0_91, %c0_92, %c0_93], %69 {strides = array<i32>} : memref<1x4x64x4xf32, #tpu.memory_space<vmem>>, vector<1x1x64x4xf32>,
    %c0_94 = arith.constant 0 : index
    %c1_95 = arith.constant 1 : index
    %c0_96 = arith.constant 0 : index
    %70 = vector.load %arg7[%c0_94, %c1_95, %c0_96] : memref<10x10x16xbf16, #tpu.memory_space<vmem>>, vector<8x8x16xbf16>
    %71 = vector.shape_cast %70 : vector<8x8x16xbf16> to vector<64x16xbf16>
    %c0_97 = arith.constant 0 : index
    %c0_98 = arith.constant 0 : index
    %c1_99 = arith.constant 1 : index
    %c0_100 = arith.constant 0 : index
    %c0_101 = arith.constant 0 : index
    %72 = vector.load %arg4[%c0_97, %c0_98, %c1_99, %c0_100, %c0_101] : memref<2x2x4x16x4xbf16, #tpu.memory_space<vmem>>, vector<1x1x1x16x4xbf16>
    %73 = vector.shape_cast %72 : vector<1x1x1x16x4xbf16> to vector<16x4xbf16>
    %cst_102 = arith.constant dense<0.000000e+00> : vector<64x4xf32>
    %74 = tpu.matmul %71, %73, %cst_102 {dimension_numbers = #tpu.dot_dimension_numbers<[1], [0], [0], [1], [0, 0, 1, 1], [], []>} : vector<64x16xbf16>, vector<16x4xbf16>, vector<64x4xf32> -> vector<64x4xf32>
    %c0_103 = arith.constant 0 : index
    %c2 = arith.constant 2 : index
    %c0_104 = arith.constant 0 : index
    %75 = vector.load %arg7[%c0_103, %c2, %c0_104] : memref<10x10x16xbf16, #tpu.memory_space<vmem>>, vector<8x8x16xbf16>
    %76 = vector.shape_cast %75 : vector<8x8x16xbf16> to vector<64x16xbf16>
    %c0_105 = arith.constant 0 : index
    %c1_106 = arith.constant 1 : index
    %c1_107 = arith.constant 1 : index
    %c0_108 = arith.constant 0 : index
    %c0_109 = arith.constant 0 : index
    %77 = vector.load %arg4[%c0_105, %c1_106, %c1_107, %c0_108, %c0_109] : memref<2x2x4x16x4xbf16, #tpu.memory_space<vmem>>, vector<1x1x1x16x4xbf16>
    %78 = vector.shape_cast %77 : vector<1x1x1x16x4xbf16> to vector<16x4xbf16>
    %cst_110 = arith.constant dense<0.000000e+00> : vector<64x4xf32>
    %79 = tpu.matmul %76, %78, %cst_110 {dimension_numbers = #tpu.dot_dimension_numbers<[1], [0], [0], [1], [0, 0, 1, 1], [], []>} : vector<64x16xbf16>, vector<16x4xbf16>, vector<64x4xf32> -> vector<64x4xf32>
    %80 = arith.addf %74, %79 : vector<64x4xf32>
    %c1_111 = arith.constant 1 : index
    %c1_112 = arith.constant 1 : index
    %c0_113 = arith.constant 0 : index
    %81 = vector.load %arg7[%c1_111, %c1_112, %c0_113] : memref<10x10x16xbf16, #tpu.memory_space<vmem>>, vector<8x8x16xbf16>
    %82 = vector.shape_cast %81 : vector<8x8x16xbf16> to vector<64x16xbf16>
    %c1_114 = arith.constant 1 : index
    %c0_115 = arith.constant 0 : index
    %c1_116 = arith.constant 1 : index
    %c0_117 = arith.constant 0 : index
    %c0_118 = arith.constant 0 : index
    %83 = vector.load %arg4[%c1_114, %c0_115, %c1_116, %c0_117, %c0_118] : memref<2x2x4x16x4xbf16, #tpu.memory_space<vmem>>, vector<1x1x1x16x4xbf16>
    %84 = vector.shape_cast %83 : vector<1x1x1x16x4xbf16> to vector<16x4xbf16>
    %cst_119 = arith.constant dense<0.000000e+00> : vector<64x4xf32>
    %85 = tpu.matmul %82, %84, %cst_119 {dimension_numbers = #tpu.dot_dimension_numbers<[1], [0], [0], [1], [0, 0, 1, 1], [], []>} : vector<64x16xbf16>, vector<16x4xbf16>, vector<64x4xf32> -> vector<64x4xf32>
    %86 = arith.addf %80, %85 : vector<64x4xf32>
    %c1_120 = arith.constant 1 : index
    %c2_121 = arith.constant 2 : index
    %c0_122 = arith.constant 0 : index
    %87 = vector.load %arg7[%c1_120, %c2_121, %c0_122] : memref<10x10x16xbf16, #tpu.memory_space<vmem>>, vector<8x8x16xbf16>
    %88 = vector.shape_cast %87 : vector<8x8x16xbf16> to vector<64x16xbf16>
    %c1_123 = arith.constant 1 : index
    %c1_124 = arith.constant 1 : index
    %c1_125 = arith.constant 1 : index
    %c0_126 = arith.constant 0 : index
    %c0_127 = arith.constant 0 : index
    %89 = vector.load %arg4[%c1_123, %c1_124, %c1_125, %c0_126, %c0_127] : memref<2x2x4x16x4xbf16, #tpu.memory_space<vmem>>, vector<1x1x1x16x4xbf16>
    %90 = vector.shape_cast %89 : vector<1x1x1x16x4xbf16> to vector<16x4xbf16>
    %cst_128 = arith.constant dense<0.000000e+00> : vector<64x4xf32>
    %91 = tpu.matmul %88, %90, %cst_128 {dimension_numbers = #tpu.dot_dimension_numbers<[1], [0], [0], [1], [0, 0, 1, 1], [], []>} : vector<64x16xbf16>, vector<16x4xbf16>, vector<64x4xf32> -> vector<64x4xf32>
    %92 = arith.addf %86, %91 : vector<64x4xf32>
    %c0_129 = arith.constant 0 : index
    %c0_130 = arith.constant 0 : index
    %93 = vector.load %arg5[%c0_129, %c0_130] : memref<1x4xf32, #tpu.memory_space<vmem>>, vector<1x4xf32>
    %94 = vector.broadcast %93 : vector<1x4xf32> to vector<64x4xf32>
    %95 = arith.addf %92, %94 : vector<64x4xf32>
    %c0_131 = arith.constant 0 : index
    %c1_132 = arith.constant 1 : index
    %c0_133 = arith.constant 0 : index
    %c0_134 = arith.constant 0 : index
    %96 = vector.load %arg6[%c0_131, %c1_132, %c0_133, %c0_134] : memref<1x4x64x4xf32, #tpu.memory_space<vmem>>, vector<1x1x64x4xf32>
    %97 = vector.shape_cast %96 : vector<1x1x64x4xf32> to vector<64x4xf32>
    %98 = vector.shape_cast %95 : vector<64x4xf32> to vector<1x1x64x4xf32>
    tpu.vector_store %arg6[%c0_131, %c1_132, %c0_133, %c0_134], %98 {strides = array<i32>} : memref<1x4x64x4xf32, #tpu.memory_space<vmem>>, vector<1x1x64x4xf32>,
    %c1_135 = arith.constant 1 : index
    %c0_136 = arith.constant 0 : index
    %c0_137 = arith.constant 0 : index
    %99 = vector.load %arg7[%c1_135, %c0_136, %c0_137] : memref<10x10x16xbf16, #tpu.memory_space<vmem>>, vector<8x8x16xbf16>
    %100 = vector.shape_cast %99 : vector<8x8x16xbf16> to vector<64x16xbf16>
    %c0_138 = arith.constant 0 : index
    %c0_139 = arith.constant 0 : index
    %c2_140 = arith.constant 2 : index
    %c0_141 = arith.constant 0 : index
    %c0_142 = arith.constant 0 : index
    %101 = vector.load %arg4[%c0_138, %c0_139, %c2_140, %c0_141, %c0_142] : memref<2x2x4x16x4xbf16, #tpu.memory_space<vmem>>, vector<1x1x1x16x4xbf16>
    %102 = vector.shape_cast %101 : vector<1x1x1x16x4xbf16> to vector<16x4xbf16>
    %cst_143 = arith.constant dense<0.000000e+00> : vector<64x4xf32>
    %103 = tpu.matmul %100, %102, %cst_143 {dimension_numbers = #tpu.dot_dimension_numbers<[1], [0], [0], [1], [0, 0, 1, 1], [], []>} : vector<64x16xbf16>, vector<16x4xbf16>, vector<64x4xf32> -> vector<64x4xf32>
    %c1_144 = arith.constant 1 : index
    %c1_145 = arith.constant 1 : index
    %c0_146 = arith.constant 0 : index
    %104 = vector.load %arg7[%c1_144, %c1_145, %c0_146] : memref<10x10x16xbf16, #tpu.memory_space<vmem>>, vector<8x8x16xbf16>
    %105 = vector.shape_cast %104 : vector<8x8x16xbf16> to vector<64x16xbf16>
    %c0_147 = arith.constant 0 : index
    %c1_148 = arith.constant 1 : index
    %c2_149 = arith.constant 2 : index
    %c0_150 = arith.constant 0 : index
    %c0_151 = arith.constant 0 : index
    %106 = vector.load %arg4[%c0_147, %c1_148, %c2_149, %c0_150, %c0_151] : memref<2x2x4x16x4xbf16, #tpu.memory_space<vmem>>, vector<1x1x1x16x4xbf16>
    %107 = vector.shape_cast %106 : vector<1x1x1x16x4xbf16> to vector<16x4xbf16>
    %cst_152 = arith.constant dense<0.000000e+00> : vector<64x4xf32>
    %108 = tpu.matmul %105, %107, %cst_152 {dimension_numbers = #tpu.dot_dimension_numbers<[1], [0], [0], [1], [0, 0, 1, 1], [], []>} : vector<64x16xbf16>, vector<16x4xbf16>, vector<64x4xf32> -> vector<64x4xf32>
    %109 = arith.addf %103, %108 : vector<64x4xf32>
    %c2_153 = arith.constant 2 : index
    %c0_154 = arith.constant 0 : index
    %c0_155 = arith.constant 0 : index
    %110 = vector.load %arg7[%c2_153, %c0_154, %c0_155] : memref<10x10x16xbf16, #tpu.memory_space<vmem>>, vector<8x8x16xbf16>
    %111 = vector.shape_cast %110 : vector<8x8x16xbf16> to vector<64x16xbf16>
    %c1_156 = arith.constant 1 : index
    %c0_157 = arith.constant 0 : index
    %c2_158 = arith.constant 2 : index
    %c0_159 = arith.constant 0 : index
    %c0_160 = arith.constant 0 : index
    %112 = vector.load %arg4[%c1_156, %c0_157, %c2_158, %c0_159, %c0_160] : memref<2x2x4x16x4xbf16, #tpu.memory_space<vmem>>, vector<1x1x1x16x4xbf16>
    %113 = vector.shape_cast %112 : vector<1x1x1x16x4xbf16> to vector<16x4xbf16>
    %cst_161 = arith.constant dense<0.000000e+00> : vector<64x4xf32>
    %114 = tpu.matmul %111, %113, %cst_161 {dimension_numbers = #tpu.dot_dimension_numbers<[1], [0], [0], [1], [0, 0, 1, 1], [], []>} : vector<64x16xbf16>, vector<16x4xbf16>, vector<64x4xf32> -> vector<64x4xf32>
    %115 = arith.addf %109, %114 : vector<64x4xf32>
    %c2_162 = arith.constant 2 : index
    %c1_163 = arith.constant 1 : index
    %c0_164 = arith.constant 0 : index
    %116 = vector.load %arg7[%c2_162, %c1_163, %c0_164] : memref<10x10x16xbf16, #tpu.memory_space<vmem>>, vector<8x8x16xbf16>
    %117 = vector.shape_cast %116 : vector<8x8x16xbf16> to vector<64x16xbf16>
    %c1_165 = arith.constant 1 : index
    %c1_166 = arith.constant 1 : index
    %c2_167 = arith.constant 2 : index
    %c0_168 = arith.constant 0 : index
    %c0_169 = arith.constant 0 : index
    %118 = vector.load %arg4[%c1_165, %c1_166, %c2_167, %c0_168, %c0_169] : memref<2x2x4x16x4xbf16, #tpu.memory_space<vmem>>, vector<1x1x1x16x4xbf16>
    %119 = vector.shape_cast %118 : vector<1x1x1x16x4xbf16> to vector<16x4xbf16>
    %cst_170 = arith.constant dense<0.000000e+00> : vector<64x4xf32>
    %120 = tpu.matmul %117, %119, %cst_170 {dimension_numbers = #tpu.dot_dimension_numbers<[1], [0], [0], [1], [0, 0, 1, 1], [], []>} : vector<64x16xbf16>, vector<16x4xbf16>, vector<64x4xf32> -> vector<64x4xf32>
    %121 = arith.addf %115, %120 : vector<64x4xf32>
    %c0_171 = arith.constant 0 : index
    %c0_172 = arith.constant 0 : index
    %122 = vector.load %arg5[%c0_171, %c0_172] : memref<1x4xf32, #tpu.memory_space<vmem>>, vector<1x4xf32>
    %123 = vector.broadcast %122 : vector<1x4xf32> to vector<64x4xf32>
    %124 = arith.addf %121, %123 : vector<64x4xf32>
    %c0_173 = arith.constant 0 : index
    %c2_174 = arith.constant 2 : index
    %c0_175 = arith.constant 0 : index
    %c0_176 = arith.constant 0 : index
    %125 = vector.load %arg6[%c0_173, %c2_174, %c0_175, %c0_176] : memref<1x4x64x4xf32, #tpu.memory_space<vmem>>, vector<1x1x64x4xf32>
    %126 = vector.shape_cast %125 : vector<1x1x64x4xf32> to vector<64x4xf32>
    %127 = vector.shape_cast %124 : vector<64x4xf32> to vector<1x1x64x4xf32>
    tpu.vector_store %arg6[%c0_173, %c2_174, %c0_175, %c0_176], %127 {strides = array<i32>} : memref<1x4x64x4xf32, #tpu.memory_space<vmem>>, vector<1x1x64x4xf32>,
    %c1_177 = arith.constant 1 : index
    %c1_178 = arith.constant 1 : index
    %c0_179 = arith.constant 0 : index
    %128 = vector.load %arg7[%c1_177, %c1_178, %c0_179] : memref<10x10x16xbf16, #tpu.memory_space<vmem>>, vector<8x8x16xbf16>
    %129 = vector.shape_cast %128 : vector<8x8x16xbf16> to vector<64x16xbf16>
    %c0_180 = arith.constant 0 : index
    %c0_181 = arith.constant 0 : index
    %c3 = arith.constant 3 : index
    %c0_182 = arith.constant 0 : index
    %c0_183 = arith.constant 0 : index
    %130 = vector.load %arg4[%c0_180, %c0_181, %c3, %c0_182, %c0_183] : memref<2x2x4x16x4xbf16, #tpu.memory_space<vmem>>, vector<1x1x1x16x4xbf16>
    %131 = vector.shape_cast %130 : vector<1x1x1x16x4xbf16> to vector<16x4xbf16>
    %cst_184 = arith.constant dense<0.000000e+00> : vector<64x4xf32>
    %132 = tpu.matmul %129, %131, %cst_184 {dimension_numbers = #tpu.dot_dimension_numbers<[1], [0], [0], [1], [0, 0, 1, 1], [], []>} : vector<64x16xbf16>, vector<16x4xbf16>, vector<64x4xf32> -> vector<64x4xf32>
    %c1_185 = arith.constant 1 : index
    %c2_186 = arith.constant 2 : index
    %c0_187 = arith.constant 0 : index
    %133 = vector.load %arg7[%c1_185, %c2_186, %c0_187] : memref<10x10x16xbf16, #tpu.memory_space<vmem>>, vector<8x8x16xbf16>
    %134 = vector.shape_cast %133 : vector<8x8x16xbf16> to vector<64x16xbf16>
    %c0_188 = arith.constant 0 : index
    %c1_189 = arith.constant 1 : index
    %c3_190 = arith.constant 3 : index
    %c0_191 = arith.constant 0 : index
    %c0_192 = arith.constant 0 : index
    %135 = vector.load %arg4[%c0_188, %c1_189, %c3_190, %c0_191, %c0_192] : memref<2x2x4x16x4xbf16, #tpu.memory_space<vmem>>, vector<1x1x1x16x4xbf16>
    %136 = vector.shape_cast %135 : vector<1x1x1x16x4xbf16> to vector<16x4xbf16>
    %cst_193 = arith.constant dense<0.000000e+00> : vector<64x4xf32>
    %137 = tpu.matmul %134, %136, %cst_193 {dimension_numbers = #tpu.dot_dimension_numbers<[1], [0], [0], [1], [0, 0, 1, 1], [], []>} : vector<64x16xbf16>, vector<16x4xbf16>, vector<64x4xf32> -> vector<64x4xf32>
    %138 = arith.addf %132, %137 : vector<64x4xf32>
    %c2_194 = arith.constant 2 : index
    %c1_195 = arith.constant 1 : index
    %c0_196 = arith.constant 0 : index
    %139 = vector.load %arg7[%c2_194, %c1_195, %c0_196] : memref<10x10x16xbf16, #tpu.memory_space<vmem>>, vector<8x8x16xbf16>
    %140 = vector.shape_cast %139 : vector<8x8x16xbf16> to vector<64x16xbf16>
    %c1_197 = arith.constant 1 : index
    %c0_198 = arith.constant 0 : index
    %c3_199 = arith.constant 3 : index
    %c0_200 = arith.constant 0 : index
    %c0_201 = arith.constant 0 : index
    %141 = vector.load %arg4[%c1_197, %c0_198, %c3_199, %c0_200, %c0_201] : memref<2x2x4x16x4xbf16, #tpu.memory_space<vmem>>, vector<1x1x1x16x4xbf16>
    %142 = vector.shape_cast %141 : vector<1x1x1x16x4xbf16> to vector<16x4xbf16>
    %cst_202 = arith.constant dense<0.000000e+00> : vector<64x4xf32>
    %143 = tpu.matmul %140, %142, %cst_202 {dimension_numbers = #tpu.dot_dimension_numbers<[1], [0], [0], [1], [0, 0, 1, 1], [], []>} : vector<64x16xbf16>, vector<16x4xbf16>, vector<64x4xf32> -> vector<64x4xf32>
    %144 = arith.addf %138, %143 : vector<64x4xf32>
    %c2_203 = arith.constant 2 : index
    %c2_204 = arith.constant 2 : index
    %c0_205 = arith.constant 0 : index
    %145 = vector.load %arg7[%c2_203, %c2_204, %c0_205] : memref<10x10x16xbf16, #tpu.memory_space<vmem>>, vector<8x8x16xbf16>
    %146 = vector.shape_cast %145 : vector<8x8x16xbf16> to vector<64x16xbf16>
    %c1_206 = arith.constant 1 : index
    %c1_207 = arith.constant 1 : index
    %c3_208 = arith.constant 3 : index
    %c0_209 = arith.constant 0 : index
    %c0_210 = arith.constant 0 : index
    %147 = vector.load %arg4[%c1_206, %c1_207, %c3_208, %c0_209, %c0_210] : memref<2x2x4x16x4xbf16, #tpu.memory_space<vmem>>, vector<1x1x1x16x4xbf16>
    %148 = vector.shape_cast %147 : vector<1x1x1x16x4xbf16> to vector<16x4xbf16>
    %cst_211 = arith.constant dense<0.000000e+00> : vector<64x4xf32>
    %149 = tpu.matmul %146, %148, %cst_211 {dimension_numbers = #tpu.dot_dimension_numbers<[1], [0], [0], [1], [0, 0, 1, 1], [], []>} : vector<64x16xbf16>, vector<16x4xbf16>, vector<64x4xf32> -> vector<64x4xf32>
    %150 = arith.addf %144, %149 : vector<64x4xf32>
    %c0_212 = arith.constant 0 : index
    %c0_213 = arith.constant 0 : index
    %151 = vector.load %arg5[%c0_212, %c0_213] : memref<1x4xf32, #tpu.memory_space<vmem>>, vector<1x4xf32>
    %152 = vector.broadcast %151 : vector<1x4xf32> to vector<64x4xf32>
    %153 = arith.addf %150, %152 : vector<64x4xf32>
    %c0_214 = arith.constant 0 : index
    %c3_215 = arith.constant 3 : index
    %c0_216 = arith.constant 0 : index
    %c0_217 = arith.constant 0 : index
    %154 = vector.load %arg6[%c0_214, %c3_215, %c0_216, %c0_217] : memref<1x4x64x4xf32, #tpu.memory_space<vmem>>, vector<1x1x64x4xf32>
    %155 = vector.shape_cast %154 : vector<1x1x64x4xf32> to vector<64x4xf32>
    %156 = vector.shape_cast %153 : vector<64x4xf32> to vector<1x1x64x4xf32>
    tpu.vector_store %arg6[%c0_214, %c3_215, %c0_216, %c0_217], %156 {strides = array<i32>} : memref<1x4x64x4xf32, #tpu.memory_space<vmem>>, vector<1x1x64x4xf32>,
    return
  }
  func.func @transform_0(%arg0: i32) -> (i32, i32, i32, i32) {
    %c0_i32 = arith.constant 0 : i32
    %c0_i32_0 = arith.constant 0 : i32
    %c0_i32_1 = arith.constant 0 : i32
    %c0_i32_2 = arith.constant 0 : i32
    return %arg0, %c0_i32, %c0_i32_0, %c0_i32_1 : i32, i32, i32, i32
  }
  func.func @transform_1(%arg0: i32) -> (i32, i32, i32, i32) {
    %c0_i32 = arith.constant 0 : i32
    %c0_i32_0 = arith.constant 0 : i32
    %c0_i32_1 = arith.constant 0 : i32
    %c0_i32_2 = arith.constant 0 : i32
    %c0_i32_3 = arith.constant 0 : i32
    return %c0_i32, %c0_i32_0, %c0_i32_1, %c0_i32_2 : i32, i32, i32, i32
  }
  func.func @transform_2(%arg0: i32) -> (i32, i32) {
    %c0_i32 = arith.constant 0 : i32
    %c0_i32_0 = arith.constant 0 : i32
    %c0_i32_1 = arith.constant 0 : i32
    return %c0_i32, %c0_i32_0 : i32, i32
  }
  func.func @transform_3(%arg0: i32) -> (i32, i32, i32, i32, i32) {
    %c0_i32 = arith.constant 0 : i32
    %c0_i32_0 = arith.constant 0 : i32
    %c0_i32_1 = arith.constant 0 : i32
    %c0_i32_2 = arith.constant 0 : i32
    %c0_i32_3 = arith.constant 0 : i32
    %c0_i32_4 = arith.constant 0 : i32
    return %c0_i32, %c0_i32_0, %c0_i32_1, %c0_i32_2, %c0_i32_3 : i32, i32, i32, i32, i32
  }
  func.func @transform_4(%arg0: i32) -> (i32, i32) {
    %c0_i32 = arith.constant 0 : i32
    %c0_i32_0 = arith.constant 0 : i32
    %c0_i32_1 = arith.constant 0 : i32
    return %c0_i32, %c0_i32_0 : i32, i32
  }
  func.func @transform_5(%arg0: i32) -> (i32, i32, i32, i32) {
    %c0_i32 = arith.constant 0 : i32
    %c0_i32_0 = arith.constant 0 : i32
    %c0_i32_1 = arith.constant 0 : i32
    %c0_i32_2 = arith.constant 0 : i32
    return %arg0, %c0_i32, %c0_i32_0, %c0_i32_1 : i32, i32, i32, i32
  }
}

</mosaic_0001>

<bundles_post_ra>
// kernel: unet_block_with_z_forward.1
= control target key start
LH: loop header
LB: loop body
LE: loop exit
PB: predicated region body
PF: predicated region fallthrough
CT: control target
= control target key end

     0   :  { %10 = vsyncpa [#allocation4], 0  ;;  %s7038_s0 = inlined_call_operand.hbm [shape: bf16[2,9,9,128], index: 0, kind: input, shape index: {}]   ;;  %s7039_s1 = inlined_call_operand.hbm [shape: bf16[2,2,128,16], index: 1, kind: input, shape index: {}]   ;;  %s7040_s2 = inlined_call_operand.hbm [shape: f32[1,16], index: 2, kind: input, shape index: {}]   ;;  %s7041_s3 = inlined_call_operand.hbm [shape: bf16[2,2,4,16,4], index: 3, kind: input, shape index: {}]   ;;  %s7042_s4 = inlined_call_operand.hbm [shape: f32[1,4], index: 4, kind: input, shape index: {}]   ;;  %s7043_s5 = inlined_call_operand.hbm [shape: f32[2,4,64,4], index: 5, kind: output, shape index: {}]  }
   0x1   :  { %12 = vsyncpa [#allocation4 + $0x1], 0 }
   0x2   :  { %13 = vsyncpa [#allocation7], 0 }
   0x3   :  { %14 = vsyncpa [#allocation10], 0 }
   0x4   :  { %15 = vsyncpa [#allocation5], 0 }
   0x5   :  { %17 = vsyncpa [#allocation5 + $0x1], 0  ;;  %s5842_s18 = smov 0   ;;  %s5844_s19 = smov 0  }
   0x6   :  { %s5846_s20 = smov 0   ;;  %s5848_s21 = smov 0  }
   0x7 LB: > { %s5863_s22 = sadd.s32 4294967295, %s5799_s21   ;;  %s4592_s23 = sadd.s32 4294967294, %s5799_s21   ;;  %s5799_s21 = sphi %s5848_s21, %s7078_s21   ;;  %s5795_s20 = sphi %s5846_s20, %s7077_s20   ;;  %s5791_s19 = sphi %s5844_s19, %s7076_s19   ;;  %s5787_s18 = sphi %s5842_s18, %s7075_s18  }
   0x8   : > { %p43_p0 = scmp.ne.s32.totalorder %s5791_s19, %s5787_s18  ;;  %p7044_p1 = scmp.eq.s32.totalorder %s5863_s22, 0 }
   0x9   : > { %p157_p3 = scmp.eq.s32.totalorder %s4592_s23, 1  ;;  %p4593_p5 = scmp.ge.s32.totalorder %s5799_s21, 1 }
   0xa   : > { %p5872_p4 = por %p7044_p1, %p43_p0  ;;  %p164_p7 = scmp.lt.s32.totalorder %s5799_s21, 3 }
   0xb   : > { %p5877_p6 = por %p157_p3, %p43_p0  ;;  %s5801_s27 = smov [#allocation6]  }
   0xc   : > { %s7048_s24 = scalar_select %p5872_p4, 1, 0 }
   0xd   : > { %s7049_s25 = scalar_select %p5877_p6, 1, 0 }
   0xe   : > { %p5882_p8 = pnand %p4593_p5, %p164_p7  ;;  %s176_s28 = sshll.u32 %s5801_s27, 4  ;;  %s5886_s28 = int_to_ptr.vmem [resolvable:$true] %s176_s28 }
   0xf   : > { %s5802_s30 = smov [#allocation9]   ;;  %s5803_s7 = smov [#allocation8]  }
  0x10   : > { %s7050_s26 = scalar_select %p5882_p8, 1, 0 }
  0x11   : > { %p5434_p9 = pneg %p5882_p8  ;;  %s200_s6 = sshll.u32 %s5802_s30, 4  ;;  %s5897_s6 = int_to_ptr.vmem [resolvable:$true] %s200_s6 }
  0x12   : > { %s5899_s8 = sshll.u32 %s5803_s7, 4  ;;  %s5583_s11 = scalar_lea.hbm %s7039_s1, 4096  ;;  %s191_s8 = int_to_ptr.vmem [resolvable:$true] %s5899_s8 }
  0x13   : > { %p5893_p11 = pnand %p5434_p9, %p7044_p1  ;;  %p5584_p12 = scmp.ne.s32.totalorder %s7039_s1, %s5583_s11 }
  0x14   : > { %p5590_p5 = scmp.lt.u32.totalorder %s5583_s11, %s7039_s1 }
  0x15   : > { %p5909_p13 = pneg %p5893_p11 }
  0x17   : > { %p5586_p0 = pnand %p5909_p13, %p5584_p12 }
  0x19   : > { %p5587_p3 = pneg %p5586_p0 }
  0x1b   : > { %p5592_p7 = pnand %p5590_p5, %p5587_p3 }
  0x1d   : > { %5595 = shalt.err (!%p5592_p7)
}
  0x1e   : > { %s5596_s17 = scalar_lea.vmem %s5886_s28, 4096  ;;  %p5604_p2 = scmp.lt.s32.totalorder %s5886_s28, %s5886_s28 }
  0x1f   : > { %p5597_p9 = scmp.ne.s32.totalorder %s5886_s28, %s5596_s17  ;;  %p5605_p6 = scmp.lt.s32.totalorder %s5596_s17, %s5596_s17 }
  0x21   : > { %p5599_p10 = pnand %p5597_p9, %p5909_p13  ;;  %p5606_p12 = por %p5605_p6, %p5604_p2 }
  0x23   : > { %p5600_p1 = pneg %p5599_p10 }
  0x25   : > { %p5607_p0 = pnand %p5606_p12, %p5600_p1 }
  0x27   : > { %5610 = shalt.err (!%p5607_p0)
}
  0x28   : > { %s7047_s23 = smov 64   ;;  %s5805_s27 = smov 4  }
  0x29   : > { %5437 = dma.hbm_to_vmem [thread:$0]  (!%p5893_p11), %s7039_s1, 4096, %s5886_s28, [#allocation7], %s7047_s23, %s7047_s23, %s5805_s27  }
  0x2a   : > { %s5611_s11 = scalar_lea.hbm %s7041_s3, 2048 }
  0x2b   : > { %p5612_p1 = scmp.ne.s32.totalorder %s7041_s3, %s5611_s11  ;;  %p5618_p10 = scmp.lt.u32.totalorder %s5611_s11, %s7041_s3 }
  0x2d   : > { %p5614_p2 = pnand %p5612_p1, %p5909_p13 }
  0x2f   : > { %p5615_p6 = pneg %p5614_p2 }
  0x31   : > { %p5620_p3 = pnand %p5618_p10, %p5615_p6 }
  0x33   : > { %5623 = shalt.err (!%p5620_p3)
}
  0x34   : > { %s5624_s28 = scalar_lea.vmem %s5897_s6, 2048  ;;  %p5632_p12 = scmp.lt.s32.totalorder %s5897_s6, %s5897_s6 }
  0x35   : > { %p5625_p5 = scmp.ne.s32.totalorder %s5897_s6, %s5624_s28  ;;  %p5633_p0 = scmp.lt.s32.totalorder %s5624_s28, %s5624_s28 }
  0x37   : > { %p5627_p7 = pnand %p5625_p5, %p5909_p13  ;;  %p5634_p1 = por %p5633_p0, %p5632_p12 }
  0x39   : > { %p5628_p9 = pneg %p5627_p7 }
  0x3b   : > { %p5635_p2 = pnand %p5634_p1, %p5628_p9 }
  0x3d   : > { %5638 = shalt.err (!%p5635_p2)
}
  0x3e   : > { %5443 = dma.hbm_to_vmem [thread:$0]  (!%p5893_p11), %s7041_s3, 2048, %s5897_s6, [#allocation10], %s7047_s23, %s7047_s23, %s5805_s27  }
  0x3f   : > { %s5639_s10 = scalar_lea.hbm %s7040_s2, 16 }
  0x40   : > { %p5640_p6 = scmp.ne.s32.totalorder %s7040_s2, %s5639_s10  ;;  %p5646_p5 = scmp.lt.u32.totalorder %s5639_s10, %s7040_s2 }
  0x42   : > { %p5642_p10 = pnand %p5640_p6, %p5909_p13 }
  0x44   : > { %p5643_p3 = pneg %p5642_p10 }
  0x46   : > { %p5648_p7 = pnand %p5646_p5, %p5643_p3 }
  0x48   : > { %5651 = shalt.err (!%p5648_p7)
}
  0x49   : > { %s5652_s16 = scalar_lea.vmem %s191_s8, 16  ;;  %s5659_s6 = scalar_lea.vmem %s191_s8, 32 }
  0x4a   : > { %p5653_p9 = scmp.ne.s32.totalorder %s191_s8, %s5652_s16  ;;  %p5660_p1 = scmp.lt.s32.totalorder %s191_s8, %s191_s8 }
  0x4b   : > { %p5661_p2 = scmp.lt.s32.totalorder %s5659_s6, %s5652_s16 }
  0x4c   : > { %p5655_p12 = pnand %p5653_p9, %p5909_p13 }
  0x4d   : > { %p5662_p4 = por %p5661_p2, %p5660_p1 }
  0x4e   : > { %p5656_p0 = pneg %p5655_p12 }
  0x50   : > { %p5663_p8 = pnand %p5662_p4, %p5656_p0 }
  0x52   : > { %5666 = shalt.err (!%p5663_p8)
}
  0x53   : > { %5440 = dma.hbm_to_vmem [thread:$0]  (!%p5893_p11), %s7040_s2, 16, %s191_s8, [#allocation7]  }
  0x54   : > { %s5806_s30 = smov [#allocation11]   ;;  %s5667_s11 = scalar_lea.hbm %s7042_s4, 16 }
  0x55   : > { %s214_s7 = sshll.u32 %s5806_s30, 4  ;;  %p5668_p6 = scmp.ne.s32.totalorder %s7042_s4, %s5667_s11  ;;  %s215_s7 = int_to_ptr.vmem [resolvable:$true] %s214_s7 }
  0x56   : > { %p5674_p10 = scmp.lt.u32.totalorder %s5667_s11, %s7042_s4 }
  0x57   : > { %p5670_p4 = pnand %p5668_p6, %p5909_p13 }
  0x59   : > { %p5671_p8 = pneg %p5670_p4 }
  0x5b   : > { %p5676_p3 = pnand %p5674_p10, %p5671_p8 }
  0x5d   : > { %5679 = shalt.err (!%p5676_p3)
}
  0x5e   : > { %s5680_s8 = scalar_lea.vmem %s215_s7, 16  ;;  %s5687_s6 = scalar_lea.vmem %s215_s7, 32 }
  0x5f   : > { %p5681_p5 = scmp.ne.s32.totalorder %s215_s7, %s5680_s8  ;;  %p5688_p12 = scmp.lt.s32.totalorder %s215_s7, %s215_s7 }
  0x60   : > { %p5689_p0 = scmp.lt.s32.totalorder %s5687_s6, %s5680_s8 }
  0x61   : > { %p5683_p7 = pnand %p5681_p5, %p5909_p13 }
  0x62   : > { %p5690_p1 = por %p5689_p0, %p5688_p12 }
  0x63   : > { %p5684_p9 = pneg %p5683_p7 }
  0x65   : > { %p5691_p2 = pnand %p5690_p1, %p5684_p9 }
  0x67   : > { %5694 = shalt.err (!%p5691_p2)
}
  0x68   : > { %5446 = dma.hbm_to_vmem [thread:$0]  (!%p5893_p11), %s7042_s4, 16, %s215_s7, [#allocation10]  }
  0x69   : > { %s5997_s14 = sadd.s32 1, %s5799_s21   ;;  %s30_s30 = sadd.s32 1, %s5795_s20 }
  0x6a   : > { %s27_s29 = ssub.s32 %s5799_s21, %s5997_s14  ;;  %p37_p13 = scmp.ne.s32.totalorder %s5795_s20, %s5791_s19 }
  0x6b   : > { %p28_p6 = scmp.eq.s32.totalorder %s27_s29, 0  ;;  %p38_p4 = scmp.eq.s32.totalorder %s5799_s21, 0 }
  0x6c   : > { %p7053_p8 = scmp.eq.s32.totalorder %s5863_s22, 1  ;;  %p5459_p3 = scmp.lt.s32.totalorder %s5799_s21, 2 }
  0x6d   : > { %s6013_s10 = scalar_select %p28_p6, %s5795_s20, %s30_s30  }
  0x6e   : > { %p6007_p10 = por %p7053_p8, %p37_p13  ;;  %p39_p5 = por %p38_p4, %p37_p13 }
  0x6f   : > { %s225_s11 = sand.u32 1, %s5795_s20   ;;  %s5412_s7 = smul.u32 1152, %s5799_s21 }
  0x70   : > { %s5411_s12 = smul.u32 72, %s225_s11  ;;  %p6017_p11 = pnand %p5459_p3, %p39_p5 }
  0x71   : > { %s6024_s8 = scalar_lea.hbm %s7038_s0, %s5412_s7  ;;  %s6028_s17 = scalar_lea.sflag [#allocation4], %s225_s11 }
  0x72   : > { %s229_s6 = scalar_lea.vmem [#allocation3], %s5411_s12  ;;  %s5695_s30 = scalar_lea.hbm %s6024_s8, 1152 }
  0x73   : > { %s236_s28 = sshll.u32 %s229_s6, 4  ;;  %p5696_p7 = scmp.ne.s32.totalorder %s6024_s8, %s5695_s30  ;;  %s6026_s28 = int_to_ptr.vmem [resolvable:$true] %s236_s28 }
  0x74   : > { %p5697_p9 = pneg %p6017_p11  ;;  %s5700_s15 = scalar_lea.hbm %s7038_s0, 2304 }
  0x75   : > { %p5701_p1 = scmp.lt.u32.totalorder %s6024_s8, %s7038_s0  ;;  %p5702_p2 = scmp.lt.u32.totalorder %s5700_s15, %s5695_s30 }
  0x76   : > { %p5698_p12 = pnand %p5697_p9, %p5696_p7  ;;  %p5704_p6 = scmp.lt.u32.totalorder %s5695_s30, %s6024_s8 }
  0x77   : > { %p5703_p13 = por %p5702_p2, %p5701_p1 }
  0x78   : > { %p5699_p0 = pneg %p5698_p12 }
  0x79   : > { %p5705_p4 = por %p5704_p6, %p5703_p13 }
  0x7b   : > { %p5706_p8 = pnand %p5705_p4, %p5699_p0 }
  0x7d   : > { %5709 = shalt.err (!%p5706_p8)
}
  0x7e   : > { %s5710_s11 = scalar_lea.vmem %s6026_s28, 1152  ;;  %s5807_s12 = smov [#allocation3]  }
  0x7f   : > { %p5711_p3 = scmp.ne.s32.totalorder %s6026_s28, %s5710_s11  ;;  %s5715_s6 = sshll.u32 %s5807_s12, 4  ;;  %s5716_s6 = int_to_ptr.vmem [resolvable:$false] %s5715_s6 }
  0x80   : > { %s5717_s23 = scalar_lea.vmem %s5716_s6, 2304  ;;  %p5718_p12 = scmp.lt.s32.totalorder %s6026_s28, %s5716_s6 }
  0x81   : > { %p5713_p5 = pnand %p5711_p3, %p5697_p9  ;;  %p5719_p1 = scmp.lt.s32.totalorder %s5717_s23, %s5710_s11 }
  0x83   : > { %p5714_p7 = pneg %p5713_p5  ;;  %p5720_p2 = por %p5719_p1, %p5718_p12 }
  0x85   : > { %p5721_p13 = pnand %p5720_p2, %p5714_p7 }
  0x87   : > { %5724 = shalt.err (!%p5721_p13)
}
  0x88   : > { %s7056_s30 = smov 64   ;;  %p7057_p9 = scmp.ne.s32.totalorder %s7050_s26, 0 }
  0x89   : > { %5450 = dma.hbm_to_vmem [thread:$0]  (!%p6017_p11), %s6024_s8, 1152, %s6026_s28, %s6028_s17, %s7056_s30, %s7056_s30, %s5805_s27  }
  0x8a   : > { %248 = sbr.rel (%p7057_p9) target bundleno = 981 (0x3d5), region = 40  ;;  %s6062_s29 = sand.u32 (!%p7057_p9), 1, %s5791_s19  }
  0x8b   : > { %s5413_s7 = smul.u32 (!%p7057_p9), 72, %s6062_s29  ;;  %s251_s15 = scalar_lea.sflag (!%p7057_p9), [#allocation4], %s6062_s29 }
  0x8c   : > { %p7058_p0 = scmp.ne.s32.totalorder (!%p7057_p9), %s7048_s24, 0 }
  0x8d   : > { %s6066_s16 = scalar_lea.vmem (!%p7057_p9), [#allocation3], %s5413_s7 }
  0x91   : > { %5770 = dma.done.wait (%p7058_p0), %s251_s15, 1152  }
  0x92   : > { %5772 = vsyncadd (%p7058_p0), %s251_s15, 4294966144  ;;  %p7059_p11 = scmp.eq.s32.totalorder %s5863_s22, 0 }
  0x94   : > { %5774 = dma.done.wait (%p7059_p11), [#allocation7], 4112   ;;  %p7060_p6 = pmov %p7059_p11 }
  0x96   : > { %5776 = vsyncadd (%p7060_p6), [#allocation7], 4294963184  ;;  %p7061_p4 = pmov %p7060_p6 }
  0x98   : > { %5778 = dma.done.wait (%p7061_p4), [#allocation10], 2064   ;;  %p7062_p8 = pmov %p7061_p4 }
  0x99   : > { %v5506_v0 = vld [vmem:[#allocation6 + $0x40] sm:$0xff]   ;;  %v5507_v1 = vld [vmem:[#allocation6 + $0x48] sm:$0xff]   ;;  %v5508_v2 = vld [vmem:[#allocation6 + $0x50] sm:$0xff]   ;;  %vm330_vm0 = vsmask.f32 3328  ;;  %vm1206_vm3 = vcmask 122880  }
  0x9a   : > { %5780 = vsyncadd (%p7062_p8), [#allocation10], 4294965232  ;;  %5033 = vmatprep.subr.bf16.mxu0 %v5506_v0  ;;  %vm331_vm1 = vsmask.f32 7440  ;;  %v5509_v3 = vld [vmem:[#allocation6 + $0x58] sm:$0xff]   ;;  %v5510_v14 = vld [vmem:[#allocation6 + $0x60] sm:$0xff]  }
  0x9b   : > { %5034 = vmatpush3.bf16.msra.mxu0 %v5506_v0  ;;  %v6081_v4 = vld [vmem:[%s6066_s16] sm:$0xf]  ;;  %v6084_v5 = vld [vmem:[%s6066_s16 + $0x8] sm:$0xf]  ;;  %v322_v6 = vld [vmem:[%s6066_s16 + $0x4] sm:$0x1] }
  0x9c   : > { %5035 = vmatprep.subr.bf16.mxu0 %v5507_v1  ;;  %v323_v7 = vld [vmem:[%s6066_s16 + $0xc] sm:$0x1]  ;;  %v334_v8 = vshrl.u32 %v6081_v4, 16  ;;  %v337_v9 = vshll.u32 %v6081_v4, 16  ;;  %v343_v10 = vshll.u32 %v322_v6, 16  ;;  %v348_v11 = vshrl.u32 %v6084_v5, 16  ;;  %vm6104_vm2 = vmor %vm330_vm0, %vm331_vm1 }
  0x9d   : > { %v351_v12 = vshll.u32 %v6084_v5, 16  ;;  %v357_v13 = vshll.u32 %v323_v7, 16  ;;  %v6093_v21 = vld [vmem:[%s6066_s16 + $0x10] sm:$0xf]  ;;  %v6096_v22 = vld [vmem:[%s6066_s16 + $0x18] sm:$0xf] }
  0x9e   : > { %v336_v15 = vrot.slane %v334_v8, 4  ;;  %v339_v16 = vrot.slane %v337_v9, 5  ;;  %v345_v17 = vrot.slane %v343_v10, 5  ;;  %v350_v18 = vrot.slane %v348_v11, 4  ;;  %v324_v24 = vld [vmem:[%s6066_s16 + $0x14] sm:$0x1] }
  0x9f   : > { %5036 = vmatpush3.bf16.msra.mxu0 %v5507_v1  ;;  %v353_v19 = vrot.slane %v351_v12, 5  ;;  %v359_v20 = vrot.slane %v357_v13, 5  ;;  %v325_v25 = vld [vmem:[%s6066_s16 + $0x1c] sm:$0x1]  ;;  %v362_v26 = vshrl.u32 %v6093_v21, 16  ;;  %v365_v27 = vshll.u32 %v6093_v21, 16 }
  0xa0   : > { %5037 = vmatprep.subr.bf16.mxu0 %v5508_v2  ;;  %v340_v23 = vor.u32 %v339_v16, %v336_v15  ;;  %v371_v30 = vshll.u32 %v324_v24, 16  ;;  %v376_v31 = vshrl.u32 %v6096_v22, 16  ;;  %v379_v32 = vshll.u32 %v6096_v22, 16  ;;  %v5511_v37 = vld [vmem:[#allocation6 + $0x68] sm:$0xff]   ;;  %v5512_v43 = vld [vmem:[#allocation6 + $0x70] sm:$0xff]   ;;  %v5513_v63 = vld [vmem:[#allocation6 + $0x78] sm:$0xff]  }
  0xa1   : > { %v354_v29 = vor.u32 %v353_v19, %v350_v18  ;;  %v364_v34 = vrot.slane %v362_v26, 4  ;;  %v367_v35 = vrot.slane %v365_v27, 5  ;;  %v385_v36 = vshll.u32 %v325_v25, 16  ;;  %v6115_v51 = vld [vmem:[%s6066_s16 + $0x20] sm:$0xf]  ;;  %v5514_v24 = vld [vmem:[#allocation6] sm:$0xff]  }
  0xa2   : > { %v341_v33 = vrot.slane %v340_v23, 4  ;;  %v378_v39 = vrot.slane %v376_v31, 4  ;;  %v381_v40 = vrot.slane %v379_v32, 5  ;;  %v373_v47 = vrot.slane %v371_v30, 5  ;;  %v6118_v52 = vld [vmem:[%s6066_s16 + $0x28] sm:$0xf] }
  0xa3   : > { %5038 = vmatpush3.bf16.msra.mxu0 %v5508_v2  ;;  %v355_v38 = vrot.slane %v354_v29, 4  ;;  %v368_v42 = vor.u32 %v367_v35, %v364_v34  ;;  %v387_v48 = vrot.slane %v385_v36, 5  ;;  %v326_v53 = vld [vmem:[%s6066_s16 + $0x24] sm:$0x1]  ;;  %v327_v54 = vld [vmem:[%s6066_s16 + $0x2c] sm:$0x1] }
  0xa4   : > { %5039 = vmatprep.subr.bf16.mxu0 %v5509_v3  ;;  %v346_v41 = vsel %vm6104_vm2, %v341_v33, %v345_v17  ;;  %v382_v45 = vor.u32 %v381_v40, %v378_v39  ;;  %v390_v55 = vshrl.u32 %v6115_v51, 16  ;;  %v393_v56 = vshll.u32 %v6115_v51, 16  ;;  %v6129_v6 = vld [vmem:[%s6066_s16 + $0x30] sm:$0xf]  ;;  %v6134_v10 = vld [vmem:[%s6066_s16 + $0x38] sm:$0xf] }
  0xa5   : > { %v360_v44 = vsel %vm6104_vm2, %v355_v38, %v359_v20  ;;  %v369_v49 = vrot.slane %v368_v42, 4  ;;  %v399_v57 = vshll.u32 %v326_v53, 16  ;;  %v404_v58 = vshrl.u32 %v6118_v52, 16  ;;  %v328_v11 = vld [vmem:[%s6066_s16 + $0x34] sm:$0x1]  ;;  %s4605_s24 = sshll.u32 %s6062_s29, 8 }
  0xa6   : > { %v4606_v46 = vcombine.low %v346_v41, %v360_v44  ;;  %v383_v50 = vrot.slane %v382_v45, 4  ;;  %v407_v59 = vshll.u32 %v6118_v52, 16  ;;  %v392_v60 = vrot.slane %v390_v55, 4  ;;  %v5515_v38 = vld [vmem:[#allocation6 + $0x8] sm:$0xff]   ;;  %v5526_v55 = vld [vmem:[#allocation6 + $0x90] sm:$0xff]   ;;  %s6879_s26 = scalar_lea.vmem [#allocation12], %s4605_s24 }
  0xa7   : > { %5040 = vmatpush3.bf16.msra.mxu0 %v5509_v3  ;;  %v395_v61 = vrot.slane %v393_v56, 5  ;;  %v413_v62 = vshll.u32 %v327_v54, 16  ;;  %v374_v0 = vsel %vm6104_vm2, %v369_v49, %v373_v47  ;;  %v401_v1 = vrot.slane %v399_v57, 5  ;;  %v5518_v47 = vld [vmem:[#allocation6 + $0x20] sm:$0xff]   ;;  %v5520_v49 = vld [vmem:[#allocation6 + $0x30] sm:$0xff]   ;;  %v5525_v54 = vld [vmem:[#allocation6 + $0x88] sm:$0xff]  }
  0xa8   : > { %5041 = vmatprep.subr.bf16.mxu0 %v5510_v14  ;;  %5049 = vmatprep.mubr.bf16.mxu0 %v4606_v46  ;;  %v406_v2 = vrot.slane %v404_v58, 4  ;;  %v409_v3 = vrot.slane %v407_v59, 5  ;;  %v388_v7 = vsel %vm6104_vm2, %v383_v50, %v387_v48  ;;  %v418_v12 = vshrl.u32 %v6129_v6, 16  ;;  %v5517_v46 = vld [vmem:[#allocation6 + $0x18] sm:$0xff]   ;;  %v5519_v48 = vld [vmem:[#allocation6 + $0x28] sm:$0xff]   ;;  %v5531_v59 = vld [vmem:[#allocation6 + $0xb0] sm:$0xff]  }
  0xa9   : > { %v396_v8 = vor.u32 %v395_v61, %v392_v60  ;;  %v415_v9 = vrot.slane %v413_v62, 5  ;;  %v421_v15 = vshll.u32 %v6129_v6, 16  ;;  %v427_v16 = vshll.u32 %v328_v11, 16  ;;  %v5521_v50 = vld [vmem:[#allocation6 + $0x38] sm:$0xff]   ;;  %v6875_v28 = vld [vmem:[#allocation11] ss:$0 sm:$0xff] }
  0xaa   : > { %v410_v13 = vor.u32 %v409_v3, %v406_v2  ;;  %v432_v17 = vshrl.u32 %v6134_v10, 16  ;;  %v420_v19 = vrot.slane %v418_v12, 4  ;;  %v435_v20 = vshll.u32 %v6134_v10, 16  ;;  %v5527_v56 = vld [vmem:[#allocation6 + $0x98] sm:$0xff]   ;;  %s4904_s27 = sshll.u32 %s5863_s22, 12  ;;  %s4481_s13 = sshll.u32 %s6879_s26, 4  ;;  %s6987_s13 = int_to_ptr.vmem [resolvable:$true] %s4481_s13 }
  0xab   : > { %5042 = vmatpush3.bf16.msra.mxu0 %v5510_v14  ;;  %v329_v14 = vld [vmem:[%s6066_s16 + $0x3c] sm:$0x1]  ;;  %v397_v18 = vrot.slane %v396_v8, 4  ;;  %v423_v26 = vrot.slane %v421_v15, 5  ;;  %v4607_v31 = vcombine.low %v374_v0, %v388_v7  ;;  %v429_v35 = vrot.slane %v427_v16, 5  ;;  %v5533_v0 = vld [vmem:[#allocation6 + $0xb8] sm:$0xff]   ;;  %s6985_s17 = scalar_lea.hbm %s7043_s5, %s4904_s27 }
  0xac   : > { %5043 = vmatprep.subr.bf16.mxu0 %v5511_v37  ;;  %v441_v23 = vshll.u32 %v329_v14, 16  ;;  %v411_v25 = vrot.slane %v410_v13, 4  ;;  %v434_v27 = vrot.slane %v432_v17, 4  ;;  %v437_v30 = vrot.slane %v435_v20, 5  ;;  %v5534_v58 = vld [vmem:[%s6066_s16 + $0x8] ss:$8 sps:$4 sm:$0xff]  }
  0xad   : > { %v402_v29 = vsel %vm6104_vm2, %v397_v18, %v401_v1  ;;  %v424_v33 = vor.u32 %v423_v26, %v420_v19  ;;  %v4618_v45 = vcombine.low %v6081_v4, %v6084_v5  ;;  %v5523_v4 = vld [vmem:[#allocation6 + $0x80] sm:$0xff]   ;;  %v4619_v5 = vcombine.low %v6093_v21, %v6096_v22  ;;  %v5529_v22 = vld [vmem:[#allocation6 + $0xa8] sm:$0xff]   ;;  %s4468_s22 = scalar_lea.sflag [#allocation5], %s6062_s29  ;;  %s5725_s11 = scalar_lea.vmem %s6987_s13, 4096 }
  0xae   : > { %v416_v32 = vsel %vm6104_vm2, %v411_v25, %v415_v9  ;;  %v438_v36 = vor.u32 %v437_v30, %v434_v27  ;;  %v4620_v53 = vcombine.low %v6115_v51, %v6118_v52  ;;  %v4621_v57 = vcombine.low %v6129_v6, %v6134_v10  ;;  %v5528_v21 = vld [vmem:[#allocation6 + $0xa0] sm:$0xff]   ;;  %v5536_v14 = vld [vmem:[%s6066_s16 + $0x18] ss:$8 sps:$4 sm:$0xff]   ;;  %p5726_p3 = scmp.ne.s32.totalorder %s6987_s13, %s5725_s11  ;;  %s5809_s12 = smov [#allocation12]  }
  0xaf   : > { %5044 = vmatpush3.bf16.msra.mxu0 %v5511_v37  ;;  %v4608_v34 = vcombine.low %v402_v29, %v416_v32  ;;  %v443_v37 = vrot.slane %v441_v23, 5  ;;  %v425_v39 = vrot.slane %v424_v33, 4  ;;  %v4650_v51 = vld [vmem:[%s6066_s16 + $0x8] sm:$0xf]  ;;  %v4652_v52 = vld [vmem:[%s6066_s16 + $0x10] sm:$0xf] }
  0xb0   : > { %5045 = vmatprep.subr.bf16.mxu0 %v5512_v43  ;;  %v439_v40 = vrot.slane %v438_v36, 4  ;;  %v916_v60 = vshrl.u32 %v4650_v51, 16  ;;  %v919_v61 = vshll.u32 %v4650_v51, 16  ;;  %v930_v62 = vshrl.u32 %v4652_v52, 16  ;;  %v4651_v7 = vld [vmem:[%s6066_s16 + $0xc] sm:$0x1]  ;;  %p5727_p5 = pnand %p5726_p3, %p6007_p10 }
  0xb1   : > { %v430_v41 = vsel %vm6104_vm2, %v425_v39, %v429_v35  ;;  %v4653_v8 = vld [vmem:[%s6066_s16 + $0x14] sm:$0x1]  ;;  %v925_v11 = vshll.u32 %v4651_v7, 16  ;;  %v5542_v15 = vld [vmem:[%s6066_s16 + $0x28] ss:$8 sps:$4 sm:$0xff]   ;;  %v5538_v23 = vld [vmem:[#allocation6 + $0xd0] sm:$0xff]  }
  0xb2   : > { %v444_v42 = vsel %vm6104_vm2, %v439_v40, %v443_v37  ;;  %v918_v1 = vrot.slane %v916_v60, 4  ;;  %v921_v2 = vrot.slane %v919_v61, 5  ;;  %v932_v3 = vrot.slane %v930_v62, 4  ;;  %v5535_v9 = vld [vmem:[#allocation6 + $0xc0] sm:$0xff]   ;;  %v5537_v16 = vld [vmem:[#allocation6 + $0xc8] sm:$0xff]   ;;  %v5544_v62 = vld [vmem:[#allocation6 + $0xf0] sm:$0xff]   ;;  %p5728_p7 = pneg %p5727_p5 }
  0xb3   : > { %5046 = vmatpush3.bf16.msra.mxu0 %v5512_v43  ;;  %v5516_v43 = vld [vmem:[#allocation6 + $0x10] sm:$0xff]   ;;  %v4609_v44 = vcombine.low %v430_v41, %v444_v42  ;;  %v939_v13 = vshll.u32 %v4653_v8, 16  ;;  %v927_v18 = vrot.slane %v925_v11, 5  ;;  %v4658_v32 = vld [vmem:[%s6066_s16 + $0x28] sm:$0xf]  ;;  %vm1204_vm6 = vcmask 125952  }
  0xb4   : > { %5047 = vmatprep.subr.bf16.mxu0 %v5513_v63  ;;  %v922_v10 = vor.u32 %v921_v2, %v918_v1  ;;  %v5543_v26 = vld [vmem:[%s6066_s16 + $0x38] ss:$8 sps:$4 sm:$0xff]   ;;  %v4660_v33 = vld [vmem:[%s6066_s16 + $0x30] sm:$0xf]  ;;  %v972_v39 = vshrl.u32 %v4658_v32, 16  ;;  %v975_v40 = vshll.u32 %v4658_v32, 16 }
  0xb5   : > { %v941_v20 = vrot.slane %v939_v13, 5  ;;  %v4654_v29 = vld [vmem:[%s6066_s16 + $0x18] sm:$0xf]  ;;  %v4656_v30 = vld [vmem:[%s6066_s16 + $0x20] sm:$0xf]  ;;  %v986_v41 = vshrl.u32 %v4660_v33, 16 }
  0xb6   : > { %v923_v17 = vrot.slane %v922_v10, 4  ;;  %v947_v35 = vshll.u32 %v4654_v29, 16  ;;  %v958_v36 = vshrl.u32 %v4656_v30, 16  ;;  %v961_v37 = vshll.u32 %v4656_v30, 16  ;;  %v4663_v10 = vld [vmem:[%s6066_s16 + $0x3c] sm:$0x1] }
  0xb7   : > { %5048 = vmatpush3.bf16.msra.mxu0 %v5513_v63  ;;  %v933_v63 = vshll.u32 %v4652_v52, 16  ;;  %v989_v42 = vshll.u32 %v4660_v33, 16  ;;  %vm1212_vm4 = vsmask.f32 256  ;;  %vm1244_vm5 = vsmask.f32 7938 }
  0xb8   : > { %5057 = vmatprep.subr.bf16.mxu0 %v5514_v24  ;;  %vm6194_vm7 = vmand %vm1206_vm3, %vm1212_vm4  ;;  %vm2306_vm10 = vcmask 1042432   ;;  %vm2307_vm11 = vcmask 1046532   ;;  %vm1590_vm12 = vcmask 130048   ;;  %vm2142_vm14 = vcmask 31744   ;;  %s5729_s6 = sshll.u32 %s5809_s12, 4  ;;  %s5730_s6 = int_to_ptr.vmem [resolvable:$false] %s5729_s6 }
  0xb9   : > { %v935_v6 = vrot.slane %v933_v63, 5  ;;  %vm6203_vm8 = vmand %vm1206_vm3, %vm1244_vm5  ;;  %s5731_s23 = scalar_lea.vmem %s5730_s6, 8192  ;;  %p5732_p12 = scmp.lt.s32.totalorder %s6987_s13, %s5730_s6 }
  0xba   : > { %5050 = vmatmul.mubr.bf16.vlgmr.msra.gmra.mrb[0].mxu0 %v4607_v31  ;;  %v5539_v31 = vld [vmem:[#allocation6 + $0xd8] sm:$0xff]   ;;  %vm6229_vm9 = vmand %vm1204_vm6, %vm1244_vm5  ;;  %p5733_p1 = scmp.lt.s32.totalorder %s5731_s23, %s5725_s11 }
  0xbb   : > { %5058 = vmatpush3.bf16.msra.mxu0 %v5514_v24  ;;  %5053 = vmatprep.mubr.bf16.mxu0 %v4608_v34  ;;  %v936_v12 = vor.u32 %v935_v6, %v932_v3  ;;  %v928_v24 = vsel %vm6104_vm2, %v923_v17, %v927_v18  ;;  %v944_v34 = vshrl.u32 %v4654_v29, 16  ;;  %v5545_v3 = vld [vmem:[#allocation6 + $0xf8] sm:$0xff]   ;;  %vm6326_vm13 = vmor %vm2306_vm10, %vm2307_vm11 }
  0xbc   : > { %5059 = vmatprep.subr.bf16.mxu0 %v5515_v38  ;;  %p5734_p2 = por %p5733_p1, %p5732_p12 }
  0xbd   : > { %v937_v19 = vrot.slane %v936_v12, 4 }
  0xbe   : > { %p5735_p13 = pnand %p5734_p2, %p5728_p7 }
  0xbf   : > { %5060 = vmatpush3.bf16.msra.mxu0 %v5515_v38  ;;  %v942_v25 = vsel %vm6104_vm2, %v937_v19, %v941_v20  ;;  %v5540_v38 = vld [vmem:[#allocation6 + $0xe0] sm:$0xff]   ;;  %v4665_v19 = vld [vmem:[%s6066_s16 + $0x44] sm:$0x1] }
  0xc0   : > { %5061 = vmatprep.subr.bf16.mxu0 %v5516_v43  ;;  %v4666_v27 = vcombine.low %v928_v24, %v942_v25 }
  0xc2   : > { %5054 = vmatmul.mubr.bf16.gmra.mrb[4].mxu0 %v4609_v44  ;;  %v946_v44 = vrot.slane %v944_v34, 4 }
  0xc3   : > { %5062 = vmatpush3.bf16.msra.mxu0 %v5516_v43  ;;  %5073 = vmatprep.mubr.bf16.mxu0 %v4618_v45  ;;  %v5541_v43 = vld [vmem:[#allocation6 + $0xe8] sm:$0xff]   ;;  %v949_v45 = vrot.slane %v947_v35, 5 }
  0xc4   : > { %5063 = vmatprep.subr.bf16.mxu0 %v5517_v46 }
  0xc7   : > { %5064 = vmatpush3.bf16.msra.mxu0 %v5517_v46  ;;  %v960_v46 = vrot.slane %v958_v36, 4 }
  0xc8   : > { %5065 = vmatprep.subr.bf16.mxu0 %v5518_v47 }
  0xcb   : > { %5066 = vmatpush3.bf16.msra.mxu0 %v5518_v47  ;;  %v963_v47 = vrot.slane %v961_v37, 5 }
  0xcc   : > { %5067 = vmatprep.subr.bf16.mxu0 %v5519_v48 }
  0xcf   : > { %5068 = vmatpush3.bf16.msra.mxu0 %v5519_v48  ;;  %v4655_v48 = vld [vmem:[%s6066_s16 + $0x1c] sm:$0x1] }
  0xd0   : > { %5069 = vmatprep.subr.bf16.mxu0 %v5520_v49 }
  0xd3   : > { %5070 = vmatpush3.bf16.msra.mxu0 %v5520_v49  ;;  %v4657_v49 = vld [vmem:[%s6066_s16 + $0x24] sm:$0x1] }
  0xd4   : > { %5071 = vmatprep.subr.bf16.mxu0 %v5521_v50  ;;  %v967_v51 = vshll.u32 %v4657_v49, 16 }
  0xd7   : > { %5072 = vmatpush3.bf16.msra.mxu0 %v5521_v50  ;;  %v4662_v50 = vld [vmem:[%s6066_s16 + $0x38] sm:$0xf] }
  0xd8   : > { %5081 = vmatprep.subr.bf16.mxu0 %v5523_v4  ;;  %v1000_v52 = vshrl.u32 %v4662_v50, 16 }
  0xda   : > { %5074 = vmatmul.mubr.bf16.vlgmr.msra.gmra.mrb[0].mxu0 %v4619_v5  ;;  %v977_v5 = vrot.slane %v975_v40, 5  ;;  %v1002_v11 = vrot.slane %v1000_v52, 4 }
  0xdb   : > { %5082 = vmatpush3.bf16.msra.mxu0 %v5523_v4  ;;  %5077 = vmatprep.mubr.bf16.mxu0 %v4620_v53  ;;  %v974_v4 = vrot.slane %v972_v39, 4  ;;  %v988_v53 = vrot.slane %v986_v41, 4  ;;  %v1223_v41 = vld [vmem:[#allocation2 + $0x18] sm:$0x1] }
  0xdc   : > { %5083 = vmatprep.subr.bf16.mxu0 %v5525_v54 }
  0xdd   : > { %v978_v63 = vor.u32 %v977_v5, %v974_v4  ;;  %v1226_v4 = vld [vmem:[#allocation2 + $0x20] sm:$0x1] }
  0xde   : > { %v1227_v5 = vsel %vm6194_vm7, 0, %v1226_v4 }
  0xdf   : > { %5084 = vmatpush3.bf16.msra.mxu0 %v5525_v54  ;;  %v991_v54 = vrot.slane %v989_v42, 5  ;;  %v1255_v42 = vld [vmem:[#allocation2 + $0x1c] sm:$0x1]  ;;  %1228 = vst [vmem:[#allocation2 + $0x20] sm:$0x1] %v1227_v5 }
  0xe0   : > { %5085 = vmatprep.subr.bf16.mxu0 %v5526_v55 }
  0xe1   : > { %v992_v1 = vor.u32 %v991_v54, %v988_v53  ;;  %v1258_v53 = vld [vmem:[#allocation2 + $0x24] sm:$0x1]  ;;  %v1220_v54 = vld [vmem:[#allocation2 + $0x10] sm:$0x1] }
  0xe2   : > { %5078 = vmatmul.mubr.bf16.gmra.mrb[4].mxu0 %v4621_v57  ;;  %v4661_v57 = vld [vmem:[%s6066_s16 + $0x34] sm:$0x1] }
  0xe3   : > { %5086 = vmatpush3.bf16.msra.mxu0 %v5526_v55  ;;  %5097 = vmatprep.mubr.bf16.mxu0 %v5534_v58  ;;  %v4664_v55 = vld [vmem:[%s6066_s16 + $0x40] sm:$0xf]  ;;  %v950_v58 = vor.u32 %v949_v45, %v946_v44  ;;  %v995_v2 = vshll.u32 %v4661_v57, 16  ;;  %v993_v17 = vrot.slane %v992_v1, 4  ;;  %v1224_v44 = vsel %vm6194_vm7, 0, %v1223_v41 }
  0xe4   : > { %5087 = vmatprep.subr.bf16.mxu0 %v5527_v56  ;;  %v1014_v60 = vshrl.u32 %v4664_v55, 16  ;;  %v1017_v61 = vshll.u32 %v4664_v55, 16  ;;  %1225 = vst [vmem:[#allocation2 + $0x18] sm:$0x1] %v1224_v44  ;;  %v1259_v55 = vsel %vm6203_vm8, 0, %v1258_v53 }
  0xe5   : > { %v951_v6 = vrot.slane %v950_v58, 4  ;;  %v997_v18 = vrot.slane %v995_v2, 5  ;;  %v1252_v57 = vld [vmem:[#allocation2 + $0x14] sm:$0x1]  ;;  %1260 = vst [vmem:[#allocation2 + $0x24] sm:$0x1] %v1259_v55 }
  0xe6   : > { %v1016_v13 = vrot.slane %v1014_v60, 4  ;;  %v1253_v58 = vsel %vm6203_vm8, 0, %v1252_v57  ;;  %v1229_v2 = vld [vmem:[#allocation2 + $0x28] sm:$0x1] }
  0xe7   : > { %5088 = vmatpush3.bf16.msra.mxu0 %v5527_v56  ;;  %v4659_v56 = vld [vmem:[%s6066_s16 + $0x2c] sm:$0x1]  ;;  %v998_v30 = vsel %vm6104_vm2, %v993_v17, %v997_v18  ;;  %1254 = vst [vmem:[#allocation2 + $0x14] sm:$0x1] %v1253_v58 }
  0xe8   : > { %5089 = vmatprep.subr.bf16.mxu0 %v5528_v21  ;;  %v5546_v18 = vld [vmem:[#allocation9 + $0x38] sm:$0xff]  }
  0xeb   : > { %5090 = vmatpush3.bf16.msra.mxu0 %v5528_v21  ;;  %v953_v21 = vshll.u32 %v4655_v48, 16  ;;  %v1256_v48 = vsel %vm6203_vm8, 0, %v1255_v42 }
  0xec   : > { %5091 = vmatprep.subr.bf16.mxu0 %v5529_v22  ;;  %1257 = vst [vmem:[#allocation2 + $0x1c] sm:$0x1] %v1256_v48 }
  0xed   : > { %v955_v7 = vrot.slane %v953_v21, 5 }
  0xef   : > { %5092 = vmatpush3.bf16.msra.mxu0 %v5529_v22  ;;  %v964_v22 = vor.u32 %v963_v47, %v960_v46  ;;  %v956_v20 = vsel %vm6104_vm2, %v951_v6, %v955_v7  ;;  %v1217_v46 = vld [vmem:[#allocation2 + $0x8] sm:$0x1]  ;;  %v1249_v47 = vld [vmem:[#allocation2 + $0xc] sm:$0x1]  ;;  %v1230_v6 = vsel %vm6194_vm7, 0, %v1229_v2 }
  0xf0   : > { %5093 = vmatprep.subr.bf16.mxu0 %v5531_v59  ;;  %v1218_v49 = vsel %vm6194_vm7, 0, %v1217_v46  ;;  %1231 = vst [vmem:[#allocation2 + $0x28] sm:$0x1] %v1230_v6 }
  0xf1   : > { %v965_v8 = vrot.slane %v964_v22, 4  ;;  %1219 = vst [vmem:[#allocation2 + $0x8] sm:$0x1] %v1218_v49 }
  0xf3   : > { %5094 = vmatpush3.bf16.msra.mxu0 %v5531_v59  ;;  %v1003_v59 = vshll.u32 %v4662_v50, 16  ;;  %v1250_v50 = vsel %vm6203_vm8, 0, %v1249_v47 }
  0xf4   : > { %5095 = vmatprep.subr.bf16.mxu0 %v5533_v0  ;;  %1251 = vst [vmem:[#allocation2 + $0xc] sm:$0x1] %v1250_v50 }
  0xf5   : > { %v1005_v12 = vrot.slane %v1003_v59, 5 }
  0xf7   : > { %5096 = vmatpush3.bf16.msra.mxu0 %v5533_v0  ;;  %v981_v0 = vshll.u32 %v4659_v56, 16  ;;  %v1006_v25 = vor.u32 %v1005_v12, %v1002_v11  ;;  %v1221_v56 = vsel %vm6194_vm7, 0, %v1220_v54 }
  0xf8   : > { %5105 = vmatprep.subr.bf16.mxu0 %v5535_v9  ;;  %1222 = vst [vmem:[#allocation2 + $0x10] sm:$0x1] %v1221_v56  ;;  %v1391_v6 = vld [vmem:[#allocation2 + $0x8] sm:$0xf] }
  0xf9   : > { %v1007_v34 = vrot.slane %v1006_v25, 4 }
  0xfa   : > { %5098 = vmatmul.mubr.bf16.vlgmr.msra.gmra.mrb[0].mxu0 %v5536_v14  ;;  %v1019_v14 = vrot.slane %v1017_v61, 5 }
  0xfb   : > { %5106 = vmatpush3.bf16.msra.mxu0 %v5535_v9  ;;  %5101 = vmatprep.mubr.bf16.mxu0 %v5542_v15  ;;  %v969_v9 = vrot.slane %v967_v51, 5  ;;  %v979_v15 = vrot.slane %v978_v63, 4  ;;  %v1267_v63 = vld [vmem:[#allocation2 + $0x3c] sm:$0x1] }
  0xfc   : > { %5107 = vmatprep.subr.bf16.mxu0 %v5537_v16  ;;  %v1268_v1 = vsel %vm6203_vm8, 0, %v1267_v63 }
  0xfd   : > { %v970_v24 = vsel %vm6104_vm2, %v965_v8, %v969_v9  ;;  %1269 = vst [vmem:[#allocation2 + $0x3c] sm:$0x1] %v1268_v1  ;;  %v1238_v8 = vld [vmem:[#allocation2 + $0x40] sm:$0x1]  ;;  %v1270_v9 = vld [vmem:[#allocation2 + $0x44] sm:$0x1] }
  0xfe   : > { %v1239_v11 = vsel %vm6194_vm7, 0, %v1238_v8  ;;  %v1271_v12 = vsel %vm6203_vm8, 0, %v1270_v9 }
  0xff   : > { %5108 = vmatpush3.bf16.msra.mxu0 %v5537_v16  ;;  %v983_v16 = vrot.slane %v981_v0, 5  ;;  %1240 = vst [vmem:[#allocation2 + $0x40] sm:$0x1] %v1239_v11  ;;  %1272 = vst [vmem:[#allocation2 + $0x44] sm:$0x1] %v1271_v12 }
 0x100   : > { %5109 = vmatprep.subr.bf16.mxu0 %v5538_v23  ;;  %v1394_v12 = vld [vmem:[#allocation2 + $0xc] sm:$0x1] }
 0x101   : > { %v984_v29 = vsel %vm6104_vm2, %v979_v15, %v983_v16 }
 0x102   : > { %5102 = vmatmul.mubr.bf16.gmra.mrb[4].mxu0 %v5543_v26  ;;  %v1020_v26 = vor.u32 %v1019_v14, %v1016_v13  ;;  %v4668_v33 = vcombine.low %v984_v29, %v998_v30  ;;  %v1232_v13 = vld [vmem:[#allocation2 + $0x30] sm:$0x1]  ;;  %v1264_v14 = vld [vmem:[#allocation2 + $0x34] sm:$0x1] }
 0x103   : > { %5110 = vmatpush3.bf16.msra.mxu0 %v5538_v23  ;;  %5121 = vmatprep.mubr.bf16.mxu0 %v4666_v27  ;;  %v1009_v23 = vshll.u32 %v4663_v10, 16  ;;  %v1023_v27 = vshll.u32 %v4665_v19, 16  ;;  %v1233_v15 = vsel %vm6194_vm7, 0, %v1232_v13  ;;  %v1265_v16 = vsel %vm6203_vm8, 0, %v1264_v14  ;;  %v5547_v19 = vld [vmem:[#allocation9 + $0x20] sm:$0xff]  }
 0x104   : > { %5111 = vmatprep.subr.bf16.mxu0 %v5539_v31  ;;  %v1021_v35 = vrot.slane %v1020_v26, 4  ;;  %1234 = vst [vmem:[#allocation2 + $0x30] sm:$0x1] %v1233_v15  ;;  %1266 = vst [vmem:[#allocation2 + $0x34] sm:$0x1] %v1265_v16  ;;  %5129 = vmatprep.subr.bf16.mxu1 %v5547_v19 }
 0x105   : > { %v1011_v32 = vrot.slane %v1009_v23, 5  ;;  %v1025_v36 = vrot.slane %v1023_v27, 5  ;;  %5130 = vmatpush3.bf16.msra.mxu1 %v5547_v19  ;;  %v6254_v23 = vld [vmem:[#allocation9 + $0x18] sm:$0xff]  }
 0x107   : > { %5112 = vmatpush3.bf16.msra.mxu0 %v5539_v31  ;;  %v4667_v31 = vcombine.low %v956_v20, %v970_v24  ;;  %v1012_v37 = vsel %vm6104_vm2, %v1007_v34, %v1011_v32  ;;  %v6251_v20 = vld [vmem:[#allocation9] sm:$0xff]  }
 0x108   : > { %5113 = vmatprep.subr.bf16.mxu0 %v5540_v38  ;;  %5139 = vmatprep.subr.bf16.mxu1 %v6251_v20 }
 0x10b   : > { %5114 = vmatpush3.bf16.msra.mxu0 %v5540_v38  ;;  %v1026_v38 = vsel %vm6104_vm2, %v1021_v35, %v1025_v36 }
 0x10c   : > { %5115 = vmatprep.subr.bf16.mxu0 %v5541_v43  ;;  %v4669_v39 = vcombine.low %v1012_v37, %v1026_v38 }
 0x10f   : > { %5116 = vmatpush3.bf16.msra.mxu0 %v5541_v43  ;;  %v5808_v43 = vmov 0  }
 0x110   : > { %5117 = vmatprep.subr.bf16.mxu0 %v5544_v62  ;;  %1205 = vst.msk [vmem:[#allocation2] sm:$0xf] %vm1204_vm6, %v5808_v43  ;;  %1209 = vst.msk [vmem:[#allocation2 + $0x48] sm:$0xf] %vm1204_vm6, %v5808_v43 }
 0x111   : > { %1207 = vst.msk [vmem:[#allocation2 + $0x4] sm:$0x1] %vm1206_vm3, %v5808_v43  ;;  %1210 = vst.msk [vmem:[#allocation2 + $0x4c] sm:$0x1] %vm1206_vm3, %v5808_v43 }
 0x113   : > { %5118 = vmatpush3.bf16.msra.mxu0 %v5544_v62  ;;  %v1235_v62 = vld [vmem:[#allocation2 + $0x38] sm:$0x1] }
 0x114   : > { %5119 = vmatprep.subr.bf16.mxu0 %v5545_v3  ;;  %v1236_v0 = vsel %vm6194_vm7, 0, %v1235_v62  ;;  %v1406_v62 = vld [vmem:[#allocation2 + $0x1c] sm:$0x1] }
 0x115   : > { %1237 = vst [vmem:[#allocation2 + $0x38] sm:$0x1] %v1236_v0 }
 0x117   : > { %5120 = vmatpush3.bf16.msra.mxu0 %v5545_v3  ;;  %v1214_v21 = vld [vmem:[#allocation2] sm:$0x1]  ;;  %v1241_v22 = vld [vmem:[#allocation2 + $0x48] sm:$0x1]  ;;  %v1261_v3 = vld [vmem:[#allocation2 + $0x2c] sm:$0x1] }
 0x118   : > { %v1273_v51 = vld [vmem:[#allocation2 + $0x4c] sm:$0x1]  ;;  %v1215_v52 = vsel %vm6194_vm7, 0, %v1214_v21  ;;  %v1242_v59 = vsel %vm6194_vm7, 0, %v1241_v22  ;;  %v1262_v7 = vsel %vm6203_vm8, 0, %v1261_v3  ;;  %5249 = vmatprep.subr.bf16.mxu0 %v5546_v18 }
 0x119   : > { %v1274_v60 = vsel %vm6203_vm8, 0, %v1273_v51  ;;  %1216 = vst [vmem:[#allocation2] sm:$0x1] %v1215_v52  ;;  %1243 = vst [vmem:[#allocation2 + $0x48] sm:$0x1] %v1242_v59 }
 0x11a   : > { %5122 = vmatmul.mubr.bf16.vlgmr.msra.gmra.mrb[0].mxu0 %v4667_v31  ;;  %1275 = vst [vmem:[#allocation2 + $0x4c] sm:$0x1] %v1274_v60  ;;  %1263 = vst [vmem:[#allocation2 + $0x2c] sm:$0x1] %v1262_v7  ;;  %v1246_v10 = vld [vmem:[#allocation2 + $0x4] sm:$0x1] }
 0x11b   : > { %5125 = vmatprep.mubr.bf16.mxu0 %v4668_v33  ;;  %v1247_v17 = vsel %vm6203_vm8, 0, %v1246_v10  ;;  %5250 = vmatpush3.bf16.msra.mxu0 %v5546_v18  ;;  %v6261_v31 = vld [vmem:[#allocation8] ss:$0 sm:$0xff]  ;;  %v1403_v60 = vld [vmem:[#allocation2 + $0x18] sm:$0xf] }
 0x11c   : > { %1248 = vst [vmem:[#allocation2 + $0x4] sm:$0x1] %v1247_v17  ;;  %5259 = vmatprep.subr.bf16.mxu0 %v6254_v23 }
 0x120   : > { %v6257_v24 = vld [vmem:[#allocation2] sm:$0xf]  ;;  %v4061_v25 = vld [vmem:[#allocation2 + $0x48] sm:$0xf] }
 0x121   : > { %v1458_v26 = vshrl.u32 %v6257_v24, 16  ;;  %v1461_v27 = vshll.u32 %v6257_v24, 16  ;;  %v4162_v29 = vshrl.u32 %v4061_v25, 16  ;;  %v4165_v30 = vshll.u32 %v4061_v25, 16  ;;  %v6265_v45 = vld [vmem:[#allocation2 + $0x4c] sm:$0x1] }
 0x122   : > { %5126 = vmatmul.mubr.bf16.gmra.mrb[4].mxu0 %v4669_v39  ;;  %v4171_v50 = vshll.u32 %v6265_v45, 16  ;;  %v1409_v25 = vld [vmem:[#allocation2 + $0x20] sm:$0xf] }
 0x123   : > { %v1460_v32 = vrot.slane %v1458_v26, 4  ;;  %v1463_v33 = vrot.slane %v1461_v27, 5  ;;  %v1449_v34 = vld [vmem:[#allocation2 + $0x4] sm:$0x1]  ;;  %v4164_v35 = vrot.slane %v4162_v29, 4  ;;  %v4167_v36 = vrot.slane %v4165_v30, 5 }
 0x124   : > { %v1467_v44 = vshll.u32 %v1449_v34, 16  ;;  %v6276_v52 = vrot.slane %v4171_v50, 5 }
 0x125   : > { %v1464_v43 = vor.u32 %v1463_v33, %v1460_v32  ;;  %v4168_v49 = vor.u32 %v4167_v36, %v4164_v35  ;;  %v1412_v32 = vld [vmem:[#allocation2 + $0x24] sm:$0x1] }
 0x126   : > { %v6272_v58 = vrot.slane %v1467_v44, 5 }
 0x127   : > { %v6270_v57 = vrot.slane %v1464_v43, 4  ;;  %v6274_v51 = vrot.slane %v4168_v49, 4 }
 0x1ed   : > { %v5123_v37 = vpop.f32.mrb[0].mxu0 }
 0x1ee   : > { %v1190_v38 = vadd.f32 %v5123_v37, %v6261_v31  ;;  %v1142_v39 = vpop.f32.mrb[1].mxu0 }
 0x1ef   : > { %v1188_v41 = vadd.f32 %v6261_v31, %v1142_v39  ;;  %v5124_v42 = vpop.f32.mrb[2].mxu0  ;;  %v1397_v39 = vld [vmem:[#allocation2 + $0x10] sm:$0xf] }
 0x1f0   : > { %v1198_v46 = vmax.f32 %v1190_v38, 0.0  ;;  %v1191_v47 = vadd.f32 %v5124_v42, %v6261_v31  ;;  %v1145_v48 = vpop.f32.mrb[3].mxu0 }
 0x1f1   : > { %v1196_v4 = vmax.f32 %v1188_v41, 0.0  ;;  %v1189_v5 = vadd.f32 %v6261_v31, %v1145_v48  ;;  %v1400_v41 = vld [vmem:[#allocation2 + $0x14] sm:$0x1]  ;;  %v6290_v48 = vld [vmem:[#allocation2] sm:$0xe] }
 0x1f2   : > { %v4898_v53 = vpack.c.bf16 %v1198_v46, %v1198_v46  ;;  %v1199_v54 = vmax.f32 %v1191_v47, 0.0  ;;  %v6288_v47 = vld [vmem:[#allocation2 + $0x4] sm:$0x1] }
 0x1f3   : > { %v4896_v55 = vpack.c.bf16 %v1196_v4, %v1196_v4  ;;  %v1197_v56 = vmax.f32 %v1189_v5, 0.0 }
 0x1f4   : > { %v1325_v21 = vshrl.u32 %v4898_v53, 16  ;;  %v4899_v22 = vpack.c.bf16 %v1199_v54, %v1199_v54  ;;  %v1328_v59 = vshll.u32 %v4898_v53, 16  ;;  %v6296_v53 = vld [vmem:[#allocation2 + $0x48] sm:$0xe] }
 0x1f5   : > { %v1309_v63 = vshrl.u32 %v4896_v55, 16  ;;  %v1312_v0 = vshll.u32 %v4896_v55, 16  ;;  %v4897_v1 = vpack.c.bf16 %v1197_v56, %v1197_v56  ;;  %v5127_v2 = vpop.f32.mrb[4].mxu0 }
 0x1f6   : > { %v1327_v3 = vrot.slane %v1325_v21, 7  ;;  %v1333_v7 = vshrl.u32 %v4899_v22, 16  ;;  %v1336_v8 = vshll.u32 %v4899_v22, 16  ;;  %v1194_v9 = vadd.f32 %v5127_v2, %v6261_v31  ;;  %v1158_v10 = vpop.f32.mrb[5].mxu0 }
 0x1f7   : > { %v1311_v11 = vrot.slane %v1309_v63, 7  ;;  %v1317_v13 = vshrl.u32 %v4897_v1, 16  ;;  %v1320_v14 = vshll.u32 %v4897_v1, 16  ;;  %v1192_v15 = vadd.f32 %v6261_v31, %v1158_v10  ;;  %v5128_v16 = vpop.f32.mrb[6].mxu0  ;;  %v6306_v63 = vld [vmem:[#allocation2] sm:$0xf] }
 0x1f8   : > { %v1330_v17 = vor.u32 %v1328_v59, %v1327_v3  ;;  %v1331_v18 = vrot.slane %v1327_v3, 4  ;;  %v1335_v19 = vrot.slane %v1333_v7, 7  ;;  %v1202_v26 = vmax.f32 %v1194_v9, 0.0  ;;  %v1161_v27 = vpop.f32.mrb[7].mxu0 }
 0x1f9   : > { %v1314_v29 = vor.u32 %v1312_v0, %v1311_v11  ;;  %v1315_v30 = vrot.slane %v1311_v11, 4  ;;  %v1319_v33 = vrot.slane %v1317_v13, 7  ;;  %v1200_v34 = vmax.f32 %v1192_v15, 0.0  ;;  %v1427_v0 = vld [vmem:[#allocation2 + $0x38] sm:$0xf] }
 0x1fa   : > { %v1404_v35 = vsel %vm6229_vm9, %v1330_v17, %v1403_v60  ;;  %v1407_v36 = vsel %vm6194_vm7, %v1331_v18, %v1406_v62  ;;  %v1338_v37 = vor.u32 %v1336_v8, %v1335_v19  ;;  %v1339_v38 = vrot.slane %v1335_v19, 4  ;;  %v1415_v11 = vld [vmem:[#allocation2 + $0x28] sm:$0xf] }
 0x1fb   : > { %1405 = vst [vmem:[#allocation2 + $0x18] sm:$0xf] %v1404_v35  ;;  %1408 = vst [vmem:[#allocation2 + $0x1c] sm:$0x1] %v1407_v36  ;;  %v1392_v42 = vsel %vm6229_vm9, %v1314_v29, %v1391_v6  ;;  %v1395_v43 = vsel %vm6194_vm7, %v1315_v30, %v1394_v12  ;;  %v1322_v44 = vor.u32 %v1320_v14, %v1319_v33  ;;  %v1323_v46 = vrot.slane %v1319_v33, 4 }
 0x1fc   : > { %1393 = vst [vmem:[#allocation2 + $0x8] sm:$0xf] %v1392_v42  ;;  %1396 = vst [vmem:[#allocation2 + $0xc] sm:$0x1] %v1395_v43  ;;  %v1410_v49 = vsel %vm6229_vm9, %v1338_v37, %v1409_v25  ;;  %v1413_v50 = vsel %vm6194_vm7, %v1339_v38, %v1412_v32  ;;  %v4902_v4 = vpack.c.bf16 %v1202_v26, %v1202_v26  ;;  %v4724_v60 = vrot.slane %v6290_v48, 9 }
 0x1fd   : > { %v4900_v5 = vpack.c.bf16 %v1200_v34, %v1200_v34  ;;  %1411 = vst [vmem:[#allocation2 + $0x20] sm:$0xf] %v1410_v49  ;;  %1414 = vst [vmem:[#allocation2 + $0x24] sm:$0x1] %v1413_v50  ;;  %v1398_v54 = vsel %vm6229_vm9, %v1322_v44, %v1397_v39  ;;  %v1401_v55 = vsel %vm6194_vm7, %v1323_v46, %v1400_v41  ;;  %v2311_v62 = vrot.slane %v6288_v47, 5 }
 0x1fe   : > { %v1195_v56 = vadd.f32 %v5128_v16, %v6261_v31  ;;  %v1193_v21 = vadd.f32 %v6261_v31, %v1161_v27  ;;  %1399 = vst [vmem:[#allocation2 + $0x10] sm:$0xf] %v1398_v54  ;;  %1402 = vst [vmem:[#allocation2 + $0x14] sm:$0x1] %v1401_v55  ;;  %v1357_v22 = vshrl.u32 %v4902_v4, 16  ;;  %v4872_v3 = vrot.slane %v6296_v53, 9 }
 0x1ff   : > { %v1341_v59 = vshrl.u32 %v4900_v5, 16  ;;  %v4335_v6 = vrot.slane %v6265_v45, 5  ;;  %v1360_v8 = vshll.u32 %v4902_v4, 16  ;;  %v1430_v31 = vld [vmem:[#allocation2 + $0x3c] sm:$0x1]  ;;  %v1344_v10 = vshll.u32 %v4900_v5, 16 }
 0x200   : > { %v1203_v1 = vmax.f32 %v1195_v56, 0.0  ;;  %v1201_v2 = vmax.f32 %v1193_v21, 0.0  ;;  %v1359_v7 = vrot.slane %v1357_v22, 7  ;;  %v1418_v12 = vld [vmem:[#allocation2 + $0x2c] sm:$0x1]  ;;  %v2168_v15 = vshrl.u32 %v6306_v63, 16 }
 0x201   : > { %v1343_v9 = vrot.slane %v1341_v59, 7  ;;  %v2171_v16 = vshll.u32 %v6306_v63, 16  ;;  %v1433_v37 = vld [vmem:[#allocation2 + $0x40] sm:$0xf]  ;;  %v1436_v38 = vld [vmem:[#allocation2 + $0x44] sm:$0x1]  ;;  %v1470_v54 = vsel %vm6104_vm2, %v6270_v57, %v6272_v58 }
 0x202   : > { %v4903_v13 = vpack.c.bf16 %v1203_v1, %v1203_v1  ;;  %v4901_v14 = vpack.c.bf16 %v1201_v2, %v1201_v2  ;;  %v1362_v17 = vor.u32 %v1360_v8, %v1359_v7  ;;  %v1363_v18 = vrot.slane %v1359_v7, 4  ;;  %v1421_v39 = vld [vmem:[#allocation2 + $0x30] sm:$0xf]  ;;  %v1424_v41 = vld [vmem:[#allocation2 + $0x34] sm:$0x1] }
 0x203   : > { %v1346_v19 = vor.u32 %v1344_v10, %v1343_v9  ;;  %v1347_v25 = vrot.slane %v1343_v9, 4  ;;  %v6312_v32 = vld [vmem:[#allocation2 + $0xc] sm:$0x1]  ;;  %v3798_v42 = vld [vmem:[#allocation2 + $0x8] sm:$0xe] }
 0x204   : > { %v1365_v26 = vshrl.u32 %v4903_v13, 16  ;;  %v1368_v27 = vshll.u32 %v4903_v13, 16  ;;  %v1349_v29 = vshrl.u32 %v4901_v14, 16  ;;  %v1352_v30 = vshll.u32 %v4901_v14, 16  ;;  %v6322_v43 = vld [vmem:[#allocation2 + $0x1c] sm:$0x1] }
 0x205   : > { %v1428_v33 = vsel %vm6229_vm9, %v1362_v17, %v1427_v0  ;;  %v1431_v34 = vsel %vm6194_vm7, %v1363_v18, %v1430_v31  ;;  %v1416_v35 = vsel %vm6229_vm9, %v1346_v19, %v1415_v11  ;;  %v1419_v36 = vsel %vm6194_vm7, %v1347_v25, %v1418_v12  ;;  %v3800_v44 = vld [vmem:[#allocation2 + $0x18] sm:$0xe]  ;;  %v6330_v4 = vld [vmem:[#allocation2 + $0x14] sm:$0x1]  ;;  %v3799_v5 = vld [vmem:[#allocation2 + $0x10] sm:$0xe] }
 0x206   : > { %1429 = vst [vmem:[#allocation2 + $0x38] sm:$0xf] %v1428_v33  ;;  %1432 = vst [vmem:[#allocation2 + $0x3c] sm:$0x1] %v1431_v34  ;;  %v1367_v46 = vrot.slane %v1365_v26, 7  ;;  %v1351_v49 = vrot.slane %v1349_v29, 7 }
 0x207   : > { %1417 = vst [vmem:[#allocation2 + $0x28] sm:$0xf] %v1416_v35  ;;  %1420 = vst [vmem:[#allocation2 + $0x2c] sm:$0x1] %v1419_v36  ;;  %v4830_v55 = vrot.slane %v3798_v42, 9  ;;  %v3824_v56 = vrot.slane %v6312_v32, 5 }
 0x208   : > { %v4831_v21 = vrot.slane %v3799_v5, 9  ;;  %v3828_v22 = vrot.slane %v6330_v4, 5  ;;  %v6338_v59 = vld [vmem:[#allocation2 + $0x24] sm:$0x1]  ;;  %v1370_v0 = vor.u32 %v1368_v27, %v1367_v46  ;;  %v1371_v1 = vrot.slane %v1367_v46, 4 }
 0x209   : > { %v1354_v2 = vor.u32 %v1352_v30, %v1351_v49  ;;  %v1355_v7 = vrot.slane %v1351_v49, 4  ;;  %v3801_v8 = vld [vmem:[#allocation2 + $0x20] sm:$0xe]  ;;  %v6340_v31 = vld [vmem:[#allocation2 + $0x8] sm:$0xf]  ;;  %v3825_v9 = vsel %vm6326_vm13, %v4830_v55, %v3824_v56  ;;  %v4832_v11 = vrot.slane %v3800_v44, 9 }
 0x20a   : > { %v3829_v10 = vsel %vm6326_vm13, %v4831_v21, %v3828_v22  ;;  %v3832_v12 = vrot.slane %v6322_v43, 5  ;;  %v1450_v13 = vld [vmem:[#allocation2 + $0xc] sm:$0x1]  ;;  %v6347_v14 = vld [vmem:[#allocation2 + $0x10] sm:$0xf]  ;;  %v1434_v17 = vsel %vm6229_vm9, %v1370_v0, %v1433_v37  ;;  %v1437_v18 = vsel %vm6194_vm7, %v1371_v1, %v1436_v38  ;;  %v6372_v56 = vld [vmem:[#allocation9 + $0x58] sm:$0xff]  }
 0x20b   : > { %v1422_v19 = vsel %vm6229_vm9, %v1354_v2, %v1421_v39  ;;  %v1425_v25 = vsel %vm6194_vm7, %v1355_v7, %v1424_v41  ;;  %v6357_v26 = vld [vmem:[#allocation2 + $0x18] sm:$0xf]  ;;  %1435 = vst [vmem:[#allocation2 + $0x40] sm:$0xf] %v1434_v17  ;;  %1438 = vst [vmem:[#allocation2 + $0x44] sm:$0x1] %v1437_v18  ;;  %v4838_v27 = vcombine.low %v3825_v9, %v3829_v10 }
 0x20c   : > { %1423 = vst [vmem:[#allocation2 + $0x30] sm:$0xf] %v1422_v19  ;;  %1426 = vst [vmem:[#allocation2 + $0x34] sm:$0x1] %v1425_v25  ;;  %v4833_v29 = vrot.slane %v3801_v8, 9  ;;  %v3836_v30 = vrot.slane %v6338_v59, 5  ;;  %v3833_v37 = vsel %vm6326_vm13, %v4832_v11, %v3832_v12  ;;  %v4697_v45 = vcombine.low %v6347_v14, %v6357_v26 }
 0x20d   : > { %v1451_v33 = vld [vmem:[#allocation2 + $0x14] sm:$0x1]  ;;  %v6360_v34 = vrot.slane %v2168_v15, 4  ;;  %v1472_v35 = vshrl.u32 %v6340_v31, 16  ;;  %v1475_v61 = vshll.u32 %v6340_v31, 16  ;;  %v1481_v36 = vshll.u32 %v1450_v13, 16  ;;  %5251 = vmatprep.mubr.msk.bf16.mxu0 %vm1590_vm12, %v4838_v27 }
 0x20e   : > { %v1486_v40 = vshrl.u32 %v6347_v14, 16  ;;  %v3837_v38 = vsel %vm6326_vm13, %v4833_v29, %v3836_v30  ;;  %v1452_v39 = vld [vmem:[#allocation2 + $0x1c] sm:$0x1]  ;;  %v1489_v41 = vshll.u32 %v6347_v14, 16  ;;  %v1500_v15 = vshrl.u32 %v6357_v26, 16 }
 0x20f   : > { %v3667_v42 = vld [vmem:[#allocation2 + $0x8] sm:$0xf]  ;;  %v4839_v44 = vcombine.low %v3833_v37, %v3837_v38  ;;  %v1474_v46 = vrot.slane %v1472_v35, 4  ;;  %v1477_v49 = vrot.slane %v1475_v61, 5  ;;  %v1495_v5 = vshll.u32 %v1451_v33, 16 }
 0x210   : > { %v3669_v55 = vld [vmem:[#allocation2 + $0x10] sm:$0xf]  ;;  %v1483_v21 = vrot.slane %v1481_v36, 5  ;;  %v1488_v22 = vrot.slane %v1486_v40, 4  ;;  %v1491_v0 = vrot.slane %v1489_v41, 5  ;;  %v1502_v1 = vrot.slane %v1500_v15, 4 }
 0x211   : > { %5252 = vmatmul.mubr.msk.bf16.vlgmr.msra.gmra.mrb[8].mxu0 %vm1590_vm12, %v4839_v44  ;;  %v1478_v2 = vor.u32 %v1477_v49, %v1474_v46  ;;  %v1503_v7 = vshll.u32 %v6357_v26, 16  ;;  %v1509_v8 = vshll.u32 %v1452_v39, 16  ;;  %v3684_v9 = vshrl.u32 %v3667_v42, 16  ;;  %v6378_v27 = vld [vmem:[#allocation2 + $0x20] sm:$0xf] }
 0x212   : > { %v1492_v10 = vor.u32 %v1491_v0, %v1488_v22  ;;  %v3687_v11 = vshll.u32 %v3667_v42, 16  ;;  %v3693_v12 = vshll.u32 %v6312_v32, 16  ;;  %v3698_v13 = vshrl.u32 %v3669_v55, 16  ;;  %5260 = vmatpush3.bf16.msra.mxu0 %v6254_v23  ;;  %v6383_v37 = vld [vmem:[#allocation2 + $0x28] sm:$0xf] }
 0x213   : > { %v1479_v17 = vrot.slane %v1478_v2, 4  ;;  %v1497_v18 = vrot.slane %v1495_v5, 5  ;;  %v1505_v19 = vrot.slane %v1503_v7, 5  ;;  %v3686_v25 = vrot.slane %v3684_v9, 4  ;;  %5269 = vmatprep.subr.bf16.mxu0 %v6372_v56  ;;  %v1453_v23 = vld [vmem:[#allocation2 + $0x24] sm:$0x1] }
 0x214   : > { %v1493_v29 = vrot.slane %v1492_v10, 4  ;;  %v1511_v30 = vrot.slane %v1509_v8, 5  ;;  %v3689_v33 = vrot.slane %v3687_v11, 5  ;;  %v3695_v35 = vrot.slane %v3693_v12, 5  ;;  %v3673_v2 = vld [vmem:[#allocation2 + $0x20] sm:$0xf] }
 0x215   : > { %v1484_v61 = vsel %vm6104_vm2, %v1479_v17, %v1483_v21  ;;  %v1506_v36 = vor.u32 %v1505_v19, %v1502_v1  ;;  %v3700_v32 = vrot.slane %v3698_v13, 4  ;;  %v3701_v40 = vshll.u32 %v3669_v55, 16  ;;  %v1454_v55 = vld [vmem:[#allocation2 + $0x2c] sm:$0x1]  ;;  %v3671_v1 = vld [vmem:[#allocation2 + $0x18] sm:$0xf] }
 0x216   : > { %v4687_v38 = vcombine.low %v1470_v54, %v1484_v61  ;;  %v3690_v39 = vor.u32 %v3689_v33, %v3686_v25  ;;  %v3707_v41 = vshll.u32 %v6330_v4, 16  ;;  %v1514_v15 = vshrl.u32 %v6378_v27, 16  ;;  %v6402_v11 = vld [vmem:[#allocation9 + $0x40] sm:$0xff]  }
 0x217   : > { %v1498_v42 = vsel %vm6104_vm2, %v1493_v29, %v1497_v18  ;;  %v1507_v44 = vrot.slane %v1506_v36, 4  ;;  %v3703_v46 = vrot.slane %v3701_v40, 5  ;;  %v1517_v49 = vshll.u32 %v6378_v27, 16  ;;  %v6411_v40 = vld [vmem:[#allocation2 + $0x38] sm:$0xf] }
 0x218   : > { %5131 = vmatprep.mubr.msk.bf16.mxu1 %vm1590_vm12, %v4687_v38  ;;  %v3691_v5 = vrot.slane %v3690_v39, 4  ;;  %v1516_v21 = vrot.slane %v1514_v15, 4  ;;  %v1523_v22 = vshll.u32 %v1453_v23, 16  ;;  %v1528_v57 = vshrl.u32 %v6383_v37, 16  ;;  %v1455_v15 = vld [vmem:[#allocation2 + $0x34] sm:$0x1] }
 0x219   : > { %v1512_v58 = vsel %vm6104_vm2, %v1507_v44, %v1511_v30  ;;  %v3704_v4 = vor.u32 %v3703_v46, %v3700_v32  ;;  %v1519_v54 = vrot.slane %v1517_v49, 5  ;;  %v1531_v0 = vshll.u32 %v6383_v37, 16  ;;  %v6409_v32 = vld [vmem:[#allocation2 + $0x30] sm:$0xf]  ;;  %v4053_v14 = vld [vmem:[#allocation2 + $0x28] sm:$0xf] }
 0x21a   : > { %v4688_v7 = vcombine.low %v1498_v42, %v1512_v58  ;;  %v3696_v8 = vsel %vm6104_vm2, %v3691_v5, %v3695_v35  ;;  %v3709_v9 = vrot.slane %v3707_v41, 5  ;;  %v1530_v10 = vrot.slane %v1528_v57, 4 }
 0x21b   : > { %v3705_v12 = vrot.slane %v3704_v4, 4  ;;  %v1520_v13 = vor.u32 %v1519_v54, %v1516_v21  ;;  %v1533_v17 = vrot.slane %v1531_v0, 5  ;;  %v1537_v18 = vshll.u32 %v1454_v55, 16  ;;  %v3675_v4 = vld [vmem:[#allocation2 + $0x28] sm:$0xf] }
 0x21c   : > { %5132 = vmatmul.mubr.msk.bf16.vlgmr.msra.gmra.mrb[0].mxu1 %vm1590_vm12, %v4688_v7  ;;  %v1525_v19 = vrot.slane %v1523_v22, 5  ;;  %v3712_v25 = vshrl.u32 %v3671_v1, 16  ;;  %v3715_v29 = vshll.u32 %v3671_v1, 16  ;;  %v3726_v30 = vshrl.u32 %v3673_v2, 16  ;;  %v1456_v1 = vld [vmem:[#allocation2 + $0x3c] sm:$0x1] }
 0x21d   : > { %5140 = vmatpush3.bf16.msra.mxu1 %v6251_v20  ;;  %v3710_v33 = vsel %vm6104_vm2, %v3705_v12, %v3709_v9  ;;  %v1521_v35 = vrot.slane %v1520_v13, 4  ;;  %v1534_v61 = vor.u32 %v1533_v17, %v1530_v10  ;;  %v3721_v36 = vshll.u32 %v6322_v43, 16  ;;  %v3676_v7 = vld [vmem:[#allocation2 + $0x2c] sm:$0x1]  ;;  %v3677_v13 = vld [vmem:[#allocation2 + $0x30] sm:$0xf] }
 0x21e   : > { %v4847_v23 = vcombine.low %v3696_v8, %v3710_v33  ;;  %v1539_v38 = vrot.slane %v1537_v18, 5  ;;  %v3714_v39 = vrot.slane %v3712_v25, 4  ;;  %v3717_v41 = vrot.slane %v3715_v29, 5  ;;  %5149 = vmatprep.subr.bf16.mxu1 %v6402_v11  ;;  %v3678_v25 = vld [vmem:[#allocation2 + $0x34] sm:$0x1] }
 0x21f   : > { %v1526_v20 = vsel %vm6104_vm2, %v1521_v35, %v1525_v19  ;;  %v1535_v42 = vrot.slane %v1534_v61, 4  ;;  %v3728_v44 = vrot.slane %v3726_v30, 4  ;;  %v3729_v46 = vshll.u32 %v3673_v2, 16 }
 0x220   : > { %5261 = vmatprep.mubr.msk.bf16.mxu0 %vm1590_vm12, %v4847_v23  ;;  %v3718_v43 = vor.u32 %v3717_v41, %v3714_v39  ;;  %v3735_v49 = vshll.u32 %v6338_v59, 16  ;;  %v1542_v5 = vshrl.u32 %v6409_v32, 16  ;;  %v1545_v55 = vshll.u32 %v6409_v32, 16  ;;  %v3679_v41 = vld [vmem:[#allocation2 + $0x38] sm:$0xf] }
 0x221   : > { %v1540_v21 = vsel %vm6104_vm2, %v1535_v42, %v1539_v38  ;;  %v3731_v22 = vrot.slane %v3729_v46, 5  ;;  %v1551_v57 = vshll.u32 %v1455_v15, 16  ;;  %v1556_v58 = vshrl.u32 %v6411_v40, 16  ;;  %v3680_v46 = vld [vmem:[#allocation2 + $0x3c] sm:$0x1] }
 0x222   : > { %v4689_v54 = vcombine.low %v1526_v20, %v1540_v21  ;;  %v3719_v0 = vrot.slane %v3718_v43, 4  ;;  %v1544_v2 = vrot.slane %v1542_v5, 4  ;;  %v4174_v59 = vsel %vm6104_vm2, %v6274_v51, %v6276_v52  ;;  %v6433_v43 = vld [vmem:[#allocation9 + $0x78] sm:$0xff]  }
 0x223   : > { %v3723_v8 = vrot.slane %v3721_v36, 5  ;;  %v3732_v9 = vor.u32 %v3731_v22, %v3728_v44  ;;  %v3737_v10 = vrot.slane %v3735_v49, 5  ;;  %v1547_v12 = vrot.slane %v1545_v55, 5  ;;  %v3681_v22 = vld [vmem:[#allocation2 + $0x40] sm:$0xf] }
 0x224   : > { %5135 = vmatprep.mubr.msk.bf16.mxu1 %vm1590_vm12, %v4689_v54  ;;  %v1553_v17 = vrot.slane %v1551_v57, 5  ;;  %v1558_v18 = vrot.slane %v1556_v58, 4  ;;  %v1559_v19 = vshll.u32 %v6411_v40, 16  ;;  %v3740_v29 = vshrl.u32 %v3675_v4, 16 }
 0x225   : > { %v3733_v30 = vrot.slane %v3732_v9, 4  ;;  %v1548_v33 = vor.u32 %v1547_v12, %v1544_v2  ;;  %v1565_v35 = vshll.u32 %v1456_v1, 16  ;;  %v3743_v61 = vshll.u32 %v3675_v4, 16  ;;  %v3682_v2 = vld [vmem:[#allocation2 + $0x44] sm:$0x1] }
 0x226   : > { %v3724_v23 = vsel %vm6104_vm2, %v3719_v0, %v3723_v8  ;;  %v1561_v36 = vrot.slane %v1559_v19, 5  ;;  %v3742_v38 = vrot.slane %v3740_v29, 4  ;;  %v3754_v39 = vshrl.u32 %v3677_v13, 16  ;;  %v4047_v19 = vld [vmem:[#allocation2 + $0x10] sm:$0xf] }
 0x227   : > { %v3738_v15 = vsel %vm6104_vm2, %v3733_v30, %v3737_v10  ;;  %v1549_v20 = vrot.slane %v1548_v33, 4  ;;  %v3745_v42 = vrot.slane %v3743_v61, 5  ;;  %v3749_v44 = vshll.u32 %v3676_v7, 16 }
 0x228   : > { %v4848_v49 = vcombine.low %v3724_v23, %v3738_v15  ;;  %v1562_v5 = vor.u32 %v1561_v36, %v1558_v18  ;;  %v3756_v55 = vrot.slane %v3754_v39, 4  ;;  %v3757_v21 = vshll.u32 %v3677_v13, 16 }
 0x229   : > { %v1554_v57 = vsel %vm6104_vm2, %v1549_v20, %v1553_v17  ;;  %v1567_v58 = vrot.slane %v1565_v35, 5  ;;  %v3746_v4 = vor.u32 %v3745_v42, %v3742_v38  ;;  %v3763_v54 = vshll.u32 %v3678_v25, 16  ;;  %v6449_v20 = vld [vmem:[#allocation2 + $0x1c] sm:$0x1] }
 0x22a   : > { %5262 = vmatmul.mubr.msk.bf16.vlgmr.msra.gmra.mrb[8].mxu0 %vm1590_vm12, %v4848_v49  ;;  %v1563_v0 = vrot.slane %v1562_v5, 4  ;;  %v3759_v1 = vrot.slane %v3757_v21, 5  ;;  %v3768_v7 = vshrl.u32 %v3679_v41, 16  ;;  %v3771_v8 = vshll.u32 %v3679_v41, 16  ;;  %v6444_v41 = vld [vmem:[#allocation2 + $0x14] sm:$0x1] }
 0x22b   : > { %v3747_v9 = vrot.slane %v3746_v4, 4  ;;  %v3751_v10 = vrot.slane %v3749_v44, 5  ;;  %v3777_v12 = vshll.u32 %v3680_v46, 16  ;;  %v3782_v18 = vshrl.u32 %v3681_v22, 16  ;;  %5270 = vmatpush3.bf16.msra.mxu0 %v6372_v56  ;;  %v4049_v56 = vld [vmem:[#allocation2 + $0x18] sm:$0xf] }
 0x22c   : > { %v1568_v13 = vsel %vm6104_vm2, %v1563_v0, %v1567_v58  ;;  %v3760_v17 = vor.u32 %v3759_v1, %v3756_v55  ;;  %v3770_v29 = vrot.slane %v3768_v7, 4  ;;  %v3773_v25 = vrot.slane %v3771_v8, 5  ;;  %5279 = vmatprep.subr.bf16.mxu0 %v6433_v43 }
 0x22d   : > { %v4690_v30 = vcombine.low %v1554_v57, %v1568_v13  ;;  %v3765_v33 = vrot.slane %v3763_v54, 5  ;;  %v4696_v35 = vcombine.low %v6257_v24, %v6340_v31  ;;  %v3784_v61 = vrot.slane %v3782_v18, 4  ;;  %v6468_v57 = vld [vmem:[#allocation2 + $0x24] sm:$0x1] }
 0x22e   : > { %v3761_v23 = vrot.slane %v3760_v17, 4  ;;  %v3774_v36 = vor.u32 %v3773_v25, %v3770_v29  ;;  %v3785_v38 = vshll.u32 %v3681_v22, 16  ;;  %v3791_v39 = vshll.u32 %v3682_v2, 16  ;;  %v6478_v18 = vld [vmem:[#allocation9 + $0x60] sm:$0xff]   ;;  %v6482_v17 = vld [vmem:[#allocation2 + $0x2c] sm:$0x1] }
 0x22f   : > { %5136 = vmatmul.mubr.msk.bf16.gmra.mrb[4].mxu1 %vm1590_vm12, %v4690_v30  ;;  %v3752_v15 = vsel %vm6104_vm2, %v3747_v9, %v3751_v10  ;;  %v4064_v42 = vshrl.u32 %v4047_v19, 16  ;;  %v6457_v24 = vsel %vm6326_vm13, %v4872_v3, %v4335_v6  ;;  %v6461_v31 = vrot.slane %v2171_v16, 5  ;;  %v4051_v3 = vld [vmem:[#allocation2 + $0x20] sm:$0xf]  ;;  %v4055_v30 = vld [vmem:[#allocation2 + $0x30] sm:$0xf] }
 0x230   : > { %v3766_v44 = vsel %vm6104_vm2, %v3761_v23, %v3765_v33  ;;  %5141 = vmatprep.mubr.msk.bf16.mxu1 %vm1590_vm12, %v4696_v35  ;;  %v3775_v46 = vrot.slane %v3774_v36, 4  ;;  %v3779_v49 = vrot.slane %v3777_v12, 5  ;;  %v3787_v5 = vrot.slane %v3785_v38, 5 }
 0x231   : > { %v4849_v55 = vcombine.low %v3752_v15, %v3766_v44  ;;  %v4066_v53 = vrot.slane %v4064_v42, 4  ;;  %v4067_v21 = vshll.u32 %v4047_v19, 16  ;;  %v3793_v22 = vrot.slane %v3791_v39, 5  ;;  %v6487_v39 = vld [vmem:[#allocation2 + $0x34] sm:$0x1] }
 0x232   : > { %v3788_v6 = vor.u32 %v3787_v5, %v3784_v61  ;;  %v4078_v63 = vshrl.u32 %v4049_v56, 16  ;;  %v4081_v16 = vshll.u32 %v4049_v56, 16  ;;  %v3780_v58 = vsel %vm6104_vm2, %v3775_v46, %v3779_v49  ;;  %v4057_v44 = vld [vmem:[#allocation2 + $0x38] sm:$0xf]  ;;  %v6493_v46 = vld [vmem:[#allocation2 + $0x3c] sm:$0x1] }
 0x233   : > { %5265 = vmatprep.mubr.msk.bf16.mxu0 %vm1590_vm12, %v4849_v55  ;;  %v4069_v4 = vrot.slane %v4067_v21, 5  ;;  %v4073_v54 = vshll.u32 %v6444_v41, 16  ;;  %v4087_v0 = vshll.u32 %v6449_v20, 16  ;;  %v4092_v7 = vshrl.u32 %v4051_v3, 16 }
 0x234   : > { %v3789_v26 = vrot.slane %v3788_v6, 4  ;;  %v4080_v1 = vrot.slane %v4078_v63, 4  ;;  %v4083_v2 = vrot.slane %v4081_v16, 5  ;;  %v4698_v9 = vcombine.low %v6378_v27, %v6383_v37 }
 0x235   : > { %v4070_v8 = vor.u32 %v4069_v4, %v4066_v53  ;;  %v4095_v10 = vshll.u32 %v4051_v3, 16  ;;  %v4101_v12 = vshll.u32 %v6468_v57, 16  ;;  %v4094_v29 = vrot.slane %v4092_v7, 4  ;;  %v4059_v53 = vld [vmem:[#allocation2 + $0x40] sm:$0xf] }
 0x236   : > { %v3794_v19 = vsel %vm6104_vm2, %v3789_v26, %v3793_v22  ;;  %v4084_v13 = vor.u32 %v4083_v2, %v4080_v1  ;;  %v4106_v25 = vshrl.u32 %v4053_v14, 16  ;;  %v4075_v61 = vrot.slane %v4073_v54, 5  ;;  %v5556_v26 = vld [vmem:[#allocation2 + $0x8] ss:$8 sps:$4 sm:$0xff]  }
 0x237   : > { %v4850_v33 = vcombine.low %v3780_v58, %v3794_v19  ;;  %5142 = vmatmul.mubr.msk.bf16.vlgmr.msra.gmra.mrb[0].mxu1 %vm1590_vm12, %v4697_v45  ;;  %v4071_v35 = vrot.slane %v4070_v8, 4  ;;  %v4097_v27 = vrot.slane %v4095_v10, 5  ;;  %v4089_v23 = vrot.slane %v4087_v0, 5  ;;  %v6503_v10 = vld [vmem:[#allocation2 + $0x44] sm:$0x1] }
 0x238   : > { %5150 = vmatpush3.bf16.msra.mxu1 %v6402_v11  ;;  %v4085_v37 = vrot.slane %v4084_v13, 4  ;;  %5145 = vmatprep.mubr.msk.bf16.mxu1 %vm1590_vm12, %v4698_v9  ;;  %v4108_v36 = vrot.slane %v4106_v25, 4  ;;  %v4109_v38 = vshll.u32 %v4053_v14, 16  ;;  %v4115_v42 = vshll.u32 %v6482_v17, 16 }
 0x239   : > { %5266 = vmatmul.mubr.msk.bf16.gmra.mrb[12].mxu0 %vm1590_vm12, %v4850_v33  ;;  %v4076_v56 = vsel %vm6104_vm2, %v4071_v35, %v4075_v61  ;;  %v4098_v15 = vor.u32 %v4097_v27, %v4094_v29  ;;  %v4120_v11 = vshrl.u32 %v4055_v30, 16  ;;  %5159 = vmatprep.subr.bf16.mxu1 %v6478_v18  ;;  %v4103_v5 = vrot.slane %v4101_v12, 5  ;;  %v4281_v29 = vld [vmem:[#allocation2 + $0x10] sm:$0xe]  ;;  %v4282_v35 = vld [vmem:[#allocation2 + $0x18] sm:$0xe] }
 0x23a   : > { %v4090_v49 = vsel %vm6104_vm2, %v4085_v37, %v4089_v23  ;;  %v4111_v55 = vrot.slane %v4109_v38, 5  ;;  %v4123_v45 = vshll.u32 %v4055_v30, 16  ;;  %v4129_v22 = vshll.u32 %v6487_v39, 16  ;;  %v4283_v61 = vld [vmem:[#allocation2 + $0x20] sm:$0xe] }
 0x23b   : > { %v4856_v21 = vcombine.low %v4076_v56, %v4090_v49  ;;  %v4099_v3 = vrot.slane %v4098_v15, 4  ;;  %v4122_v6 = vrot.slane %v4120_v11, 4  ;;  %v4134_v58 = vshrl.u32 %v4057_v44, 16  ;;  %v4284_v38 = vld [vmem:[#allocation2 + $0x28] sm:$0xe] }
 0x23c   : > { %v4112_v63 = vor.u32 %v4111_v55, %v4108_v36  ;;  %v4125_v16 = vrot.slane %v4123_v45, 5  ;;  %v4137_v4 = vshll.u32 %v4057_v44, 16  ;;  %v4117_v54 = vrot.slane %v4115_v42, 5  ;;  %v4285_v11 = vld [vmem:[#allocation2 + $0x30] sm:$0xe] }
 0x23d   : > { %5271 = vmatprep.mubr.msk.bf16.mxu0 %vm1590_vm12, %v4856_v21  ;;  %v4699_v0 = vcombine.low %v6409_v32, %v6411_v40  ;;  %v4143_v14 = vshll.u32 %v6493_v46, 16  ;;  %v4148_v1 = vshrl.u32 %v4059_v53, 16  ;;  %v4136_v8 = vrot.slane %v4134_v58, 4 }
 0x23e   : > { %v4113_v2 = vrot.slane %v4112_v63, 4  ;;  %v4126_v7 = vor.u32 %v4125_v16, %v4122_v6  ;;  %v4139_v9 = vrot.slane %v4137_v4, 5  ;;  %v4104_v12 = vsel %vm6104_vm2, %v4099_v3, %v4103_v5  ;;  %v6523_v63 = vld [vmem:[#allocation9 + $0x28] sm:$0xff]  }
 0x23f   : > { %5146 = vmatmul.mubr.msk.bf16.gmra.mrb[4].mxu1 %vm1590_vm12, %v4699_v0  ;;  %v4150_v19 = vrot.slane %v4148_v1, 4  ;;  %v4151_v13 = vshll.u32 %v4059_v53, 16  ;;  %v2177_v32 = vshll.u32 %v6288_v47, 16  ;;  %v4131_v30 = vrot.slane %v4129_v22, 5  ;;  %v4286_v53 = vld [vmem:[#allocation2 + $0x38] sm:$0xe] }
 0x240   : > { %v4118_v40 = vsel %vm6104_vm2, %v4113_v2, %v4117_v54  ;;  %v4127_v25 = vrot.slane %v4126_v7, 4  ;;  %v4140_v33 = vor.u32 %v4139_v9, %v4136_v8  ;;  %5151 = vmatprep.mubr.msk.bf16.mxu1 %vm1590_vm12, %v5556_v26  ;;  %v4145_v37 = vrot.slane %v4143_v14, 5  ;;  %v5558_v54 = vld [vmem:[#allocation2 + $0x18] ss:$8 sps:$4 sm:$0xff]   ;;  %v1895_v1 = vld [vmem:[#allocation2 + $0x10] sm:$0xf] }
 0x241   : > { %v4857_v27 = vcombine.low %v4104_v12, %v4118_v40  ;;  %v4153_v23 = vrot.slane %v4151_v13, 5  ;;  %v4157_v36 = vshll.u32 %v6503_v10, 16  ;;  %v4865_v42 = vrot.slane %v4281_v29, 9  ;;  %v2287_v47 = vld [vmem:[#allocation2 + $0x28] sm:$0xe] }
 0x242   : > { %v4132_v56 = vsel %vm6104_vm2, %v4127_v25, %v4131_v30  ;;  %v4141_v15 = vrot.slane %v4140_v33, 4  ;;  %v4307_v44 = vrot.slane %v6444_v41, 5  ;;  %v4866_v5 = vrot.slane %v4282_v35, 9  ;;  %v1893_v41 = vld [vmem:[#allocation2 + $0x8] sm:$0xf] }
 0x243   : > { %5272 = vmatmul.mubr.msk.bf16.vlgmr.msra.gmra.mrb[8].mxu0 %vm1590_vm12, %v4857_v27  ;;  %v4154_v49 = vor.u32 %v4153_v23, %v4150_v19  ;;  %v4311_v55 = vrot.slane %v6449_v20, 5  ;;  %v4867_v45 = vrot.slane %v4283_v61, 9  ;;  %v4315_v3 = vrot.slane %v6468_v57, 5  ;;  %v1894_v20 = vld [vmem:[#allocation2 + $0xc] sm:$0x1] }
 0x244   : > { %v4146_v21 = vsel %vm6104_vm2, %v4141_v15, %v4145_v37  ;;  %5280 = vmatpush3.bf16.msra.mxu0 %v6433_v43  ;;  %v4868_v6 = vrot.slane %v4284_v38, 9  ;;  %v4319_v22 = vrot.slane %v6482_v17, 5  ;;  %v4159_v4 = vrot.slane %v4157_v36, 5  ;;  %v5559_v43 = vld [vmem:[#allocation2 + $0x28] ss:$8 sps:$4 sm:$0xff]  }
 0x245   : > { %v4858_v16 = vcombine.low %v4132_v56, %v4146_v21  ;;  %v4155_v58 = vrot.slane %v4154_v49, 4  ;;  %v2174_v0 = vor.u32 %v6461_v31, %v6360_v34  ;;  %v4308_v14 = vsel %vm6326_vm13, %v4865_v42, %v4307_v44  ;;  %v1896_v19 = vld [vmem:[#allocation2 + $0x14] sm:$0x1]  ;;  %v1897_v30 = vld [vmem:[#allocation2 + $0x18] sm:$0xf] }
 0x246   : > { %v6531_v57 = vsel %vm6326_vm13, %v4868_v6, %v4319_v22  ;;  %v4869_v17 = vrot.slane %v4285_v11, 9  ;;  %v4323_v26 = vrot.slane %v6487_v39, 5  ;;  %v4870_v7 = vrot.slane %v4286_v53, 9  ;;  %v4287_v37 = vld [vmem:[#allocation2 + $0x40] sm:$0xe] }
 0x247   : > { %5275 = vmatprep.mubr.msk.bf16.mxu0 %vm1590_vm12, %v4858_v16  ;;  %v4160_v2 = vsel %vm6104_vm2, %v4155_v58, %v4159_v4  ;;  %5152 = vmatmul.mubr.msk.bf16.vlgmr.msra.gmra.mrb[0].mxu1 %vm1590_vm12, %v5558_v54  ;;  %v4327_v8 = vrot.slane %v6493_v46, 5  ;;  %v1910_v9 = vshrl.u32 %v1893_v41, 16  ;;  %v4312_v12 = vsel %vm6326_vm13, %v4866_v5, %v4311_v55  ;;  %v1899_v23 = vld [vmem:[#allocation2 + $0x20] sm:$0xf]  ;;  %v1898_v56 = vld [vmem:[#allocation2 + $0x1c] sm:$0x1] }
 0x248   : > { %5160 = vmatpush3.bf16.msra.mxu1 %v6478_v18  ;;  %5155 = vmatprep.mubr.msk.bf16.mxu1 %vm1590_vm12, %v5559_v43  ;;  %v4316_v39 = vsel %vm6326_vm13, %v4867_v45, %v4315_v3  ;;  %v1913_v13 = vshll.u32 %v1893_v41, 16  ;;  %v1919_v29 = vshll.u32 %v1894_v20, 16  ;;  %v4859_v46 = vcombine.low %v4160_v2, %v4174_v59  ;;  %v5561_v36 = vld [vmem:[#allocation2 + $0x38] ss:$8 sps:$4 sm:$0xff]   ;;  %v1900_v44 = vld [vmem:[#allocation2 + $0x24] sm:$0x1] }
 0x249   : > { %v1912_v40 = vrot.slane %v1910_v9, 4  ;;  %v1924_v25 = vshrl.u32 %v1895_v1, 16  ;;  %v1927_v18 = vshll.u32 %v1895_v1, 16  ;;  %5169 = vmatprep.subr.bf16.mxu1 %v6523_v63  ;;  %v4873_v33 = vcombine.low %v4308_v14, %v4312_v12  ;;  %v1901_v21 = vld [vmem:[#allocation2 + $0x28] sm:$0xf] }
 0x24a   : > { %v4874_v35 = vcombine.low %v4316_v39, %v6531_v57  ;;  %v4324_v61 = vsel %vm6326_vm13, %v4869_v17, %v4323_v26  ;;  %v1915_v27 = vrot.slane %v1913_v13, 5  ;;  %v4328_v51 = vsel %vm6326_vm13, %v4870_v7, %v4327_v8  ;;  %v1903_v57 = vld [vmem:[#allocation2 + $0x30] sm:$0xf]  ;;  %v1902_v2 = vld [vmem:[#allocation2 + $0x2c] sm:$0x1] }
 0x24b   : > { %5276 = vmatmul.mubr.msk.bf16.gmra.mrb[12].mxu0 %vm1590_vm12, %v4859_v46  ;;  %v1926_v52 = vrot.slane %v1924_v25, 4  ;;  %v1929_v59 = vrot.slane %v1927_v18, 5  ;;  %v1933_v38 = vshll.u32 %v1896_v19, 16  ;;  %v1921_v42 = vrot.slane %v1919_v29, 5  ;;  %v1905_v8 = vld [vmem:[#allocation2 + $0x38] sm:$0xf] }
 0x24c   : > { %5281 = vmatprep.mubr.msk.bf16.mxu0 %vm1590_vm12, %v4873_v33  ;;  %v1916_v15 = vor.u32 %v1915_v27, %v1912_v40  ;;  %v1938_v11 = vshrl.u32 %v1897_v30, 16  ;;  %v1941_v49 = vshll.u32 %v1897_v30, 16  ;;  %v4871_v55 = vrot.slane %v4287_v37, 9  ;;  %v1904_v46 = vld [vmem:[#allocation2 + $0x34] sm:$0x1] }
 0x24d   : > { %v1930_v5 = vor.u32 %v1929_v59, %v1926_v52  ;;  %v4331_v45 = vrot.slane %v6503_v10, 5  ;;  %v1952_v53 = vshrl.u32 %v1899_v23, 16  ;;  %v1947_v41 = vshll.u32 %v1898_v56, 16 }
 0x24e   : > { %v1917_v3 = vrot.slane %v1916_v15, 4  ;;  %v1940_v6 = vrot.slane %v1938_v11, 4  ;;  %v1943_v22 = vrot.slane %v1941_v49, 5  ;;  %v1935_v58 = vrot.slane %v1933_v38, 5  ;;  %v1906_v38 = vld [vmem:[#allocation2 + $0x3c] sm:$0x1] }
 0x24f   : > { %5156 = vmatmul.mubr.msk.bf16.gmra.mrb[4].mxu1 %vm1590_vm12, %v5561_v36  ;;  %v1931_v16 = vrot.slane %v1930_v5, 4  ;;  %v1954_v4 = vrot.slane %v1952_v53, 4  ;;  %v1955_v54 = vshll.u32 %v1899_v23, 16  ;;  %v4875_v20 = vcombine.low %v4324_v61, %v4328_v51  ;;  %v1907_v61 = vld [vmem:[#allocation2 + $0x40] sm:$0xf]  ;;  %v6574_v5 = vld [vmem:[#allocation9 + $0x8] sm:$0xff]  }
 0x250   : > { %v1944_v14 = vor.u32 %v1943_v22, %v1940_v6  ;;  %v1961_v43 = vshll.u32 %v1900_v44, 16  ;;  %v1966_v17 = vshrl.u32 %v1901_v21, 16  ;;  %v1922_v10 = vsel %vm6104_vm2, %v1917_v3, %v1921_v42  ;;  %v1908_v44 = vld [vmem:[#allocation2 + $0x44] sm:$0x1]  ;;  %v2283_v3 = vld [vmem:[#allocation2 + $0x8] sm:$0xe] }
 0x251   : > { %v1936_v26 = vsel %vm6104_vm2, %v1931_v16, %v1935_v58  ;;  %v1957_v1 = vrot.slane %v1955_v54, 5  ;;  %v1969_v7 = vshll.u32 %v1901_v21, 16  ;;  %v4332_v12 = vsel %vm6326_vm13, %v4871_v55, %v4331_v45 }
 0x252   : > { %v4714_v9 = vcombine.low %v1922_v10, %v1936_v26  ;;  %v1949_v39 = vrot.slane %v1947_v41, 5  ;;  %v1968_v19 = vrot.slane %v1966_v17, 4  ;;  %v1945_v13 = vrot.slane %v1944_v14, 4  ;;  %v2284_v17 = vld [vmem:[#allocation2 + $0x10] sm:$0xe] }
 0x253   : > { %5282 = vmatmul.mubr.msk.bf16.vlgmr.msra.gmra.mrb[8].mxu0 %vm1590_vm12, %v4874_v35  ;;  %v1958_v29 = vor.u32 %v1957_v1, %v1954_v4  ;;  %v1971_v40 = vrot.slane %v1969_v7, 5  ;;  %v1980_v25 = vshrl.u32 %v1903_v57, 16  ;;  %v1963_v18 = vrot.slane %v1961_v43, 5 }
 0x254   : > { %5285 = vmatprep.mubr.msk.bf16.mxu0 %vm1590_vm12, %v4875_v20  ;;  %5161 = vmatprep.mubr.msk.bf16.mxu1 %vm1590_vm12, %v4714_v9  ;;  %v1975_v30 = vshll.u32 %v1902_v2, 16  ;;  %v1983_v33 = vshll.u32 %v1903_v57, 16  ;;  %v1994_v27 = vshrl.u32 %v1905_v8, 16  ;;  %v1997_v51 = vshll.u32 %v1905_v8, 16  ;;  %v6582_v57 = vld [vmem:[#allocation2 + $0x14] sm:$0x1] }
 0x255   : > { %v1959_v37 = vrot.slane %v1958_v29, 4  ;;  %v1972_v23 = vor.u32 %v1971_v40, %v1968_v19  ;;  %v1982_v36 = vrot.slane %v1980_v25, 4  ;;  %v4876_v35 = vcombine.low %v4332_v12, %v6457_v24  ;;  %v6576_v24 = vld [vmem:[#allocation2 + $0xc] sm:$0x1]  ;;  %v6589_v9 = vld [vmem:[#allocation2 + $0x1c] sm:$0x1] }
 0x256   : > { %v1985_v52 = vrot.slane %v1983_v33, 5  ;;  %v1989_v59 = vshll.u32 %v1904_v46, 16  ;;  %v1996_v56 = vrot.slane %v1994_v27, 4  ;;  %v1950_v15 = vsel %vm6104_vm2, %v1945_v13, %v1949_v39  ;;  %v2285_v13 = vld [vmem:[#allocation2 + $0x18] sm:$0xe] }
 0x257   : > { %v1964_v42 = vsel %vm6104_vm2, %v1959_v37, %v1963_v18  ;;  %v1999_v11 = vrot.slane %v1997_v51, 5  ;;  %v2008_v49 = vshrl.u32 %v1907_v61, 16  ;;  %v1973_v45 = vrot.slane %v1972_v23, 4  ;;  %v6614_v25 = vld [vmem:[#allocation2 + $0x24] sm:$0x1] }
 0x258   : > { %v4715_v55 = vcombine.low %v1950_v15, %v1964_v42  ;;  %v1986_v53 = vor.u32 %v1985_v52, %v1982_v36  ;;  %v2011_v21 = vshll.u32 %v1907_v61, 16  ;;  %v1977_v6 = vrot.slane %v1975_v30, 5  ;;  %v6616_v18 = vld [vmem:[#allocation2 + $0x2c] sm:$0x1]  ;;  %v2155_v30 = vld [vmem:[#allocation2 + $0x10] sm:$0xf] }
 0x259   : > { %v2000_v22 = vor.u32 %v1999_v11, %v1996_v56  ;;  %v2003_v41 = vshll.u32 %v1906_v38, 16  ;;  %v2010_v16 = vrot.slane %v2008_v49, 4  ;;  %v1991_v4 = vrot.slane %v1989_v59, 5  ;;  %v2157_v27 = vld [vmem:[#allocation2 + $0x18] sm:$0xf] }
 0x25a   : > { %5162 = vmatmul.mubr.msk.bf16.vlgmr.msra.gmra.mrb[0].mxu1 %vm1590_vm12, %v4715_v55  ;;  %v1987_v58 = vrot.slane %v1986_v53, 4  ;;  %v2013_v54 = vrot.slane %v2011_v21, 5  ;;  %v2017_v20 = vshll.u32 %v1908_v44, 16  ;;  %v4725_v14 = vrot.slane %v2283_v3, 9  ;;  %v6625_v36 = vld [vmem:[#allocation2 + $0x34] sm:$0x1] }
 0x25b   : > { %5286 = vmatmul.mubr.msk.bf16.gmra.mrb[12].mxu0 %vm1590_vm12, %v4876_v35  ;;  %5170 = vmatpush3.bf16.msra.mxu1 %v6523_v63  ;;  %v2315_v43 = vrot.slane %v6576_v24, 5  ;;  %v1978_v10 = vsel %vm6104_vm2, %v1973_v45, %v1977_v6  ;;  %v2001_v1 = vrot.slane %v2000_v22, 4  ;;  %v2005_v8 = vrot.slane %v2003_v41, 5  ;;  %v2288_v51 = vld [vmem:[#allocation2 + $0x30] sm:$0xe] }
 0x25c   : > { %v1992_v26 = vsel %vm6104_vm2, %v1987_v58, %v1991_v4  ;;  %v2014_v2 = vor.u32 %v2013_v54, %v2010_v16  ;;  %5179 = vmatprep.subr.bf16.mxu1 %v6574_v5  ;;  %v6594_v63 = vrot.slane %v2174_v0, 4  ;;  %v6598_v12 = vrot.slane %v2177_v32, 5  ;;  %v2153_v32 = vld [vmem:[#allocation2 + $0x8] sm:$0xf]  ;;  %v6629_v56 = vld [vmem:[#allocation2 + $0x3c] sm:$0x1] }
 0x25d   : > { %v4716_v7 = vcombine.low %v1978_v10, %v1992_v26  ;;  %v2019_v19 = vrot.slane %v2017_v20, 5  ;;  %v4726_v29 = vrot.slane %v2284_v17, 9  ;;  %v2319_v46 = vrot.slane %v6582_v57, 5  ;;  %v2289_v15 = vld [vmem:[#allocation2 + $0x38] sm:$0xe] }
 0x25e   : > { %v2015_v39 = vrot.slane %v2014_v2, 4  ;;  %v2312_v34 = vsel %vm6326_vm13, %v4724_v60, %v2311_v62  ;;  %v2316_v31 = vsel %vm6326_vm13, %v4725_v14, %v2315_v43  ;;  %v2006_v0 = vsel %vm6104_vm2, %v2001_v1, %v2005_v8  ;;  %v2286_v62 = vld [vmem:[#allocation2 + $0x20] sm:$0xe]  ;;  %v2161_v41 = vld [vmem:[#allocation2 + $0x28] sm:$0xf] }
 0x25f   : > { %5165 = vmatprep.mubr.msk.bf16.mxu1 %vm1590_vm12, %v4716_v7  ;;  %v4727_v33 = vrot.slane %v2285_v13, 9  ;;  %v2323_v60 = vrot.slane %v6589_v9, 5  ;;  %v2180_v61 = vsel %vm6104_vm2, %v6594_v63, %v6598_v12  ;;  %v4732_v37 = vcombine.low %v2312_v34, %v2316_v31  ;;  %v2159_v53 = vld [vmem:[#allocation2 + $0x20] sm:$0xf]  ;;  %v6644_v13 = vld [vmem:[#allocation9 + $0x48] sm:$0xff]  }
 0x260   : > { %v2020_v40 = vsel %vm6104_vm2, %v2015_v39, %v2019_v19  ;;  %v2320_v23 = vsel %vm6326_vm13, %v4726_v29, %v2319_v46  ;;  %v2182_v35 = vshrl.u32 %v2153_v32, 16  ;;  %v2185_v52 = vshll.u32 %v2153_v32, 16  ;;  %v2163_v29 = vld [vmem:[#allocation2 + $0x30] sm:$0xf] }
 0x261   : > { %v4717_v48 = vcombine.low %v2006_v0, %v2020_v40  ;;  %v4729_v59 = vrot.slane %v2287_v47, 9  ;;  %v2331_v38 = vrot.slane %v6616_v18, 5  ;;  %v2196_v42 = vshrl.u32 %v2155_v30, 16  ;;  %v2165_v0 = vld [vmem:[#allocation2 + $0x38] sm:$0xf] }
 0x262   : > { %v2199_v44 = vshll.u32 %v2155_v30, 16  ;;  %v4728_v11 = vrot.slane %v2286_v62, 9  ;;  %v2184_v49 = vrot.slane %v2182_v35, 4  ;;  %v2187_v55 = vrot.slane %v2185_v52, 5 }
 0x263   : > { %5166 = vmatmul.mubr.msk.bf16.gmra.mrb[4].mxu1 %vm1590_vm12, %v4717_v48  ;;  %v2210_v45 = vshrl.u32 %v2157_v27, 16  ;;  %v2324_v21 = vsel %vm6326_vm13, %v4727_v33, %v2323_v60  ;;  %v2327_v3 = vrot.slane %v6614_v25, 5  ;;  %v4730_v6 = vrot.slane %v2288_v51, 9 }
 0x264   : > { %5171 = vmatprep.mubr.msk.bf16.mxu1 %vm1590_vm12, %v4732_v37  ;;  %v2335_v22 = vrot.slane %v6625_v36, 5  ;;  %v2188_v16 = vor.u32 %v2187_v55, %v2184_v49  ;;  %v2198_v58 = vrot.slane %v2196_v42, 4  ;;  %v2201_v4 = vrot.slane %v2199_v44, 5 }
 0x265   : > { %v2213_v54 = vshll.u32 %v2157_v27, 16  ;;  %v2332_v20 = vsel %vm6326_vm13, %v4729_v59, %v2331_v38  ;;  %v4731_v14 = vrot.slane %v2289_v15, 9  ;;  %v2224_v43 = vshrl.u32 %v2159_v53, 16  ;;  %v2534_v27 = vld [vmem:[#allocation2 + $0x8] sm:$0xf] }
 0x266   : > { %v2227_v17 = vshll.u32 %v2159_v53, 16  ;;  %v2339_v10 = vrot.slane %v6629_v56, 5  ;;  %v2212_v26 = vrot.slane %v2210_v45, 4  ;;  %v2238_v2 = vshrl.u32 %v2161_v41, 16 }
 0x267   : > { %v2215_v1 = vrot.slane %v2213_v54, 5  ;;  %v4733_v7 = vcombine.low %v2320_v23, %v2324_v21  ;;  %v2328_v8 = vsel %vm6326_vm13, %v4728_v11, %v2327_v3  ;;  %v2336_v39 = vsel %vm6326_vm13, %v4730_v6, %v2335_v22  ;;  %v2536_v11 = vld [vmem:[#allocation2 + $0x10] sm:$0xf] }
 0x268   : > { %v2191_v19 = vshll.u32 %v6576_v24, 16  ;;  %v4734_v46 = vcombine.low %v2328_v8, %v2332_v20  ;;  %v2189_v34 = vrot.slane %v2188_v16, 4  ;;  %v2202_v31 = vor.u32 %v2201_v4, %v2198_v58 }
 0x269   : > { %v2205_v32 = vshll.u32 %v6582_v57, 16  ;;  %v2226_v40 = vrot.slane %v2224_v43, 4  ;;  %v2229_v47 = vrot.slane %v2227_v17, 5  ;;  %v2240_v30 = vrot.slane %v2238_v2, 4 }
 0x26a   : > { %v2241_v48 = vshll.u32 %v2161_v41, 16  ;;  %v2340_v24 = vsel %vm6326_vm13, %v4731_v14, %v2339_v10  ;;  %v2216_v33 = vor.u32 %v2215_v1, %v2212_v26  ;;  %v2252_v60 = vshrl.u32 %v2163_v29, 16  ;;  %v2538_v41 = vld [vmem:[#allocation2 + $0x18] sm:$0xf]  ;;  %v6671_v26 = vld [vmem:[#allocation2 + $0xc] sm:$0x1] }
 0x26b   : > { %5172 = vmatmul.mubr.msk.bf16.vlgmr.msra.gmra.mrb[8].mxu1 %vm1590_vm12, %v4733_v7  ;;  %v2255_v62 = vshll.u32 %v2163_v29, 16  ;;  %v4735_v37 = vcombine.low %v2336_v39, %v2340_v24  ;;  %v2193_v57 = vrot.slane %v2191_v19, 5  ;;  %v2266_v51 = vshrl.u32 %v2165_v0, 16  ;;  %v6674_v39 = vld [vmem:[#allocation2 + $0x14] sm:$0x1] }
 0x26c   : > { %5180 = vmatpush3.bf16.msra.mxu1 %v6574_v5  ;;  %5175 = vmatprep.mubr.msk.bf16.mxu1 %vm1590_vm12, %v4734_v46  ;;  %v2243_v23 = vrot.slane %v2241_v48, 5  ;;  %v2203_v35 = vrot.slane %v2202_v31, 4  ;;  %v2207_v52 = vrot.slane %v2205_v32, 5  ;;  %v2219_v59 = vshll.u32 %v6589_v9, 16  ;;  %v2540_v9 = vld [vmem:[#allocation2 + $0x20] sm:$0xf] }
 0x26d   : > { %5189 = vmatprep.subr.bf16.mxu1 %v6644_v13  ;;  %v2233_v5 = vshll.u32 %v6614_v25, 16  ;;  %v2194_v38 = vsel %vm6104_vm2, %v2189_v34, %v2193_v57  ;;  %v2230_v15 = vor.u32 %v2229_v47, %v2226_v40  ;;  %v2247_v44 = vshll.u32 %v6616_v18, 16  ;;  %v2544_v24 = vld [vmem:[#allocation2 + $0x30] sm:$0xf] }
 0x26e   : > { %v2244_v42 = vor.u32 %v2243_v23, %v2240_v30  ;;  %v2217_v49 = vrot.slane %v2216_v33, 4  ;;  %v2254_v55 = vrot.slane %v2252_v60, 4  ;;  %v2257_v45 = vrot.slane %v2255_v62, 5  ;;  %v6681_v62 = vld [vmem:[#allocation9 + $0x68] sm:$0xff]  }
 0x26f   : > { %v2269_v53 = vshll.u32 %v2165_v0, 16  ;;  %v2268_v3 = vrot.slane %v2266_v51, 4  ;;  %v2551_v6 = vshrl.u32 %v2534_v27, 16  ;;  %v2554_v22 = vshll.u32 %v2534_v27, 16  ;;  %v2542_v0 = vld [vmem:[#allocation2 + $0x28] sm:$0xf] }
 0x270   : > { %v2245_v21 = vrot.slane %v2244_v42, 4  ;;  %v4741_v25 = vcombine.low %v2180_v61, %v2194_v38  ;;  %v2221_v16 = vrot.slane %v2219_v59, 5  ;;  %v2565_v18 = vshrl.u32 %v2536_v11, 16 }
 0x271   : > { %v2271_v58 = vrot.slane %v2269_v53, 5  ;;  %v2208_v4 = vsel %vm6104_vm2, %v2203_v35, %v2207_v52  ;;  %v2231_v54 = vrot.slane %v2230_v15, 4  ;;  %v2235_v20 = vrot.slane %v2233_v5, 5  ;;  %v6684_v35 = vld [vmem:[#allocation2 + $0x24] sm:$0x1] }
 0x272   : > { %v2249_v14 = vrot.slane %v2247_v44, 5  ;;  %v2222_v43 = vsel %vm6104_vm2, %v2217_v49, %v2221_v16  ;;  %v2258_v17 = vor.u32 %v2257_v45, %v2254_v55  ;;  %v2553_v10 = vrot.slane %v2551_v6, 4  ;;  %v2546_v44 = vld [vmem:[#allocation2 + $0x38] sm:$0xf]  ;;  %v2548_v53 = vld [vmem:[#allocation2 + $0x40] sm:$0xf] }
 0x273   : > { %5176 = vmatmul.mubr.msk.bf16.gmra.mrb[12].mxu1 %vm1590_vm12, %v4735_v37  ;;  %v2556_v63 = vrot.slane %v2554_v22, 5  ;;  %v2272_v61 = vor.u32 %v2271_v58, %v2268_v3  ;;  %v2567_v1 = vrot.slane %v2565_v18, 4  ;;  %v2568_v2 = vshll.u32 %v2536_v11, 16  ;;  %v6691_v6 = vld [vmem:[#allocation2 + $0x34] sm:$0x1] }
 0x274   : > { %5181 = vmatprep.mubr.msk.bf16.mxu1 %vm1590_vm12, %v4741_v25  ;;  %v2250_v12 = vsel %vm6104_vm2, %v2245_v21, %v2249_v14  ;;  %v4742_v7 = vcombine.low %v2208_v4, %v2222_v43  ;;  %v2261_v8 = vshll.u32 %v6625_v36, 16  ;;  %v2579_v19 = vshrl.u32 %v2538_v41, 16  ;;  %v6697_v25 = vld [vmem:[#allocation2 + $0x1c] sm:$0x1]  ;;  %v6700_v18 = vld [vmem:[#allocation2 + $0x2c] sm:$0x1] }
 0x275   : > { %v2593_v29 = vshrl.u32 %v2540_v9, 16  ;;  %v2236_v46 = vsel %vm6104_vm2, %v2231_v54, %v2235_v20  ;;  %v2275_v34 = vshll.u32 %v6629_v56, 16  ;;  %v2570_v31 = vrot.slane %v2568_v2, 5 }
 0x276   : > { %v2582_v32 = vshll.u32 %v2538_v41, 16  ;;  %v4743_v40 = vcombine.low %v2236_v46, %v2250_v12  ;;  %v2259_v47 = vrot.slane %v2258_v17, 4  ;;  %v2557_v30 = vor.u32 %v2556_v63, %v2553_v10 }
 0x277   : > { %v2560_v48 = vshll.u32 %v6671_v26, 16  ;;  %v2273_v33 = vrot.slane %v2272_v61, 4  ;;  %v2571_v36 = vor.u32 %v2570_v31, %v2567_v1  ;;  %v2574_v60 = vshll.u32 %v6674_v39, 16 }
 0x278   : > { %v2596_v27 = vshll.u32 %v2540_v9, 16  ;;  %v2581_v37 = vrot.slane %v2579_v19, 4  ;;  %v2595_v57 = vrot.slane %v2593_v29, 4  ;;  %v2607_v23 = vshrl.u32 %v2542_v0, 16 }
 0x279   : > { %v2610_v56 = vshll.u32 %v2542_v0, 16  ;;  %v2572_v51 = vrot.slane %v2571_v36, 4  ;;  %v2584_v52 = vrot.slane %v2582_v32, 5  ;;  %v2621_v5 = vshrl.u32 %v2544_v24, 16 }
 0x27a   : > { %v2598_v59 = vrot.slane %v2596_v27, 5  ;;  %v2263_v38 = vrot.slane %v2261_v8, 5  ;;  %v2277_v15 = vrot.slane %v2275_v34, 5  ;;  %v2562_v42 = vrot.slane %v2560_v48, 5 }
 0x27b   : > { %5182 = vmatmul.mubr.msk.bf16.vlgmr.msra.gmra.mrb[8].mxu1 %vm1590_vm12, %v4742_v7  ;;  %v2558_v11 = vrot.slane %v2557_v30, 4  ;;  %v2576_v49 = vrot.slane %v2574_v60, 5  ;;  %v2609_v55 = vrot.slane %v2607_v23, 4  ;;  %v2612_v45 = vrot.slane %v2610_v56, 5 }
 0x27c   : > { %5190 = vmatpush3.bf16.msra.mxu1 %v6644_v13  ;;  %5185 = vmatprep.mubr.msk.bf16.mxu1 %vm1590_vm12, %v4743_v40  ;;  %v2264_v21 = vsel %vm6104_vm2, %v2259_v47, %v2263_v38  ;;  %v2599_v3 = vor.u32 %v2598_v59, %v2595_v57  ;;  %v2623_v13 = vrot.slane %v2621_v5, 4  ;;  %v2624_v22 = vshll.u32 %v2544_v24, 16  ;;  %v6709_v47 = vld [vmem:[#allocation2 + $0x44] sm:$0x1]  ;;  %v2768_v5 = vld [vmem:[#allocation2 + $0x8] sm:$0xe] }
 0x27d   : > { %5199 = vmatprep.subr.bf16.mxu1 %v6681_v62  ;;  %v2278_v41 = vsel %vm6104_vm2, %v2273_v33, %v2277_v15  ;;  %v2577_v9 = vsel %vm6104_vm2, %v2572_v51, %v2576_v49  ;;  %v2585_v16 = vor.u32 %v2584_v52, %v2581_v37  ;;  %v2602_v58 = vshll.u32 %v6684_v35, 16  ;;  %v6713_v33 = vld [vmem:[#allocation2 + $0x3c] sm:$0x1]  ;;  %v2769_v37 = vld [vmem:[#allocation2 + $0x10] sm:$0xe] }
 0x27e   : > { %v2626_v4 = vrot.slane %v2624_v22, 5  ;;  %v2635_v54 = vshrl.u32 %v2546_v44, 16  ;;  %v2638_v20 = vshll.u32 %v2546_v44, 16  ;;  %v2649_v14 = vshrl.u32 %v2548_v53, 16  ;;  %v6723_v38 = vld [vmem:[#allocation9 + $0x30] sm:$0xff]  }
 0x27f   : > { %v4744_v43 = vcombine.low %v2264_v21, %v2278_v41  ;;  %v2563_v17 = vsel %vm6104_vm2, %v2558_v11, %v2562_v42  ;;  %v2613_v10 = vor.u32 %v2612_v45, %v2609_v55  ;;  %v2630_v63 = vshll.u32 %v6691_v6, 16  ;;  %v2771_v49 = vld [vmem:[#allocation2 + $0x20] sm:$0xe] }
 0x280   : > { %v4750_v12 = vcombine.low %v2563_v17, %v2577_v9  ;;  %v2588_v61 = vshll.u32 %v6697_v25, 16  ;;  %v2600_v1 = vrot.slane %v2599_v3, 4  ;;  %v2627_v2 = vor.u32 %v2626_v4, %v2623_v13  ;;  %v6730_v3 = vld [vmem:[#allocation2 + $0x10] sm:$0xf]  ;;  %v2770_v13 = vld [vmem:[#allocation2 + $0x18] sm:$0xe] }
 0x281   : > { %v2586_v7 = vrot.slane %v2585_v16, 4  ;;  %v2616_v8 = vshll.u32 %v6700_v18, 16  ;;  %v2651_v19 = vrot.slane %v2649_v14, 4  ;;  %v2652_v29 = vshll.u32 %v2548_v53, 16  ;;  %v6737_v9 = vld [vmem:[#allocation2 + $0x8] sm:$0xf] }
 0x282   : > { %v2604_v46 = vrot.slane %v2602_v58, 5  ;;  %v2628_v34 = vrot.slane %v2627_v2, 4  ;;  %v2637_v31 = vrot.slane %v2635_v54, 4  ;;  %v2640_v32 = vrot.slane %v2638_v20, 5  ;;  %v2773_v4 = vld [vmem:[#allocation2 + $0x30] sm:$0xe] }
 0x283   : > { %5186 = vmatmul.mubr.msk.bf16.gmra.mrb[12].mxu1 %vm1590_vm12, %v4744_v43  ;;  %v2614_v0 = vrot.slane %v2613_v10, 4  ;;  %v2632_v40 = vrot.slane %v2630_v63, 5  ;;  %v2654_v30 = vrot.slane %v2652_v29, 5  ;;  %v2590_v48 = vrot.slane %v2588_v61, 5 }
 0x284   : > { %5191 = vmatprep.mubr.msk.bf16.mxu1 %vm1590_vm12, %v4750_v12  ;;  %v2605_v24 = vsel %vm6104_vm2, %v2600_v1, %v2604_v46  ;;  %v2618_v36 = vrot.slane %v2616_v8, 5  ;;  %v2641_v23 = vor.u32 %v2640_v32, %v2637_v31  ;;  %v2658_v56 = vshll.u32 %v6709_v47, 16  ;;  %v6757_v31 = vld [vmem:[#allocation2 + $0x30] sm:$0xf] }
 0x285   : > { %v2633_v60 = vsel %vm6104_vm2, %v2628_v34, %v2632_v40  ;;  %v2655_v27 = vor.u32 %v2654_v30, %v2651_v19  ;;  %v2591_v57 = vsel %vm6104_vm2, %v2586_v7, %v2590_v48  ;;  %v2644_v59 = vshll.u32 %v6713_v33, 16  ;;  %v2774_v7 = vld [vmem:[#allocation2 + $0x38] sm:$0xe]  ;;  %v2775_v34 = vld [vmem:[#allocation2 + $0x40] sm:$0xe] }
 0x286   : > { %v4751_v51 = vcombine.low %v2591_v57, %v2605_v24  ;;  %v2619_v52 = vsel %vm6104_vm2, %v2614_v0, %v2618_v36  ;;  %v4760_v44 = vrot.slane %v2769_v37, 9  ;;  %v2798_v11 = vrot.slane %v6674_v39, 5  ;;  %v6761_v30 = vld [vmem:[#allocation2 + $0x18] sm:$0xf]  ;;  %v2966_v24 = vld [vmem:[#allocation2 + $0x14] sm:$0x1] }
 0x287   : > { %v4752_v15 = vcombine.low %v2619_v52, %v2633_v60  ;;  %v2656_v42 = vrot.slane %v2655_v27, 4  ;;  %v2642_v55 = vrot.slane %v2641_v23, 4  ;;  %v2660_v45 = vrot.slane %v2658_v56, 5  ;;  %v6767_v27 = vld [vmem:[#allocation2 + $0x28] sm:$0xf] }
 0x288   : > { %v4759_v53 = vrot.slane %v2768_v5, 9  ;;  %v2794_v21 = vrot.slane %v6671_v26, 5  ;;  %v2646_v22 = vrot.slane %v2644_v59, 5  ;;  %v2799_v41 = vsel %vm6326_vm13, %v4760_v44, %v2798_v11  ;;  %v2965_v52 = vld [vmem:[#allocation2 + $0xc] sm:$0x1]  ;;  %v6776_v11 = vld [vmem:[#allocation9 + $0x10] sm:$0xff]  }
 0x289   : > { %v2661_v39 = vsel %vm6104_vm2, %v2656_v42, %v2660_v45  ;;  %v4762_v16 = vrot.slane %v2771_v49, 9  ;;  %v2806_v58 = vrot.slane %v6684_v35, 5  ;;  %v2988_v26 = vshrl.u32 %v6730_v3, 16 }
 0x28a   : > { %v2991_v54 = vshll.u32 %v6730_v3, 16  ;;  %v2647_v20 = vsel %vm6104_vm2, %v2642_v55, %v2646_v22  ;;  %v2795_v14 = vsel %vm6326_vm13, %v4759_v53, %v2794_v21  ;;  %v4761_v43 = vrot.slane %v2770_v13, 9 }
 0x28b   : > { %5192 = vmatmul.mubr.msk.bf16.vlgmr.msra.gmra.mrb[8].mxu1 %vm1590_vm12, %v4751_v51  ;;  %v4753_v17 = vcombine.low %v2647_v20, %v2661_v39  ;;  %v2802_v10 = vrot.slane %v6697_v25, 5  ;;  %v2974_v63 = vshrl.u32 %v6737_v9, 16  ;;  %v2977_v12 = vshll.u32 %v6737_v9, 16  ;;  %v6754_v25 = vld [vmem:[#allocation2 + $0x20] sm:$0xf] }
 0x28c   : > { %5200 = vmatpush3.bf16.msra.mxu1 %v6681_v62  ;;  %5195 = vmatprep.mubr.msk.bf16.mxu1 %vm1590_vm12, %v4752_v15  ;;  %v2772_v62 = vld [vmem:[#allocation2 + $0x28] sm:$0xe]  ;;  %v4767_v35 = vcombine.low %v2795_v14, %v2799_v41  ;;  %v2810_v1 = vrot.slane %v6700_v18, 5  ;;  %v4764_v2 = vrot.slane %v2773_v4, 9  ;;  %v2807_v8 = vsel %vm6326_vm13, %v4762_v16, %v2806_v58  ;;  %v2968_v58 = vld [vmem:[#allocation2 + $0x24] sm:$0x1] }
 0x28d   : > { %5209 = vmatprep.subr.bf16.mxu1 %v6723_v38  ;;  %v4763_v61 = vrot.slane %v2772_v62, 9  ;;  %v2814_v19 = vrot.slane %v6691_v6, 5  ;;  %v2990_v29 = vrot.slane %v2988_v26, 4  ;;  %v2993_v46 = vrot.slane %v2991_v54, 5  ;;  %v6782_v62 = vld [vmem:[#allocation2 + $0x40] sm:$0xf] }
 0x28e   : > { %v2803_v18 = vsel %vm6326_vm13, %v4761_v43, %v2802_v10  ;;  %v4765_v32 = vrot.slane %v2774_v7, 9  ;;  %v2976_v0 = vrot.slane %v2974_v63, 4  ;;  %v2979_v40 = vrot.slane %v2977_v12, 5  ;;  %v6789_v43 = vld [vmem:[#allocation2 + $0x38] sm:$0xf] }
 0x28f   : > { %v4768_v48 = vcombine.low %v2803_v18, %v2807_v8  ;;  %v2811_v6 = vsel %vm6326_vm13, %v4763_v61, %v2810_v1  ;;  %v3016_v36 = vshrl.u32 %v6754_v25, 16  ;;  %v3019_v60 = vshll.u32 %v6754_v25, 16  ;;  %v2970_v63 = vld [vmem:[#allocation2 + $0x34] sm:$0x1] }
 0x290   : > { %v2815_v37 = vsel %vm6326_vm13, %v4764_v2, %v2814_v19  ;;  %v4766_v57 = vrot.slane %v2775_v34, 9  ;;  %v2994_v23 = vor.u32 %v2993_v46, %v2990_v29  ;;  %v3044_v56 = vshrl.u32 %v6757_v31, 16  ;;  %v2969_v29 = vld [vmem:[#allocation2 + $0x2c] sm:$0x1] }
 0x291   : > { %v2822_v51 = vrot.slane %v6709_v47, 5  ;;  %v3002_v59 = vshrl.u32 %v6761_v30, 16  ;;  %v3005_v5 = vshll.u32 %v6761_v30, 16  ;;  %v3047_v15 = vshll.u32 %v6757_v31, 16 }
 0x292   : > { %v2980_v42 = vor.u32 %v2979_v40, %v2976_v0  ;;  %v2997_v44 = vshll.u32 %v2966_v24, 16  ;;  %v3030_v49 = vshrl.u32 %v6767_v27, 16  ;;  %v3033_v55 = vshll.u32 %v6767_v27, 16 }
 0x293   : > { %5196 = vmatmul.mubr.msk.bf16.gmra.mrb[12].mxu1 %vm1590_vm12, %v4753_v17  ;;  %v4769_v45 = vcombine.low %v2811_v6, %v2815_v37  ;;  %v2818_v53 = vrot.slane %v6713_v33, 5  ;;  %v3018_v21 = vrot.slane %v3016_v36, 4  ;;  %v3021_v47 = vrot.slane %v3019_v60, 5 }
 0x294   : > { %5201 = vmatprep.mubr.msk.bf16.mxu1 %vm1590_vm12, %v4767_v35  ;;  %v2983_v13 = vshll.u32 %v2965_v52, 16  ;;  %v2995_v22 = vrot.slane %v2994_v23, 4  ;;  %v3046_v39 = vrot.slane %v3044_v56, 4  ;;  %v3049_v41 = vrot.slane %v3047_v15, 5 }
 0x295   : > { %v2823_v16 = vsel %vm6326_vm13, %v4766_v57, %v2822_v51  ;;  %v3004_v4 = vrot.slane %v3002_v59, 4  ;;  %v3007_v33 = vrot.slane %v3005_v5, 5  ;;  %v2981_v26 = vrot.slane %v2980_v42, 4  ;;  %v2972_v5 = vld [vmem:[#allocation2 + $0x44] sm:$0x1] }
 0x296   : > { %v2999_v54 = vrot.slane %v2997_v44, 5  ;;  %v3032_v20 = vrot.slane %v3030_v49, 4  ;;  %v3035_v14 = vrot.slane %v3033_v55, 5  ;;  %v2819_v17 = vsel %vm6326_vm13, %v4765_v32, %v2818_v53 }
 0x297   : > { %v3022_v10 = vor.u32 %v3021_v47, %v3018_v21  ;;  %v3072_v12 = vshrl.u32 %v6782_v62, 16  ;;  %v3075_v35 = vshll.u32 %v6782_v62, 16  ;;  %v4770_v61 = vcombine.low %v2819_v17, %v2823_v16  ;;  %v3804_v17 = vld [vmem:[#allocation2 + $0x38] sm:$0xe] }
 0x298   : > { %v2985_v1 = vrot.slane %v2983_v13, 5  ;;  %v3000_v2 = vsel %vm6104_vm2, %v2995_v22, %v2999_v54  ;;  %v3050_v7 = vor.u32 %v3049_v41, %v3046_v39  ;;  %v3008_v8 = vor.u32 %v3007_v33, %v3004_v4  ;;  %v5569_v39 = vld [vmem:[#allocation9 + $0x50] sm:$0xff]  }
 0x299   : > { %v3025_v19 = vshll.u32 %v2968_v58, 16  ;;  %v3058_v46 = vshrl.u32 %v6789_v43, 16  ;;  %v3061_v34 = vshll.u32 %v6789_v43, 16  ;;  %v3036_v0 = vor.u32 %v3035_v14, %v3032_v20 }
 0x29a   : > { %v2986_v18 = vsel %vm6104_vm2, %v2981_v26, %v2985_v1  ;;  %v3053_v40 = vshll.u32 %v2970_v63, 16  ;;  %v3023_v6 = vrot.slane %v3022_v10, 4  ;;  %v3074_v24 = vrot.slane %v3072_v12, 4  ;;  %v3805_v10 = vld [vmem:[#allocation2 + $0x40] sm:$0xe] }
 0x29b   : > { %5202 = vmatmul.mubr.msk.bf16.vlgmr.msra.gmra.mrb[8].mxu1 %vm1590_vm12, %v4768_v48  ;;  %v4785_v48 = vcombine.low %v2986_v18, %v3000_v2  ;;  %v3077_v36 = vrot.slane %v3075_v35, 5  ;;  %v3039_v60 = vshll.u32 %v2969_v29, 16  ;;  %v3051_v37 = vrot.slane %v3050_v7, 4  ;;  %v5578_v63 = vld [vmem:[#allocation2 + $0x3c] sm:$0x1] }
 0x29c   : > { %5210 = vmatpush3.bf16.msra.mxu1 %v6723_v38  ;;  %5205 = vmatprep.mubr.msk.bf16.mxu1 %vm1590_vm12, %v4769_v45  ;;  %v2967_v38 = vld [vmem:[#allocation2 + $0x1c] sm:$0x1]  ;;  %v3009_v57 = vrot.slane %v3008_v8, 4  ;;  %v3027_v23 = vrot.slane %v3025_v19, 5  ;;  %v3060_v56 = vrot.slane %v3058_v46, 4  ;;  %v3063_v51 = vrot.slane %v3061_v34, 5 }
 0x29d   : > { %5219 = vmatprep.subr.bf16.mxu1 %v6776_v11  ;;  %v3011_v32 = vshll.u32 %v2967_v38, 16  ;;  %v3037_v52 = vrot.slane %v3036_v0, 4  ;;  %v3055_v59 = vrot.slane %v3053_v40, 5  ;;  %v3078_v44 = vor.u32 %v3077_v36, %v3074_v24  ;;  %v2971_v45 = vld [vmem:[#allocation2 + $0x3c] sm:$0x1]  ;;  %v5574_v8 = vld [vmem:[#allocation9 + $0x70] sm:$0xff]  }
 0x29e   : > { %v3028_v42 = vsel %vm6104_vm2, %v3023_v6, %v3027_v23  ;;  %v3041_v49 = vrot.slane %v3039_v60, 5  ;;  %v3064_v21 = vor.u32 %v3063_v51, %v3060_v56  ;;  %v3081_v47 = vshll.u32 %v2972_v5, 16  ;;  %v5579_v12 = vld [vmem:[#allocation2 + $0x44] sm:$0x1]  ;;  %v3409_v19 = vld [vmem:[#allocation2 + $0x10] sm:$0xf] }
 0x29f   : > { %v3013_v15 = vrot.slane %v3011_v32, 5  ;;  %v3056_v55 = vsel %vm6104_vm2, %v3051_v37, %v3055_v59  ;;  %v3067_v16 = vshll.u32 %v2971_v45, 16  ;;  %v3079_v58 = vrot.slane %v3078_v44, 4  ;;  %v3411_v18 = vld [vmem:[#allocation2 + $0x18] sm:$0xf] }
 0x2a0   : > { %v3042_v22 = vsel %vm6104_vm2, %v3037_v52, %v3041_v49  ;;  %v3065_v4 = vrot.slane %v3064_v21, 4  ;;  %v3083_v33 = vrot.slane %v3081_v47, 5  ;;  %v4794_v38 = vcombine.low %v6737_v9, %v6730_v3  ;;  %v3415_v6 = vld [vmem:[#allocation2 + $0x28] sm:$0xf]  ;;  %v3417_v37 = vld [vmem:[#allocation2 + $0x30] sm:$0xf] }
 0x2a1   : > { %v3014_v53 = vsel %vm6104_vm2, %v3009_v57, %v3013_v15  ;;  %v4787_v41 = vcombine.low %v3042_v22, %v3056_v55  ;;  %v3069_v26 = vrot.slane %v3067_v16, 5  ;;  %v3852_v35 = vrot.slane %v5579_v12, 5  ;;  %v3413_v57 = vld [vmem:[#allocation2 + $0x20] sm:$0xf]  ;;  %v3419_v51 = vld [vmem:[#allocation2 + $0x38] sm:$0xf] }
 0x2a2   : > { %v4786_v13 = vcombine.low %v3014_v53, %v3028_v42  ;;  %v3084_v54 = vsel %vm6104_vm2, %v3079_v58, %v3083_v33  ;;  %v4837_v1 = vrot.slane %v3805_v10, 9  ;;  %v4795_v9 = vcombine.low %v6761_v30, %v6754_v25  ;;  %v5573_v30 = vld [vmem:[#allocation2 + $0x10] ss:$8 sps:$4 sm:$0xff]   ;;  %v5575_v49 = vld [vmem:[#allocation2 + $0x20] ss:$8 sps:$4 sm:$0xff]  }
 0x2a3   : > { %5206 = vmatmul.mubr.msk.bf16.gmra.mrb[12].mxu1 %vm1590_vm12, %v4770_v61  ;;  %v3070_v20 = vsel %vm6104_vm2, %v3065_v4, %v3069_v26  ;;  %v4836_v61 = vrot.slane %v3804_v17, 9  ;;  %v4796_v29 = vcombine.low %v6767_v27, %v6757_v31  ;;  %v3426_v46 = vshrl.u32 %v3409_v19, 16  ;;  %v3410_v31 = vld [vmem:[#allocation2 + $0x14] sm:$0x1]  ;;  %v3412_v27 = vld [vmem:[#allocation2 + $0x1c] sm:$0x1] }
 0x2a4   : > { %5211 = vmatprep.mubr.msk.bf16.mxu1 %vm1590_vm12, %v4785_v48  ;;  %v4788_v14 = vcombine.low %v3070_v20, %v3084_v54  ;;  %v6828_v7 = vsel %vm6326_vm13, %v4837_v1, %v3852_v35  ;;  %v3429_v34 = vshll.u32 %v3409_v19, 16  ;;  %v3440_v40 = vshrl.u32 %v3411_v18, 16  ;;  %v5576_v47 = vld [vmem:[#allocation2 + $0x30] ss:$8 sps:$4 sm:$0xff]   ;;  %v3423_v16 = vld [vmem:[#allocation2 + $0x48] sm:$0xf] }
 0x2a5   : > { %v3428_v32 = vrot.slane %v3426_v46, 4  ;;  %v3443_v48 = vshll.u32 %v3411_v18, 16  ;;  %v4797_v25 = vcombine.low %v6789_v43, %v6782_v62  ;;  %v3468_v23 = vshrl.u32 %v3415_v6, 16  ;;  %v5580_v20 = vld [vmem:[#allocation9 + $0x38] sm:$0xff]   ;;  %v3416_v17 = vld [vmem:[#allocation2 + $0x2c] sm:$0x1] }
 0x2a6   : > { %v3431_v0 = vrot.slane %v3429_v34, 5  ;;  %v3442_v36 = vrot.slane %v3440_v40, 4  ;;  %v3471_v56 = vshll.u32 %v3415_v6, 16  ;;  %v3435_v52 = vshll.u32 %v3410_v31, 16  ;;  %v3420_v34 = vld [vmem:[#allocation2 + $0x3c] sm:$0x1] }
 0x2a7   : > { %v3445_v60 = vrot.slane %v3443_v48, 5  ;;  %v3449_v59 = vshll.u32 %v3412_v27, 16  ;;  %v3482_v5 = vshrl.u32 %v3417_v37, 16  ;;  %v3485_v62 = vshll.u32 %v3417_v37, 16  ;;  %v5577_v18 = vld [vmem:[#allocation2 + $0x40] ss:$8 sps:$4 sm:$0xff]  }
 0x2a8   : > { %v3432_v24 = vor.u32 %v3431_v0, %v3428_v32  ;;  %v3454_v42 = vshrl.u32 %v3413_v57, 16  ;;  %v3457_v44 = vshll.u32 %v3413_v57, 16  ;;  %v3470_v55 = vrot.slane %v3468_v23, 4 }
 0x2a9   : > { %v3446_v15 = vor.u32 %v3445_v60, %v3442_v36  ;;  %v3473_v45 = vrot.slane %v3471_v56, 5  ;;  %v3496_v53 = vshrl.u32 %v3419_v51, 16  ;;  %v3499_v21 = vshll.u32 %v3419_v51, 16  ;;  %v3424_v36 = vld [vmem:[#allocation2 + $0x4c] sm:$0x1] }
 0x2aa   : > { %v3433_v43 = vrot.slane %v3432_v24, 4  ;;  %v3437_v22 = vrot.slane %v3435_v52, 5  ;;  %v3451_v4 = vrot.slane %v3449_v59, 5  ;;  %v3456_v33 = vrot.slane %v3454_v42, 4  ;;  %v3422_v51 = vld [vmem:[#allocation2 + $0x44] sm:$0x1] }
 0x2ab   : > { %5212 = vmatmul.mubr.msk.bf16.vlgmr.msra.gmra.mrb[16].mxu1 %vm1590_vm12, %v4786_v13  ;;  %v3421_v13 = vld [vmem:[#allocation2 + $0x40] sm:$0xf]  ;;  %v3447_v58 = vrot.slane %v3446_v15, 4  ;;  %v3459_v26 = vrot.slane %v3457_v44, 5  ;;  %v3498_v10 = vrot.slane %v3496_v53, 4  ;;  %v3527_v1 = vshll.u32 %v3423_v16, 16 }
 0x2ac   : > { %5220 = vmatpush3.bf16.msra.mxu1 %v6776_v11  ;;  %5215 = vmatprep.mubr.msk.bf16.mxu1 %vm1590_vm12, %v4787_v41  ;;  %v3848_v11 = vrot.slane %v5578_v63, 5  ;;  %v3487_v41 = vrot.slane %v3485_v62, 5  ;;  %v3438_v54 = vsel %vm6104_vm2, %v3433_v43, %v3437_v22  ;;  %v3501_v63 = vrot.slane %v3499_v21, 5  ;;  %v3802_v22 = vld [vmem:[#allocation2 + $0x28] sm:$0xe] }
 0x2ad   : > { %5229 = vmatprep.subr.bf16.mxu1 %v5569_v39  ;;  %v3510_v12 = vshrl.u32 %v3421_v13, 16  ;;  %v3513_v35 = vshll.u32 %v3421_v13, 16  ;;  %v3460_v19 = vor.u32 %v3459_v26, %v3456_v33  ;;  %v3477_v46 = vshll.u32 %v3416_v17, 16  ;;  %v5582_v33 = vld [vmem:[#allocation2 + $0x2c] sm:$0x1] }
 0x2ae   : > { %v6824_v2 = vsel %vm6326_vm13, %v4836_v61, %v3848_v11  ;;  %v3418_v11 = vld [vmem:[#allocation2 + $0x34] sm:$0x1]  ;;  %v3524_v61 = vshrl.u32 %v3423_v16, 16  ;;  %v3502_v48 = vor.u32 %v3501_v63, %v3498_v10  ;;  %v3529_v31 = vrot.slane %v3527_v1, 5 }
 0x2af   : > { %v4841_v3 = vcombine.low %v6824_v2, %v6828_v7  ;;  %v3491_v40 = vshll.u32 %v3418_v11, 16  ;;  %v3505_v24 = vshll.u32 %v3420_v34, 16  ;;  %v3461_v60 = vrot.slane %v3460_v19, 4 }
 0x2b0   : > { %v3526_v6 = vrot.slane %v3524_v61, 4  ;;  %v3479_v37 = vrot.slane %v3477_v46, 5  ;;  %v3503_v56 = vrot.slane %v3502_v48, 4  ;;  %v3533_v62 = vshll.u32 %v3424_v36, 16 }
 0x2b1   : > { %v3493_v23 = vrot.slane %v3491_v40, 5  ;;  %v3507_v15 = vrot.slane %v3505_v24, 5  ;;  %v3519_v44 = vshll.u32 %v3422_v51, 16  ;;  %v3840_v26 = vrot.slane %v5582_v33, 5 }
 0x2b2   : > { %v3535_v13 = vrot.slane %v3533_v62, 5 }
 0x2b3   : > { %5216 = vmatmul.mubr.msk.bf16.gmra.mrb[20].mxu1 %vm1590_vm12, %v4788_v14  ;;  %v3414_v14 = vld [vmem:[#allocation2 + $0x24] sm:$0x1] }
 0x2b4   : > { %5221 = vmatprep.mubr.msk.bf16.mxu1 %vm1590_vm12, %v4794_v38  ;;  %v3474_v38 = vor.u32 %v3473_v45, %v3470_v55  ;;  %v3508_v45 = vsel %vm6104_vm2, %v3503_v56, %v3507_v15 }
 0x2b6   : > { %v3475_v0 = vrot.slane %v3474_v38, 4 }
 0x2b8   : > { %v3480_v52 = vsel %vm6104_vm2, %v3475_v0, %v3479_v37 }
 0x2bb   : > { %5222 = vmatmul.mubr.msk.bf16.vlgmr.msra.gmra.mrb[16].mxu1 %vm1590_vm12, %v4795_v9 }
 0x2bc   : > { %5230 = vmatpush3.bf16.msra.mxu1 %v5569_v39  ;;  %5225 = vmatprep.mubr.msk.bf16.mxu1 %vm1590_vm12, %v4796_v29  ;;  %v3484_v39 = vrot.slane %v3482_v5, 4  ;;  %v3463_v29 = vshll.u32 %v3414_v14, 16  ;;  %v3530_v5 = vor.u32 %v3529_v31, %v3526_v6 }
 0x2bd   : > { %5239 = vmatprep.subr.bf16.mxu1 %v5574_v8 }
 0x2be   : > { %v3488_v9 = vor.u32 %v3487_v41, %v3484_v39  ;;  %v3465_v57 = vrot.slane %v3463_v29, 5  ;;  %v5581_v41 = vld [vmem:[#allocation2 + $0x34] sm:$0x1] }
 0x2bf   : > { %v3844_v16 = vrot.slane %v5581_v41, 5 }
 0x2c0   : > { %v3489_v27 = vrot.slane %v3488_v9, 4  ;;  %v3466_v42 = vsel %vm6104_vm2, %v3461_v60, %v3465_v57 }
 0x2c1   : > { %v4813_v55 = vcombine.low %v3466_v42, %v3480_v52 }
 0x2c2   : > { %v3494_v43 = vsel %vm6104_vm2, %v3489_v27, %v3493_v23 }
 0x2c3   : > { %5226 = vmatmul.mubr.msk.bf16.gmra.mrb[20].mxu1 %vm1590_vm12, %v4797_v25  ;;  %v3512_v25 = vrot.slane %v3510_v12, 4  ;;  %v4814_v53 = vcombine.low %v3494_v43, %v3508_v45 }
 0x2c4   : > { %5231 = vmatprep.mubr.msk.bf16.mxu1 %vm1590_vm12, %v5573_v30  ;;  %v3515_v30 = vrot.slane %v3513_v35, 5 }
 0x2c6   : > { %v3516_v59 = vor.u32 %v3515_v30, %v3512_v25 }
 0x2c8   : > { %v3517_v21 = vrot.slane %v3516_v59, 4 }
 0x2cb   : > { %5232 = vmatmul.mubr.msk.bf16.vlgmr.msra.gmra.mrb[16].mxu1 %vm1590_vm12, %v5575_v49  ;;  %v3803_v49 = vld [vmem:[#allocation2 + $0x30] sm:$0xe] }
 0x2cc   : > { %5240 = vmatpush3.bf16.msra.mxu1 %v5574_v8  ;;  %5235 = vmatprep.mubr.msk.bf16.mxu1 %vm1590_vm12, %v5576_v47  ;;  %v3452_v8 = vsel %vm6104_vm2, %v3447_v58, %v3451_v4  ;;  %v3531_v47 = vrot.slane %v3530_v5, 4  ;;  %v4835_v39 = vrot.slane %v3803_v49, 9  ;;  %v3521_v58 = vrot.slane %v3519_v44, 5 }
 0x2cd   : > { %5289 = vmatprep.subr.bf16.mxu1 %v5580_v20  ;;  %v4812_v32 = vcombine.low %v3438_v54, %v3452_v8  ;;  %v4834_v4 = vrot.slane %v3802_v22, 9 }
 0x2ce   : > { %v3522_v54 = vsel %vm6104_vm2, %v3517_v21, %v3521_v58  ;;  %v3536_v14 = vsel %vm6104_vm2, %v3531_v47, %v3535_v13  ;;  %v3845_v17 = vsel %vm6326_vm13, %v4835_v39, %v3844_v16 }
 0x2cf   : > { %v4815_v38 = vcombine.low %v3522_v54, %v3536_v14  ;;  %v3841_v10 = vsel %vm6326_vm13, %v4834_v4, %v3840_v26 }
 0x2d3   : > { %5236 = vmatmul.mubr.msk.bf16.gmra.mrb[20].mxu1 %vm1590_vm12, %v5577_v18 }
 0x2d4   : > { %5241 = vmatprep.mubr.msk.bf16.mxu1 %vm1590_vm12, %v4812_v32 }
 0x2db   : > { %5242 = vmatmul.mubr.msk.bf16.vlgmr.msra.gmra.mrb[16].mxu1 %vm1590_vm12, %v4813_v55 }
 0x2dc   : > { %5290 = vmatpush3.bf16.msra.mxu1 %v5580_v20  ;;  %5245 = vmatprep.mubr.msk.bf16.mxu1 %vm1590_vm12, %v4814_v53  ;;  %v4840_v20 = vcombine.low %v3841_v10, %v3845_v17 }
 0x2e3   : > { %5246 = vmatmul.mubr.msk.bf16.gmra.mrb[20].mxu1 %vm1590_vm12, %v4815_v38 }
 0x2e4   : > { %5255 = vmatprep.mubr.msk.bf16.mxu1 %vm1590_vm12, %v4840_v20 }
 0x2eb   : > { %5256 = vmatmul.mubr.msk.bf16.vlgmr.msra.gmra.mrb[24].mxu1 %vm1590_vm12, %v4841_v3 }
 0x326   : > { %v5283_v63 = vpop.f32.mrb[8].mxu0 }
 0x327   : > { %v4452_v11 = vadd.f32 %v5283_v63, %v6875_v28  ;;  %v4404_v12 = vpop.f32.mrb[9].mxu0 }
 0x328   : > { %v4450_v50 = vadd.f32 %v6875_v28, %v4404_v12  ;;  %v5284_v35 = vpop.f32.mrb[10].mxu0 }
 0x329   : > { %4885 = vst.msk [vmem:[%s6879_s26 + $0xd0] sm:$0xff] %vm2142_vm14, %v4452_v11  ;;  %v4453_v2 = vadd.f32 %v5284_v35, %v6875_v28  ;;  %v4407_v7 = vpop.f32.mrb[11].mxu0 }
 0x32a   : > { %4883 = vst.msk [vmem:[%s6879_s26 + $0xc0] sm:$0xff] %vm2142_vm14, %v4450_v50  ;;  %v4451_v3 = vadd.f32 %v6875_v28, %v4407_v7 }
 0x32b   : > { %4886 = vst.msk [vmem:[%s6879_s26 + $0xd8] sm:$0xff] %vm2142_vm14, %v4453_v2 }
 0x32c   : > { %4884 = vst.msk [vmem:[%s6879_s26 + $0xc8] sm:$0xff] %vm2142_vm14, %v4451_v3 }
 0x32d   : > { %v5163_v61 = vpop.f32.mrb[0].mxu1 }
 0x32e   : > { %v6891_v1 = vpop.f32.mrb[12].mxu0  ;;  %v2136_v9 = vadd.f32 %v5163_v61, %v6875_v28  ;;  %v2088_v8 = vpop.f32.mrb[1].mxu1 }
 0x32f   : > { %v6894_v19 = vpop.f32.mrb[13].mxu0  ;;  %v2134_v29 = vadd.f32 %v6875_v28, %v2088_v8  ;;  %v5164_v46 = vpop.f32.mrb[2].mxu1 }
 0x330   : > { %2145 = vst.msk [vmem:[%s6879_s26 + $0x10] sm:$0xff] %vm2142_vm14, %v2136_v9  ;;  %v6899_v34 = vpop.f32.mrb[14].mxu0  ;;  %v2137_v18 = vadd.f32 %v5164_v46, %v6875_v28  ;;  %v2091_v32 = vpop.f32.mrb[3].mxu1 }
 0x331   : > { %2143 = vst.msk [vmem:[%s6879_s26] sm:$0xff] %vm2142_vm14, %v2134_v29  ;;  %v6904_v0 = vpop.f32.mrb[15].mxu0  ;;  %v2135_v40 = vadd.f32 %v6875_v28, %v2091_v32 }
 0x332   : > { %2146 = vst.msk [vmem:[%s6879_s26 + $0x18] sm:$0xff] %vm2142_vm14, %v2137_v18 }
 0x333   : > { %2144 = vst.msk [vmem:[%s6879_s26 + $0x8] sm:$0xff] %vm2142_vm14, %v2135_v40 }
 0x336   : > { %v5167_v48 = vpop.f32.mrb[4].mxu1 }
 0x337   : > { %v2140_v25 = vadd.f32 %v5167_v48, %v6875_v28  ;;  %v2104_v30 = vpop.f32.mrb[5].mxu1 }
 0x338   : > { %v2138_v6 = vadd.f32 %v6875_v28, %v2104_v30  ;;  %v5168_v31 = vpop.f32.mrb[6].mxu1 }
 0x339   : > { %2149 = vst.msk [vmem:[%s6879_s26 + $0x30] sm:$0xff] %vm2142_vm14, %v2140_v25  ;;  %v2141_v27 = vadd.f32 %v5168_v31, %v6875_v28  ;;  %v2107_v24 = vpop.f32.mrb[7].mxu1 }
 0x33a   : > { %2147 = vst.msk [vmem:[%s6879_s26 + $0x20] sm:$0xff] %vm2142_vm14, %v2138_v6  ;;  %v2139_v36 = vadd.f32 %v6875_v28, %v2107_v24 }
 0x33b   : > { %2150 = vst.msk [vmem:[%s6879_s26 + $0x38] sm:$0xff] %vm2142_vm14, %v2141_v27 }
 0x33c   : > { %2148 = vst.msk [vmem:[%s6879_s26 + $0x28] sm:$0xff] %vm2142_vm14, %v2139_v36 }
 0x36e   : > { %v5203_v60 = vpop.f32.mrb[8].mxu1 }
 0x36f   : > { %v2939_v37 = vadd.f32 %v5203_v60, %v6875_v28  ;;  %v2891_v57 = vpop.f32.mrb[9].mxu1 }
 0x370   : > { %v2937_v23 = vadd.f32 %v6875_v28, %v2891_v57  ;;  %v5204_v56 = vpop.f32.mrb[10].mxu1 }
 0x371   : > { %4779 = vst.msk [vmem:[%s6879_s26 + $0x50] sm:$0xff] %vm2142_vm14, %v2939_v37  ;;  %v2940_v51 = vadd.f32 %v5204_v56, %v6875_v28  ;;  %v2894_v52 = vpop.f32.mrb[11].mxu1 }
 0x372   : > { %4777 = vst.msk [vmem:[%s6879_s26 + $0x40] sm:$0xff] %vm2142_vm14, %v2937_v23  ;;  %v2938_v59 = vadd.f32 %v6875_v28, %v2894_v52 }
 0x373   : > { %4780 = vst.msk [vmem:[%s6879_s26 + $0x58] sm:$0xff] %vm2142_vm14, %v2940_v51 }
 0x374   : > { %4778 = vst.msk [vmem:[%s6879_s26 + $0x48] sm:$0xff] %vm2142_vm14, %v2938_v59 }
 0x376   : > { %v5207_v5 = vpop.f32.mrb[12].mxu1 }
 0x377   : > { %v2943_v62 = vadd.f32 %v5207_v5, %v6875_v28  ;;  %v2907_v43 = vpop.f32.mrb[13].mxu1 }
 0x378   : > { %v2941_v15 = vadd.f32 %v6875_v28, %v2907_v43  ;;  %v5208_v42 = vpop.f32.mrb[14].mxu1 }
 0x379   : > { %4783 = vst.msk [vmem:[%s6879_s26 + $0x70] sm:$0xff] %vm2142_vm14, %v2943_v62  ;;  %v2944_v44 = vadd.f32 %v5208_v42, %v6875_v28  ;;  %v2910_v49 = vpop.f32.mrb[15].mxu1 }
 0x37a   : > { %4781 = vst.msk [vmem:[%s6879_s26 + $0x60] sm:$0xff] %vm2142_vm14, %v2941_v15  ;;  %v2942_v55 = vadd.f32 %v6875_v28, %v2910_v49 }
 0x37b   : > { %4784 = vst.msk [vmem:[%s6879_s26 + $0x78] sm:$0xff] %vm2142_vm14, %v2944_v44 }
 0x37c   : > { %4782 = vst.msk [vmem:[%s6879_s26 + $0x68] sm:$0xff] %vm2142_vm14, %v2942_v55 }
 0x3ae   : > { %v5243_v45 = vpop.f32.mrb[16].mxu1 }
 0x3af   : > { %v3652_v53 = vadd.f32 %v5243_v45, %v6875_v28  ;;  %v3604_v21 = vpop.f32.mrb[17].mxu1 }
 0x3b0   : > { %v3650_v47 = vadd.f32 %v6875_v28, %v3604_v21  ;;  %v5244_v13 = vpop.f32.mrb[18].mxu1 }
 0x3b1   : > { %4824 = vst.msk [vmem:[%s6879_s26 + $0x90] sm:$0xff] %vm2142_vm14, %v3652_v53  ;;  %v3653_v22 = vadd.f32 %v5244_v13, %v6875_v28  ;;  %v3607_v39 = vpop.f32.mrb[19].mxu1 }
 0x3b2   : > { %4822 = vst.msk [vmem:[%s6879_s26 + $0x80] sm:$0xff] %vm2142_vm14, %v3650_v47  ;;  %v3651_v41 = vadd.f32 %v6875_v28, %v3607_v39 }
 0x3b3   : > { %4825 = vst.msk [vmem:[%s6879_s26 + $0x98] sm:$0xff] %vm2142_vm14, %v3653_v22 }
 0x3b4   : > { %4823 = vst.msk [vmem:[%s6879_s26 + $0x88] sm:$0xff] %vm2142_vm14, %v3651_v41 }
 0x3b6   : > { %v5247_v16 = vpop.f32.mrb[20].mxu1 }
 0x3b7   : > { %v3656_v58 = vadd.f32 %v5247_v16, %v6875_v28  ;;  %v3620_v4 = vpop.f32.mrb[21].mxu1 }
 0x3b8   : > { %v3654_v33 = vadd.f32 %v6875_v28, %v3620_v4  ;;  %v5248_v26 = vpop.f32.mrb[22].mxu1 }
 0x3b9   : > { %4828 = vst.msk [vmem:[%s6879_s26 + $0xb0] sm:$0xff] %vm2142_vm14, %v3656_v58  ;;  %v3657_v54 = vadd.f32 %v5248_v26, %v6875_v28  ;;  %v3623_v14 = vpop.f32.mrb[23].mxu1 }
 0x3ba   : > { %4826 = vst.msk [vmem:[%s6879_s26 + $0xa0] sm:$0xff] %vm2142_vm14, %v3654_v33  ;;  %v3655_v17 = vadd.f32 %v6875_v28, %v3623_v14 }
 0x3bb   : > { %4829 = vst.msk [vmem:[%s6879_s26 + $0xb8] sm:$0xff] %vm2142_vm14, %v3657_v54 }
 0x3bc   : > { %4827 = vst.msk [vmem:[%s6879_s26 + $0xa8] sm:$0xff] %vm2142_vm14, %v3655_v17 }
 0x3be   : > { %v5257_v38 = vpop.f32.mrb[24].mxu1 }
 0x3bf   : > { %v5291_v10 = vadd.f32 %v6891_v1, %v5257_v38  ;;  %v3937_v20 = vpop.f32.mrb[25].mxu1 }
 0x3c0   : > { %v5292_v63 = vadd.f32 %v6894_v19, %v3937_v20  ;;  %v5258_v11 = vpop.f32.mrb[26].mxu1 }
 0x3c1   : > { %v4456_v12 = vadd.f32 %v5291_v10, %v6875_v28  ;;  %v5293_v50 = vadd.f32 %v6899_v34, %v5258_v11  ;;  %v3940_v35 = vpop.f32.mrb[27].mxu1 }
 0x3c2   : > { %v4454_v2 = vadd.f32 %v5292_v63, %v6875_v28  ;;  %v5294_v7 = vadd.f32 %v6904_v0, %v3940_v35 }
 0x3c3   : > { %4889 = vst.msk [vmem:[%s6879_s26 + $0xf0] sm:$0xff] %vm2142_vm14, %v4456_v12  ;;  %v4457_v3 = vadd.f32 %v5293_v50, %v6875_v28 }
 0x3c4   : > { %4887 = vst.msk [vmem:[%s6879_s26 + $0xe0] sm:$0xff] %vm2142_vm14, %v4454_v2  ;;  %v4455_v61 = vadd.f32 %v5294_v7, %v6875_v28 }
 0x3c5   : > { %4890 = vst.msk [vmem:[%s6879_s26 + $0xf8] sm:$0xff] %vm2142_vm14, %v4457_v3 }
 0x3c6   : > { %4888 = vst.msk [vmem:[%s6879_s26 + $0xe8] sm:$0xff] %vm2142_vm14, %v4455_v61 }
 0x3c7   : > { %5738 = shalt.err (!%p5735_p13)
}
 0x3c8   : > { %s5739_s30 = scalar_lea.hbm %s6985_s17, 4096  ;;  %s5743_s16 = scalar_lea.hbm %s7043_s5, 8192 }
 0x3c9   : > { %p5740_p9 = scmp.ne.s32.totalorder %s6985_s17, %s5739_s30  ;;  %p5744_p6 = scmp.lt.u32.totalorder %s6985_s17, %s7043_s5 }
 0x3ca   : > { %p5745_p4 = scmp.lt.u32.totalorder %s5743_s16, %s5739_s30  ;;  %p5747_p3 = scmp.lt.u32.totalorder %s5739_s30, %s6985_s17 }
 0x3cb   : > { %p5741_p0 = pnand %p5740_p9, %p6007_p10 }
 0x3cc   : > { %p5746_p8 = por %p5745_p4, %p5744_p6 }
 0x3cd   : > { %p5742_p11 = pneg %p5741_p0 }
 0x3ce   : > { %p5748_p5 = por %p5747_p3, %p5746_p8 }
 0x3d0   : > { %p5749_p7 = pnand %p5748_p5, %p5742_p11 }
 0x3d2   : > { %5752 = shalt.err (!%p5749_p7)
}
 0x3d3   : > { %s5810_s27 = smov 128   ;;  %s5811_s8 = smov 8  }
 0x3d4   : > { %5432 = dma.vmem_to_hbm [thread:$0]  (%p6007_p10), %s6987_s13, 4096, %s6985_s17, %s4468_s22, %s5810_s27, %s5810_s27, %s5811_s8  }
 0x3d5 PF: > { %s4496_s28 = sand.u32 1, %s5787_s18   ;;  %p7073_p12 = scmp.ne.s32.totalorder %s7049_s25, 0 }
 0x3d6   : > { %p7074_p1 = scmp.ge.s32.totalorder %s5799_s21, 2  ;;  %s4497_s11 = scalar_lea.sflag [#allocation5], %s4496_s28 }
 0x3d8   : > { %p5452_p2 = pnand %p7074_p1, %p7073_p12 }
 0x3da   : > { %5782 = dma.done.wait (!%p5452_p2), %s4497_s11, 4096  }
 0x3db   : > { %5784 = vsyncadd (!%p5452_p2), %s4497_s11, 4294963200  ;;  %p20_p13 = scmp.ge.s32.totalorder %s5997_s14, 4   ;;  %s7075_s18 = smov %s5791_s19 }
 0x3dc   : > { %s7076_s19 = smov %s5795_s20  ;;  %s7077_s20 = smov %s6013_s10 }
 0x3dd   : > { %s7078_s21 = smov %s5997_s14  ;;  %22 = sbr.rel (!%p20_p13) target bundleno = 7 (0x7), region = 126 }
 0x3e4   :  { %4502 = vsyncpa [#allocation4], 1 }
 0x3e5   :  { %4504 = vsyncpa [#allocation4 + $0x1], 1 }
 0x3e6   :  { %4505 = vsyncpa [#allocation7], 1 }
 0x3e7   :  { %4506 = vsyncpa [#allocation10], 1 }
 0x3e8   :  { %4507 = vsyncpa [#allocation5], 1 }
 0x3e9   :  { %4509 = vsyncpa [#allocation5 + $0x1], 1 }

</bundles_post_ra>
